<compile_context>
chip_gen: v5e
topology: v5e:2x2
jax: 0.10.0
libtpu: 0.0.40
codegen_flags: <defaults>
</compile_context>

<pallas_src>
import jax
import jax.numpy as jnp
from jax.experimental import pallas as pl
from jax.experimental.pallas import tpu as pltpu

EPS = 1e-5


def _fused_kernel(x_ref, s_ref, w_ref, gb_ref, o_ref):
    # x_ref:  (Cin, P)    f32  channels-major activations, P = N*H*W
    # s_ref:  (1, Cin)    bf16 per-input-channel scale (x363), folded into W
    # w_ref:  (Cout, Cin) bf16 1x1 conv weight in natural OI layout
    # gb_ref: (Cout, 2)   f32  column 0 = gamma, column 1 = beta
    # o_ref:  (Cout, P)
    #
    # Fold the per-Cin broadcast multiply into the (small) weight tile:
    #   (x * s) . W^T  ==  (W * diag(s)) . x
    # bf16 operands are upcast once so the fold and the contraction run in f32.
    w_scaled = (w_ref[...].astype(jnp.float32) *
                s_ref[...].astype(jnp.float32))               # (Cout, Cin) VPU
    y = jnp.dot(w_scaled, x_ref[...],
                preferred_element_type=jnp.float32)           # (Cout, P)  MXU

    # Training-mode BatchNorm2d: batch statistics per output channel over
    # N*H*W (axis 1), centered two-pass, all in f32 (v5e-safe epilogue).
    inv_p = 1.0 / y.shape[1]
    mean = jnp.sum(y, axis=1, keepdims=True) * inv_p          # (Cout, 1)
    d = y - mean
    var = jnp.sum(d * d, axis=1, keepdims=True) * inv_p       # biased variance
    gamma = gb_ref[:, 0:1]                                    # (Cout, 1)
    beta = gb_ref[:, 1:2]                                     # (Cout, 1)
    scale = jax.lax.rsqrt(var + EPS) * gamma                  # (Cout, 1)
    o_ref[...] = (d * scale + beta).astype(o_ref.dtype)       # single FMA/elem


def fused_mul_conv1x1_bn(x_nchw, scale_nc11, weight_oi11, gamma, beta,
                         out_dtype=jnp.float32):
    """x_nchw*(scale) -> 1x1 conv (no bias) -> training-mode BN, fused.

    out_dtype may be jnp.bfloat16 if the downstream consumer accepts it
    (halves output writeback); defaults to f32 for bit-comparable validation.
    """
    N, Cin, H, W = x_nchw.shape
    Cout = weight_oi11.shape[0]
    P = N * H * W

    # Channels-major glue: for N == 1 this is a free reshape (no extra XLA
    # transposes / HBM round trips around the kernel).
    if N == 1:
        x_cm = x_nchw.reshape(Cin, P)
    else:
        x_cm = jnp.transpose(x_nchw, (1, 0, 2, 3)).reshape(Cin, P)

    # bf16 weight + scale: largest single HBM-traffic cut that leaves the
    # activation precision untouched; upcast happens once inside the kernel.
    s2d = scale_nc11.reshape(1, Cin).astype(jnp.bfloat16)
    w2d = weight_oi11.reshape(Cout, Cin).astype(jnp.bfloat16)   # OIHW 1x1 -> OI
    gb2d = jnp.stack([gamma.astype(jnp.float32),
                      beta.astype(jnp.float32)], axis=1)        # (Cout, 2)

    out_bytes = jnp.dtype(out_dtype).itemsize * Cout * P
    cost = pl.CostEstimate(
        flops=2 * P * Cin * Cout + 6 * Cout * P,   # matmul + BN epilogue
        transcendentals=Cout,                      # rsqrt per output channel
        bytes_accessed=(4 * Cin * P                # x   (f32)
                        + 2 * Cin * Cout           # W   (bf16)
                        + 2 * Cin                  # s   (bf16)
                        + 4 * 2 * Cout             # gamma/beta (f32)
                        + out_bytes),
    )

    # Whole-problem single block (no grid): total padded VMEM ~1.3 MiB,
    # far under the scoped limit on every TPU generation.
    out_cm = pl.pallas_call(
        _fused_kernel,
        out_shape=jax.ShapeDtypeStruct((Cout, P), out_dtype),
        in_specs=[pl.BlockSpec(memory_space=pltpu.MemorySpace.VMEM)] * 4,
        out_specs=pl.BlockSpec(memory_space=pltpu.MemorySpace.VMEM),
        cost_estimate=cost,
    )(x_cm, s2d, w2d, gb2d)

    # (Cout, P) -> NCHW.  Free reshape for N == 1.
    if N == 1:
        return out_cm.reshape(1, Cout, H, W)
    return jnp.transpose(out_cm.reshape(Cout, N, H, W), (1, 0, 2, 3))


def reference(x_nchw, scale_nc11, weight_oi11, gamma, beta):
    """Plain-JAX reference with the module's forward semantics."""
    x = x_nchw * scale_nc11
    y = jax.lax.conv_general_dilated(
        x, weight_oi11, window_strides=(1, 1), padding="VALID",
        dimension_numbers=("NCHW", "OIHW", "NCHW"))
    mean = jnp.mean(y, axis=(0, 2, 3), keepdims=True)
    var = jnp.mean((y - mean) ** 2, axis=(0, 2, 3), keepdims=True)
    return (y - mean) / jnp.sqrt(var + EPS) * gamma.reshape(1, -1, 1, 1) \
        + beta.reshape(1, -1, 1, 1)


if __name__ == "__main__":
    # Shapes from the module: x358 (1, 1056, 14, 14), x363 (1, 1056, 1, 1),
    # Conv2d(1056 -> 176, 1x1, bias=False), BatchNorm2d(176).
    N, Cin, H, W, Cout = 1, 1056, 14, 14, 176

    key = jax.random.PRNGKey(0)
    k1, k2, k3 = jax.random.split(key, 3)
    x358 = jax.random.normal(k1, (N, Cin, H, W), dtype=jnp.float32)
    x363 = jax.random.normal(k2, (N, Cin, 1, 1), dtype=jnp.float32)

    # Deterministic synthetic parameters (PyTorch-style init bounds / defaults).
    bound = 1.0 / (Cin ** 0.5)
    conv_w = jax.random.uniform(k3, (Cout, Cin, 1, 1), dtype=jnp.float32,
                                minval=-bound, maxval=bound)
    gamma = jnp.ones((Cout,), dtype=jnp.float32)   # BN affine defaults
    beta = jnp.zeros((Cout,), dtype=jnp.float32)

    out = jax.block_until_ready(
        fused_mul_conv1x1_bn(x358, x363, conv_w, gamma, beta))
    assert out.shape == (N, Cout, H, W), out.shape

    # (a) Kernel math check at tight tolerance: compare against a reference
    #     that uses the SAME bf16-rounded weight/scale values (isolates any
    #     kernel bug from the intended bf16 storage quantization).
    w_q = conv_w.astype(jnp.bfloat16).astype(jnp.float32)
    s_q = x363.astype(jnp.bfloat16).astype(jnp.float32)
    ref_q = reference(x358, s_q, w_q, gamma, beta)
    assert jnp.allclose(out, ref_q, atol=1e-3, rtol=1e-3), float(
        jnp.max(jnp.abs(out - ref_q)))

    # (b) End-to-end check against the exact f32 module semantics: the only
    #     remaining difference is the bf16 weight/scale quantization
    #     (~1.6e-3 RMS on the BN-normalized output for K=1056).
    ref = reference(x358, x363, conv_w, gamma, beta)
    assert jnp.allclose(out, ref, atol=1e-2, rtol=1e-2), float(
        jnp.max(jnp.abs(out - ref)))

    print("KERNEL_OK")
</pallas_src>

<mosaic_0001>
module attributes {stable_mosaic.version = 11 : i64} {
  func.func @_fused_kernel(%arg0: memref<1056x196xf32, #tpu.memory_space<vmem>>, %arg1: memref<1x1056xbf16, #tpu.memory_space<vmem>>, %arg2: memref<176x1056xbf16, #tpu.memory_space<vmem>>, %arg3: memref<176x2xf32, #tpu.memory_space<vmem>>, %arg4: memref<176x196xf32, #tpu.memory_space<vmem>>) attributes {dimension_semantics = [], scalar_prefetch = 0 : i64, scratch_operands = 0 : i64, tpu.core_type = #tpu.core_type<tc>} {
    %c0 = arith.constant 0 : index
    %c0_0 = arith.constant 0 : index
    %0 = vector.load %arg2[%c0, %c0_0] : memref<176x1056xbf16, #tpu.memory_space<vmem>>, vector<176x1056xbf16>
    %1 = arith.extf %0 : vector<176x1056xbf16> to vector<176x1056xf32>
    %c0_1 = arith.constant 0 : index
    %c0_2 = arith.constant 0 : index
    %2 = vector.load %arg1[%c0_1, %c0_2] : memref<1x1056xbf16, #tpu.memory_space<vmem>>, vector<1x1056xbf16>
    %3 = arith.extf %2 : vector<1x1056xbf16> to vector<1x1056xf32>
    %4 = vector.broadcast %3 : vector<1x1056xf32> to vector<176x1056xf32>
    %5 = arith.mulf %1, %4 : vector<176x1056xf32>
    %c0_3 = arith.constant 0 : index
    %c0_4 = arith.constant 0 : index
    %6 = vector.load %arg0[%c0_3, %c0_4] : memref<1056x196xf32, #tpu.memory_space<vmem>>, vector<1056x196xf32>
    %cst = arith.constant dense<0.000000e+00> : vector<176x196xf32>
    %7 = tpu.matmul %5, %6, %cst {dimension_numbers = #tpu.dot_dimension_numbers<[1], [0], [0], [1], [0, 0, 1, 1], [], []>} : vector<176x1056xf32>, vector<1056x196xf32>, vector<176x196xf32> -> vector<176x196xf32>
    %cst_5 = arith.constant dense<0.000000e+00> : vector<176xf32>
    %8 = vector.multi_reduction <add>, %7, %cst_5 [1] : vector<176x196xf32> to vector<176xf32>
    %9 = vector.shape_cast %8 : vector<176xf32> to vector<176x1xf32>
    %cst_6 = arith.constant 0.00510204071 : f32
    %10 = vector.broadcast %cst_6 : f32 to vector<176x1xf32>
    %11 = arith.mulf %9, %10 : vector<176x1xf32>
    %12 = vector.broadcast %11 : vector<176x1xf32> to vector<176x196xf32>
    %13 = arith.subf %7, %12 : vector<176x196xf32>
    %14 = arith.mulf %13, %13 : vector<176x196xf32>
    %cst_7 = arith.constant dense<0.000000e+00> : vector<176xf32>
    %15 = vector.multi_reduction <add>, %14, %cst_7 [1] : vector<176x196xf32> to vector<176xf32>
    %16 = vector.shape_cast %15 : vector<176xf32> to vector<176x1xf32>
    %cst_8 = arith.constant 0.00510204071 : f32
    %17 = vector.broadcast %cst_8 : f32 to vector<176x1xf32>
    %18 = arith.mulf %16, %17 : vector<176x1xf32>
    %c0_9 = arith.constant 0 : index
    %c0_10 = arith.constant 0 : index
    %19 = vector.load %arg3[%c0_9, %c0_10] : memref<176x2xf32, #tpu.memory_space<vmem>>, vector<176x1xf32>
    %c0_11 = arith.constant 0 : index
    %c1 = arith.constant 1 : index
    %20 = vector.load %arg3[%c0_11, %c1] : memref<176x2xf32, #tpu.memory_space<vmem>>, vector<176x1xf32>
    %cst_12 = arith.constant 9.99999974E-6 : f32
    %21 = vector.broadcast %cst_12 : f32 to vector<176x1xf32>
    %22 = arith.addf %18, %21 : vector<176x1xf32>
    %23 = math.rsqrt %22 : vector<176x1xf32>
    %24 = arith.mulf %23, %19 : vector<176x1xf32>
    %25 = vector.broadcast %24 : vector<176x1xf32> to vector<176x196xf32>
    %26 = arith.mulf %13, %25 : vector<176x196xf32>
    %27 = vector.broadcast %20 : vector<176x1xf32> to vector<176x196xf32>
    %28 = arith.addf %26, %27 : vector<176x196xf32>
    %c0_13 = arith.constant 0 : index
    %c0_14 = arith.constant 0 : index
    %29 = vector.load %arg4[%c0_13, %c0_14] : memref<176x196xf32, #tpu.memory_space<vmem>>, vector<176x196xf32>
    tpu.vector_store %arg4[%c0_13, %c0_14], %28 {strides = array<i32>} : memref<176x196xf32, #tpu.memory_space<vmem>>, vector<176x196xf32>,
    return
  }
}

</mosaic_0001>

<bundles_post_ra>
// kernel: tpu_custom_call.1
= control target key start
LH: loop header
LB: loop body
LE: loop exit
PB: predicated region body
PF: predicated region fallthrough
CT: control target
= control target key end

     0   :  { %s6921_s0 = inlined_call_operand.vmem [shape: f32[1056,196], index: 0, kind: input, shape index: {}]   ;;  %s6922_s1 = inlined_call_operand.vmem [shape: bf16[1,1056], index: 1, kind: input, shape index: {}]   ;;  %s6923_s2 = inlined_call_operand.vmem [shape: bf16[176,1056], index: 2, kind: input, shape index: {}]   ;;  %s6924_s3 = inlined_call_operand.vmem [shape: f32[176,2], index: 3, kind: input, shape index: {}]   ;;  %s6925_s4 = inlined_call_operand.hbm [shape: f32[176,196], index: 4, kind: output, shape index: {}]  }
   0x1   :  { %v589_v0 = vld [vmem:[%s6921_s0 + $0xf0] sm:$0xff]  ;;  %v587_v2 = vld [vmem:[%s6921_s0 + $0xe0] sm:$0xff] }
   0x2   :  { %v621_v1 = vld [vmem:[%s6921_s0 + $0x1f0] sm:$0xff]  ;;  %3393 = vmatpush.msra.mxu2 %v589_v0  ;;  %v619_v3 = vld [vmem:[%s6921_s0 + $0x1e0] sm:$0xff]  ;;  %890 = vmatpush.msra.mxu0 %v589_v0 }
   0x3   :  { %3409 = vmatpush.msra.mxu3 %v621_v1  ;;  %v585_v4 = vld [vmem:[%s6921_s0 + $0xd0] sm:$0xff]  ;;  %973 = vmatpush.msra.mxu1 %v621_v1  ;;  %v583_v6 = vld [vmem:[%s6921_s0 + $0xc0] sm:$0xff] }
   0x4   :  { %v617_v5 = vld [vmem:[%s6921_s0 + $0x1d0] sm:$0xff]  ;;  %3394 = vmatpush.msra.mxu2 %v587_v2  ;;  %v615_v7 = vld [vmem:[%s6921_s0 + $0x1c0] sm:$0xff]  ;;  %891 = vmatpush.msra.mxu0 %v587_v2 }
   0x5   :  { %3410 = vmatpush.msra.mxu3 %v619_v3  ;;  %974 = vmatpush.msra.mxu1 %v619_v3  ;;  %v581_v8 = vld [vmem:[%s6921_s0 + $0xb0] sm:$0xff]  ;;  %v579_v10 = vld [vmem:[%s6921_s0 + $0xa0] sm:$0xff] }
   0x6   :  { %3395 = vmatpush.msra.mxu2 %v585_v4  ;;  %v613_v9 = vld [vmem:[%s6921_s0 + $0x1b0] sm:$0xff]  ;;  %892 = vmatpush.msra.mxu0 %v585_v4  ;;  %v611_v11 = vld [vmem:[%s6921_s0 + $0x1a0] sm:$0xff] }
   0x7   :  { %3411 = vmatpush.msra.mxu3 %v617_v5  ;;  %975 = vmatpush.msra.mxu1 %v617_v5  ;;  %v577_v12 = vld [vmem:[%s6921_s0 + $0x90] sm:$0xff]  ;;  %v575_v14 = vld [vmem:[%s6921_s0 + $0x80] sm:$0xff] }
   0x8   :  { %3396 = vmatpush.msra.mxu2 %v583_v6  ;;  %893 = vmatpush.msra.mxu0 %v583_v6  ;;  %v609_v13 = vld [vmem:[%s6921_s0 + $0x190] sm:$0xff]  ;;  %v607_v15 = vld [vmem:[%s6921_s0 + $0x180] sm:$0xff] }
   0x9   :  { %3412 = vmatpush.msra.mxu3 %v615_v7  ;;  %976 = vmatpush.msra.mxu1 %v615_v7  ;;  %v3609_v16 = vld [vmem:[%s6922_s1] sm:$0xff]  ;;  %v573_v17 = vld [vmem:[%s6921_s0 + $0x70] sm:$0xff] }
   0xa   :  { %3397 = vmatpush.msra.mxu2 %v581_v8  ;;  %894 = vmatpush.msra.mxu0 %v581_v8  ;;  %v605_v18 = vld [vmem:[%s6921_s0 + $0x170] sm:$0xff] }
   0xb   :  { %3413 = vmatpush.msra.mxu3 %v613_v9  ;;  %977 = vmatpush.msra.mxu1 %v613_v9 }
   0xc   :  { %3398 = vmatpush.msra.mxu2 %v579_v10  ;;  %895 = vmatpush.msra.mxu0 %v579_v10 }
   0xd   :  { %3414 = vmatpush.msra.mxu3 %v611_v11  ;;  %978 = vmatpush.msra.mxu1 %v611_v11 }
   0xe   :  { %3399 = vmatpush.msra.mxu2 %v577_v12  ;;  %896 = vmatpush.msra.mxu0 %v577_v12 }
   0xf   :  { %3415 = vmatpush.msra.mxu3 %v609_v13  ;;  %979 = vmatpush.msra.mxu1 %v609_v13 }
  0x10   :  { %3400 = vmatpush.msra.mxu2 %v575_v14 }
  0x11   :  { %3416 = vmatpush.msra.mxu3 %v607_v15 }
  0x12   :  { %9 = vsyncpa [#allocation3], 0  ;;  %v571_v19 = vld [vmem:[%s6921_s0 + $0x60] sm:$0xff]  ;;  %897 = vmatpush.msra.mxu0 %v575_v14  ;;  %980 = vmatpush.msra.mxu1 %v607_v15  ;;  %v3624_v21 = vunpack.c.l.bf16 %v3609_v16  ;;  %v569_v22 = vld [vmem:[%s6921_s0 + $0x50] sm:$0xff]  ;;  %vm823_vm0 = vcmask 261120   ;;  %vm2384_vm1 = vcmask 556032  }
  0x13   :  { %v603_v20 = vld [vmem:[%s6921_s0 + $0x160] sm:$0xff]  ;;  %3401 = vmatpush.msra.mxu2 %v573_v17  ;;  %3417 = vmatpush.msra.mxu3 %v605_v18  ;;  %v601_v23 = vld [vmem:[%s6921_s0 + $0x150] sm:$0xff]  ;;  %v28_v13 = vld [vmem:[%s6923_s2 + $0x48] sm:$0xff]  ;;  %s3337_s21 = sshll.u32 %s6925_s4, 4  ;;  %s3531_s22 = smov 256   ;;  %s3338_s21 = int_to_ptr.hbm [resolvable:$true] %s3337_s21 }
  0x14   :  { %898 = vmatpush.msra.mxu0 %v573_v17  ;;  %981 = vmatpush.msra.mxu1 %v605_v18  ;;  %v567_v24 = vld [vmem:[%s6921_s0 + $0x40] sm:$0xff]  ;;  %v334_v26 = vperm.slane %v3624_v21, 0  ;;  %v335_v27 = vperm.slane %v3624_v21, 2  ;;  %v73_v28 = vld [vmem:[%s6923_s2 + $0x18c] sm:$0xff]  ;;  %v83_v2 = vld [vmem:[%s6923_s2 + $0x1d4] sm:$0xff] }
  0x15   :  { %3402 = vmatpush.msra.mxu2 %v571_v19  ;;  %3418 = vmatpush.msra.mxu3 %v603_v20  ;;  %v599_v25 = vld [vmem:[%s6921_s0 + $0x140] sm:$0xff]  ;;  %v565_v29 = vld [vmem:[%s6921_s0 + $0x30] sm:$0xff]  ;;  %v227_v33 = vunpack.c.l.bf16 %v73_v28  ;;  %v228_v35 = vunpack.c.h.bf16 %v73_v28  ;;  %v245_v7 = vunpack.c.l.bf16 %v83_v2  ;;  %v246_v8 = vunpack.c.h.bf16 %v83_v2 }
  0x16   :  { %899 = vmatpush.msra.mxu0 %v571_v19  ;;  %982 = vmatpush.msra.mxu1 %v603_v20  ;;  %v597_v30 = vld [vmem:[%s6921_s0 + $0x130] sm:$0xff]  ;;  %v563_v31 = vld [vmem:[%s6921_s0 + $0x20] sm:$0xff]  ;;  %v3655_v34 = vperm.slane %v334_v26, 0  ;;  %v3657_v36 = vperm.slane %v335_v27, 0  ;;  %v88_v26 = vld [vmem:[%s6923_s2 + $0x1f8] sm:$0xff] }
  0x17   :  { %3403 = vmatpush.msra.mxu2 %v569_v22  ;;  %3419 = vmatpush.msra.mxu3 %v601_v23  ;;  %v595_v32 = vld [vmem:[%s6921_s0 + $0x120] sm:$0xff]  ;;  %v561_v38 = vld [vmem:[%s6921_s0 + $0x10] sm:$0xff] }
  0x18   :  { %900 = vmatpush.msra.mxu0 %v569_v22  ;;  %983 = vmatpush.msra.mxu1 %v601_v23  ;;  %v18_v37 = vld [vmem:[%s6923_s2] sm:$0xff]  ;;  %v593_v39 = vld [vmem:[%s6921_s0 + $0x110] sm:$0xff]  ;;  %v3675_v42 = vmul.f32 %v3655_v34, %v227_v33  ;;  %v3678_v43 = vmul.f32 %v3657_v36, %v228_v35  ;;  %v3777_v19 = vmul.f32 %v3655_v34, %v245_v7  ;;  %v146_v22 = vunpack.c.l.bf16 %v28_v13 }
  0x19   :  { %3404 = vmatpush.msra.mxu2 %v567_v24  ;;  %3420 = vmatpush.msra.mxu3 %v599_v25  ;;  %v559_v40 = vld [vmem:[%s6921_s0] sm:$0xff]  ;;  %v128_v44 = vunpack.c.l.bf16 %v18_v37  ;;  %v129_v45 = vunpack.c.h.bf16 %v18_v37  ;;  %v78_v46 = vld [vmem:[%s6923_s2 + $0x1b0] sm:$0xff]  ;;  %v3780_v20 = vmul.f32 %v3657_v36, %v246_v8  ;;  %v147_v23 = vunpack.c.h.bf16 %v28_v13 }
  0x1a   :  { %901 = vmatpush.msra.mxu0 %v567_v24  ;;  %984 = vmatpush.msra.mxu1 %v599_v25  ;;  %v591_v41 = vld [vmem:[%s6921_s0 + $0x100] sm:$0xff]  ;;  %7138 = vst [vmem:[#allocation5_spill] sm:$0xff] %v3678_v43  ;;  %v653_v47 = vld [vmem:[%s6921_s0 + $0x2f0] sm:$0xff]  ;;  %v236_v50 = vunpack.c.l.bf16 %v78_v46  ;;  %v237_v51 = vunpack.c.h.bf16 %v78_v46  ;;  %v3808_v33 = vmul.f32 %v3655_v34, %v146_v22 }
  0x1b   :  { %3405 = vmatpush.msra.mxu2 %v565_v29  ;;  %3421 = vmatpush.msra.mxu3 %v597_v30  ;;  %v685_v48 = vld [vmem:[%s6921_s0 + $0x3f0] sm:$0xff]  ;;  %v651_v49 = vld [vmem:[%s6921_s0 + $0x2e0] sm:$0xff]  ;;  %v3698_v53 = vmul.f32 %v3655_v34, %v128_v44  ;;  %v3701_v54 = vmul.f32 %v3657_v36, %v129_v45  ;;  %7142 = vst [vmem:[#allocation9_spill] sm:$0xff] %v3777_v19 }
  0x1c   :  { %902 = vmatpush.msra.mxu0 %v565_v29  ;;  %985 = vmatpush.msra.mxu1 %v597_v30  ;;  %v683_v52 = vld [vmem:[%s6921_s0 + $0x3e0] sm:$0xff]  ;;  %v717_v56 = vld [vmem:[%s6921_s0 + $0x4f0] sm:$0xff]  ;;  %v3719_v60 = vmul.f32 %v3655_v34, %v236_v50  ;;  %v3722_v61 = vmul.f32 %v3657_v36, %v237_v51  ;;  %7143 = vst [vmem:[#allocation10_spill] sm:$0xff] %v3780_v20 }
  0x1d   :  { %3406 = vmatpush.msra.mxu2 %v563_v31  ;;  %3422 = vmatpush.msra.mxu3 %v595_v32  ;;  %7139 = vst [vmem:[#allocation6_spill] sm:$0xff] %v3701_v54  ;;  %v23_v55 = vld [vmem:[%s6923_s2 + $0x24] sm:$0xff]  ;;  %v649_v57 = vld [vmem:[%s6921_s0 + $0x2d0] sm:$0xff]  ;;  %v3811_v35 = vmul.f32 %v3657_v36, %v147_v23 }
  0x1e   :  { %903 = vmatpush.msra.mxu0 %v563_v31  ;;  %986 = vmatpush.msra.mxu1 %v595_v32  ;;  %v749_v58 = vld [vmem:[%s6921_s0 + $0x5f0] sm:$0xff]  ;;  %7140 = vst [vmem:[#allocation7_spill] sm:$0xff] %v3722_v61  ;;  %v715_v62 = vld [vmem:[%s6921_s0 + $0x4e0] sm:$0xff]  ;;  %v137_v0 = vunpack.c.l.bf16 %v23_v55  ;;  %v138_v1 = vunpack.c.h.bf16 %v23_v55  ;;  %v254_v31 = vunpack.c.l.bf16 %v88_v26  ;;  %v255_v32 = vunpack.c.h.bf16 %v88_v26 }
  0x1f   :  { %3407 = vmatpush.msra.mxu2 %v561_v38  ;;  %3423 = vmatpush.msra.mxu3 %v593_v39  ;;  %v681_v59 = vld [vmem:[%s6921_s0 + $0x3d0] sm:$0xff]  ;;  %v647_v63 = vld [vmem:[%s6921_s0 + $0x2c0] sm:$0xff]  ;;  %7144 = vst [vmem:[#allocation11_spill] sm:$0xff] %v3811_v35 }
  0x20   :  { %904 = vmatpush.msra.mxu0 %v561_v38  ;;  %987 = vmatpush.msra.mxu1 %v593_v39  ;;  %v747_v3 = vld [vmem:[%s6921_s0 + $0x5e0] sm:$0xff]  ;;  %v713_v5 = vld [vmem:[%s6921_s0 + $0x4d0] sm:$0xff]  ;;  %v3750_v9 = vmul.f32 %v3655_v34, %v137_v0  ;;  %v3753_v10 = vmul.f32 %v3657_v36, %v138_v1  ;;  %v3835_v46 = vmul.f32 %v3655_v34, %v254_v31 }
  0x21   :  { %3408 = vmatpush.msra.mxu2 %v559_v40  ;;  %3424 = vmatpush.msra.mxu3 %v591_v41  ;;  %v679_v4 = vld [vmem:[%s6921_s0 + $0x3c0] sm:$0xff]  ;;  %v645_v6 = vld [vmem:[%s6921_s0 + $0x2b0] sm:$0xff] }
  0x22   :  { %939 = vmatmul.f32.vlgmr.msra.gmra.mxu2 %v3675_v42  ;;  %1022 = vmatmul.f32.vlgmr.msra.gmra.mxu3 %v3678_v43  ;;  %7141 = vst [vmem:[#allocation8_spill] sm:$0xff] %v3753_v10  ;;  %v745_v11 = vld [vmem:[%s6921_s0 + $0x5d0] sm:$0xff]  ;;  %v711_v14 = vld [vmem:[%s6921_s0 + $0x4c0] sm:$0xff] }
  0x23   :  { %1056 = vmatpush.msrb.mxu2 %v653_v47  ;;  %1139 = vmatpush.msrb.mxu3 %v685_v48  ;;  %v677_v12 = vld [vmem:[%s6921_s0 + $0x3b0] sm:$0xff]  ;;  %v643_v15 = vld [vmem:[%s6921_s0 + $0x2a0] sm:$0xff]  ;;  %7145 = vst [vmem:[#allocation12_spill] sm:$0xff] %v3835_v46  ;;  %v3838_v47 = vmul.f32 %v3657_v36, %v255_v32 }
  0x24   :  { %905 = vmatpush.msra.mxu0 %v559_v40  ;;  %988 = vmatpush.msra.mxu1 %v591_v41  ;;  %v743_v17 = vld [vmem:[%s6921_s0 + $0x5c0] sm:$0xff]  ;;  %v709_v24 = vld [vmem:[%s6921_s0 + $0x4b0] sm:$0xff] }
  0x25   :  { %1057 = vmatpush.msrb.mxu2 %v651_v49  ;;  %1140 = vmatpush.msrb.mxu3 %v683_v52  ;;  %v675_v18 = vld [vmem:[%s6921_s0 + $0x3a0] sm:$0xff]  ;;  %v641_v25 = vld [vmem:[%s6921_s0 + $0x290] sm:$0xff]  ;;  %7146 = vst [vmem:[#allocation13_spill] sm:$0xff] %v3838_v47 }
  0x26   :  { %906 = vmatmul.f32.vlgmr.msra.gmra.mxu0 %v3698_v53  ;;  %989 = vmatmul.f32.vlgmr.msra.gmra.mxu1 %v3701_v54  ;;  %v741_v27 = vld [vmem:[%s6921_s0 + $0x5b0] sm:$0xff]  ;;  %v707_v29 = vld [vmem:[%s6921_s0 + $0x4a0] sm:$0xff] }
  0x27   :  { %1222 = vmatpush.msrb.mxu0 %v717_v56  ;;  %1058 = vmatpush.msrb.mxu2 %v649_v57  ;;  %v673_v28 = vld [vmem:[%s6921_s0 + $0x390] sm:$0xff]  ;;  %v639_v30 = vld [vmem:[%s6921_s0 + $0x280] sm:$0xff] }
  0x28   :  { %1305 = vmatpush.msrb.mxu1 %v749_v58  ;;  %1141 = vmatpush.msrb.mxu3 %v681_v59  ;;  %v739_v37 = vld [vmem:[%s6921_s0 + $0x5a0] sm:$0xff]  ;;  %v33_v39 = vld [vmem:[%s6923_s2 + $0x6c] sm:$0xff]  ;;  %v43_v26 = vld [vmem:[%s6923_s2 + $0xb4] sm:$0xff] }
  0x29   :  { %1223 = vmatpush.msrb.mxu0 %v715_v62  ;;  %1059 = vmatpush.msrb.mxu2 %v647_v63  ;;  %v671_v38 = vld [vmem:[%s6921_s0 + $0x380] sm:$0xff]  ;;  %v705_v40 = vld [vmem:[%s6921_s0 + $0x490] sm:$0xff]  ;;  %v155_v48 = vunpack.c.l.bf16 %v33_v39  ;;  %v156_v49 = vunpack.c.h.bf16 %v33_v39  ;;  %v173_v31 = vunpack.c.l.bf16 %v43_v26  ;;  %v174_v32 = vunpack.c.h.bf16 %v43_v26 }
  0x2a   :  { %942 = vmatmul.f32.gmra.mxu2 %v3719_v60  ;;  %1025 = vmatmul.f32.gmra.mxu3 %v3722_v61  ;;  %v637_v41 = vld [vmem:[%s6921_s0 + $0x270] sm:$0xff]  ;;  %v703_v50 = vld [vmem:[%s6921_s0 + $0x480] sm:$0xff] }
  0x2b   :  { %1306 = vmatpush.msrb.mxu1 %v747_v3  ;;  %1142 = vmatpush.msrb.mxu3 %v679_v4  ;;  %v737_v44 = vld [vmem:[%s6921_s0 + $0x590] sm:$0xff]  ;;  %v635_v51 = vld [vmem:[%s6921_s0 + $0x260] sm:$0xff]  ;;  %v3866_v63 = vmul.f32 %v3655_v34, %v155_v48  ;;  %v3869_v0 = vmul.f32 %v3657_v36, %v156_v49 }
  0x2c   :  { %1224 = vmatpush.msrb.mxu0 %v713_v5  ;;  %1060 = vmatpush.msrb.mxu2 %v645_v6  ;;  %v669_v45 = vld [vmem:[%s6921_s0 + $0x370] sm:$0xff]  ;;  %v93_v52 = vld [vmem:[%s6923_s2 + $0x21c] sm:$0xff] }
  0x2d   :  { %1307 = vmatpush.msrb.mxu1 %v745_v11  ;;  %1143 = vmatpush.msrb.mxu3 %v677_v12  ;;  %v735_v55 = vld [vmem:[%s6921_s0 + $0x580] sm:$0xff]  ;;  %v701_v57 = vld [vmem:[%s6921_s0 + $0x470] sm:$0xff]  ;;  %v263_v59 = vunpack.c.l.bf16 %v93_v52  ;;  %v264_v62 = vunpack.c.h.bf16 %v93_v52  ;;  %7147 = vst [vmem:[#allocation14_spill] sm:$0xff] %v3869_v0 }
  0x2e   :  { %909 = vmatmul.f32.gmra.mxu0 %v3750_v9  ;;  %992 = vmatmul.f32.gmra.mxu1 %v3753_v10  ;;  %v667_v56 = vld [vmem:[%s6921_s0 + $0x360] sm:$0xff]  ;;  %v633_v58 = vld [vmem:[%s6921_s0 + $0x250] sm:$0xff] }
  0x2f   :  { %1225 = vmatpush.msrb.mxu0 %v711_v14  ;;  %1061 = vmatpush.msrb.mxu2 %v643_v15  ;;  %v733_v1 = vld [vmem:[%s6921_s0 + $0x570] sm:$0xff]  ;;  %v699_v4 = vld [vmem:[%s6921_s0 + $0x460] sm:$0xff]  ;;  %v3893_v8 = vmul.f32 %v3655_v34, %v263_v59  ;;  %v3896_v11 = vmul.f32 %v3657_v36, %v264_v62  ;;  %v108_v62 = vld [vmem:[%s6923_s2 + $0x288] sm:$0xff] }
  0x30   :  { %1308 = vmatpush.msrb.mxu1 %v743_v17  ;;  %1144 = vmatpush.msrb.mxu3 %v675_v18  ;;  %v665_v2 = vld [vmem:[%s6921_s0 + $0x350] sm:$0xff]  ;;  %v631_v5 = vld [vmem:[%s6921_s0 + $0x240] sm:$0xff] }
  0x31   :  { %1226 = vmatpush.msrb.mxu0 %v709_v24  ;;  %1062 = vmatpush.msrb.mxu2 %v641_v25  ;;  %v38_v3 = vld [vmem:[%s6923_s2 + $0x90] sm:$0xff]  ;;  %v731_v6 = vld [vmem:[%s6921_s0 + $0x560] sm:$0xff]  ;;  %7148 = vst [vmem:[#allocation15_spill] sm:$0xff] %v3893_v8 }
  0x32   :  { %945 = vmatmul.f32.gmra.mxu2 %v3777_v19  ;;  %1028 = vmatmul.f32.gmra.mxu3 %v3780_v20  ;;  %v663_v7 = vld [vmem:[%s6921_s0 + $0x340] sm:$0xff]  ;;  %7149 = vst [vmem:[#allocation16_spill] sm:$0xff] %v3896_v11  ;;  %v164_v12 = vunpack.c.l.bf16 %v38_v3  ;;  %v165_v13 = vunpack.c.h.bf16 %v38_v3  ;;  %v697_v23 = vld [vmem:[%s6921_s0 + $0x450] sm:$0xff] }
  0x33   :  { %1309 = vmatpush.msrb.mxu1 %v741_v27  ;;  %1145 = vmatpush.msrb.mxu3 %v673_v28  ;;  %v98_v14 = vld [vmem:[%s6923_s2 + $0x240] sm:$0xff]  ;;  %v629_v24 = vld [vmem:[%s6921_s0 + $0x230] sm:$0xff] }
  0x34   :  { %1227 = vmatpush.msrb.mxu0 %v707_v29  ;;  %1063 = vmatpush.msrb.mxu2 %v639_v30  ;;  %v272_v15 = vunpack.c.l.bf16 %v98_v14  ;;  %v273_v17 = vunpack.c.h.bf16 %v98_v14  ;;  %v3906_v18 = vmul.f32 %v3655_v34, %v164_v12  ;;  %v3909_v22 = vmul.f32 %v3657_v36, %v165_v13  ;;  %v729_v25 = vld [vmem:[%s6921_s0 + $0x550] sm:$0xff]  ;;  %v695_v28 = vld [vmem:[%s6921_s0 + $0x440] sm:$0xff] }
  0x35   :  { %1310 = vmatpush.msrb.mxu1 %v739_v37  ;;  %1146 = vmatpush.msrb.mxu3 %v671_v38  ;;  %v661_v27 = vld [vmem:[%s6921_s0 + $0x330] sm:$0xff]  ;;  %v103_v37 = vld [vmem:[%s6923_s2 + $0x264] sm:$0xff]  ;;  %v48_v38 = vld [vmem:[%s6923_s2 + $0xd8] sm:$0xff] }
  0x36   :  { %912 = vmatmul.f32.gmra.mxu0 %v3808_v33  ;;  %995 = vmatmul.f32.gmra.mxu1 %v3811_v35  ;;  %7150 = vst [vmem:[#allocation17_spill] sm:$0xff] %v3909_v22  ;;  %v3930_v29 = vmul.f32 %v3655_v34, %v272_v15  ;;  %v3933_v30 = vmul.f32 %v3657_v36, %v273_v17  ;;  %v281_v39 = vunpack.c.l.bf16 %v103_v37  ;;  %v727_v48 = vld [vmem:[%s6921_s0 + $0x540] sm:$0xff]  ;;  %v725_v52 = vld [vmem:[%s6921_s0 + $0x530] sm:$0xff]  ;;  %v183_v59 = vunpack.c.h.bf16 %v48_v38  ;;  %v79_v35 = vld [vmem:[%s6923_s2 + $0x1b8] sm:$0xff] }
  0x37   :  { %1228 = vmatpush.msrb.mxu0 %v705_v40  ;;  %1064 = vmatpush.msrb.mxu2 %v637_v41  ;;  %v282_v40 = vunpack.c.h.bf16 %v103_v37  ;;  %v3946_v41 = vmul.f32 %v3655_v34, %v173_v31  ;;  %v659_v49 = vld [vmem:[%s6921_s0 + $0x320] sm:$0xff]  ;;  %v689_v14 = vld [vmem:[%s6921_s0 + $0x410] sm:$0xff] }
  0x38   :  { %1311 = vmatpush.msrb.mxu1 %v737_v44  ;;  %1147 = vmatpush.msrb.mxu3 %v669_v45  ;;  %7151 = vst [vmem:[#allocation18_spill] sm:$0xff] %v3930_v29  ;;  %v3949_v44 = vmul.f32 %v3657_v36, %v174_v32  ;;  %v627_v45 = vld [vmem:[%s6921_s0 + $0x220] sm:$0xff]  ;;  %v781_v32 = vld [vmem:[%s6921_s0 + $0x6f0] sm:$0xff] }
  0x39   :  { %1229 = vmatpush.msrb.mxu0 %v703_v50  ;;  %1065 = vmatpush.msrb.mxu2 %v635_v51  ;;  %7152 = vst [vmem:[#allocation19_spill] sm:$0xff] %v3933_v30  ;;  %v693_v50 = vld [vmem:[%s6921_s0 + $0x430] sm:$0xff]  ;;  %v53_v12 = vld [vmem:[%s6923_s2 + $0xfc] sm:$0xff] }
  0x3a   :  { %948 = vmatmul.f32.gmra.mxu2 %v3835_v46  ;;  %1031 = vmatmul.f32.gmra.mxu3 %v3838_v47  ;;  %7153 = vst [vmem:[#allocation20_spill] sm:$0xff] %v3949_v44  ;;  %v625_v51 = vld [vmem:[%s6921_s0 + $0x210] sm:$0xff]  ;;  %v655_v13 = vld [vmem:[%s6921_s0 + $0x300] sm:$0xff] }
  0x3b   :  { %1312 = vmatpush.msrb.mxu1 %v735_v55  ;;  %1148 = vmatpush.msrb.mxu3 %v667_v56  ;;  %v657_v55 = vld [vmem:[%s6921_s0 + $0x310] sm:$0xff]  ;;  %v3973_v56 = vmul.f32 %v3655_v34, %v281_v39  ;;  %v58_v39 = vld [vmem:[%s6923_s2 + $0x120] sm:$0xff] }
  0x3c   :  { %1230 = vmatpush.msrb.mxu0 %v701_v57  ;;  %1066 = vmatpush.msrb.mxu2 %v633_v58  ;;  %v3976_v57 = vmul.f32 %v3657_v36, %v282_v40  ;;  %v182_v58 = vunpack.c.l.bf16 %v48_v38  ;;  %v721_v37 = vld [vmem:[%s6921_s0 + $0x510] sm:$0xff]  ;;  %v687_v40 = vld [vmem:[%s6921_s0 + $0x400] sm:$0xff] }
  0x3d   :  { %1313 = vmatpush.msrb.mxu1 %v733_v1  ;;  %1149 = vmatpush.msrb.mxu3 %v665_v2  ;;  %7154 = vst [vmem:[#allocation21_spill] sm:$0xff] %v3973_v56  ;;  %v290_v1 = vunpack.c.l.bf16 %v108_v62  ;;  %v291_v2 = vunpack.c.h.bf16 %v108_v62  ;;  %v813_v38 = vld [vmem:[%s6921_s0 + $0x7f0] sm:$0xff]  ;;  %v44_v47 = vld [vmem:[%s6923_s2 + $0xbc] sm:$0xff] }
  0x3e   :  { %915 = vmatmul.f32.gmra.mxu0 %v3866_v63  ;;  %998 = vmatmul.f32.gmra.mxu1 %v3869_v0  ;;  %7155 = vst [vmem:[#allocation22_spill] sm:$0xff] %v3976_v57  ;;  %v3986_v3 = vmul.f32 %v3655_v34, %v182_v58  ;;  %v574_v0 = vld [vmem:[%s6921_s0 + $0x78] sm:$0xff] }
  0x3f   :  { %1231 = vmatpush.msrb.mxu0 %v699_v4  ;;  %1067 = vmatpush.msrb.mxu2 %v631_v5  ;;  %v3989_v4 = vmul.f32 %v3657_v36, %v183_v59  ;;  %v691_v5 = vld [vmem:[%s6921_s0 + $0x420] sm:$0xff]  ;;  %v4010_v15 = vmul.f32 %v3655_v34, %v290_v1  ;;  %v4013_v17 = vmul.f32 %v3657_v36, %v291_v2  ;;  %v821_v1 = vld [vmem:[%s6921_s0 + $0x830] sm:$0xff] }
  0x40   :  { %1314 = vmatpush.msrb.mxu1 %v731_v6  ;;  %1150 = vmatpush.msrb.mxu3 %v663_v7  ;;  %v623_v6 = vld [vmem:[%s6921_s0 + $0x200] sm:$0xff] }
  0x41   :  { %1232 = vmatpush.msrb.mxu0 %v697_v23  ;;  %1068 = vmatpush.msrb.mxu2 %v629_v24  ;;  %7156 = vst [vmem:[#allocation23_spill] sm:$0xff] %v3989_v4  ;;  %v723_v7 = vld [vmem:[%s6921_s0 + $0x520] sm:$0xff]  ;;  %v191_v23 = vunpack.c.l.bf16 %v53_v12  ;;  %v192_v24 = vunpack.c.h.bf16 %v53_v12 }
  0x42   :  { %951 = vmatmul.f32.gmra.mxu2 %v3893_v8  ;;  %1034 = vmatmul.f32.gmra.mxu3 %v3896_v11  ;;  %7157 = vst [vmem:[#allocation24_spill] sm:$0xff] %v4010_v15  ;;  %v779_v2 = vld [vmem:[%s6921_s0 + $0x6e0] sm:$0xff] }
  0x43   :  { %1315 = vmatpush.msrb.mxu1 %v729_v25  ;;  %1151 = vmatpush.msrb.mxu3 %v661_v27  ;;  %7158 = vst [vmem:[#allocation25_spill] sm:$0xff] %v4013_v17  ;;  %v113_v25 = vld [vmem:[%s6923_s2 + $0x2ac] sm:$0xff]  ;;  %v4026_v31 = vmul.f32 %v3657_v36, %v192_v24  ;;  %v123_v24 = vld [vmem:[%s6923_s2 + $0x2f4] sm:$0xff]  ;;  %v84_v10 = vld [vmem:[%s6923_s2 + $0x1dc] sm:$0xff] }
  0x44   :  { %1233 = vmatpush.msrb.mxu0 %v695_v28  ;;  %1069 = vmatpush.msrb.mxu2 %v627_v45  ;;  %v299_v26 = vunpack.c.l.bf16 %v113_v25  ;;  %v300_v27 = vunpack.c.h.bf16 %v113_v25  ;;  %v4023_v28 = vmul.f32 %v3655_v34, %v191_v23  ;;  %v719_v45 = vld [vmem:[%s6921_s0 + $0x500] sm:$0xff]  ;;  %v317_v25 = vunpack.c.l.bf16 %v123_v24 }
  0x45   :  { %1316 = vmatpush.msrb.mxu1 %v727_v48  ;;  %1152 = vmatpush.msrb.mxu3 %v659_v49  ;;  %7159 = vst [vmem:[#allocation26_spill] sm:$0xff] %v4026_v31 }
  0x46   :  { %918 = vmatmul.f32.gmra.mxu0 %v3906_v18  ;;  %1001 = vmatmul.f32.gmra.mxu1 %v3909_v22  ;;  %v4047_v48 = vmul.f32 %v3655_v34, %v299_v26  ;;  %v4050_v49 = vmul.f32 %v3657_v36, %v300_v27  ;;  %v318_v26 = vunpack.c.h.bf16 %v123_v24  ;;  %v809_v24 = vld [vmem:[%s6921_s0 + $0x7d0] sm:$0xff] }
  0x47   :  { %1234 = vmatpush.msrb.mxu0 %v693_v50  ;;  %1070 = vmatpush.msrb.mxu2 %v625_v51  ;;  %v200_v50 = vunpack.c.l.bf16 %v58_v39  ;;  %v201_v51 = vunpack.c.h.bf16 %v58_v39  ;;  %v68_v39 = vld [vmem:[%s6923_s2 + $0x168] sm:$0xff] }
  0x48   :  { %1317 = vmatpush.msrb.mxu1 %v725_v52  ;;  %1153 = vmatpush.msrb.mxu3 %v657_v55  ;;  %7160 = vst [vmem:[#allocation27_spill] sm:$0xff] %v4047_v48  ;;  %v118_v52 = vld [vmem:[%s6923_s2 + $0x2d0] sm:$0xff] }
  0x49   :  { %1235 = vmatpush.msrb.mxu0 %v691_v5  ;;  %1071 = vmatpush.msrb.mxu2 %v623_v6  ;;  %7161 = vst [vmem:[#allocation28_spill] sm:$0xff] %v4050_v49  ;;  %v308_v55 = vunpack.c.l.bf16 %v118_v52  ;;  %v309_v58 = vunpack.c.h.bf16 %v118_v52  ;;  %v4060_v59 = vmul.f32 %v3655_v34, %v200_v50  ;;  %v4063_v62 = vmul.f32 %v3657_v36, %v201_v51  ;;  %v590_v5 = vld [vmem:[%s6921_s0 + $0xf8] sm:$0xff]  ;;  %v63_v6 = vld [vmem:[%s6923_s2 + $0x144] sm:$0xff] }
  0x4a   :  { %954 = vmatmul.f32.gmra.mxu2 %v3930_v29  ;;  %1037 = vmatmul.f32.gmra.mxu3 %v3933_v30  ;;  %v210_v23 = vunpack.c.h.bf16 %v63_v6  ;;  %v337_v50 = vperm.slane %v3624_v21, 6  ;;  %v4114_v51 = vmul.f32 %v3655_v34, %v317_v25  ;;  %v4117_v52 = vmul.f32 %v3657_v36, %v318_v26  ;;  %v20_v25 = vld [vmem:[%s6923_s2 + $0x10] sm:$0xff]  ;;  %v582_v30 = vld [vmem:[%s6921_s0 + $0xb8] sm:$0xff] }
  0x4b   :  { %1318 = vmatpush.msrb.mxu1 %v723_v7  ;;  %1154 = vmatpush.msrb.mxu3 %v655_v13  ;;  %7162 = vst [vmem:[#allocation29_spill] sm:$0xff] %v4063_v62  ;;  %v811_v7 = vld [vmem:[%s6921_s0 + $0x7e0] sm:$0xff]  ;;  %v4081_v12 = vmul.f32 %v3655_v34, %v308_v55  ;;  %v4084_v13 = vmul.f32 %v3657_v36, %v309_v58  ;;  %v19_v55 = vld [vmem:[%s6923_s2 + $0x8] sm:$0xff]  ;;  %v219_v58 = vunpack.c.h.bf16 %v68_v39 }
  0x4c   :  { %1236 = vmatpush.msrb.mxu0 %v689_v14  ;;  %1388 = vmatpush.msra.mxu2 %v781_v32  ;;  %v209_v14 = vunpack.c.l.bf16 %v63_v6  ;;  %v4097_v32 = vmul.f32 %v3657_v36, %v210_v23  ;;  %7166 = vst [vmem:[#allocation33_spill] sm:$0xff] %v4114_v51 }
  0x4d   :  { %1319 = vmatpush.msrb.mxu1 %v721_v37  ;;  %1471 = vmatpush.msra.mxu3 %v813_v38  ;;  %7163 = vst [vmem:[#allocation30_spill] sm:$0xff] %v4081_v12  ;;  %v777_v37 = vld [vmem:[%s6921_s0 + $0x6d0] sm:$0xff]  ;;  %v588_v38 = vld [vmem:[%s6921_s0 + $0xe8] sm:$0xff] }
  0x4e   :  { %921 = vmatmul.f32.gmra.mxu0 %v3946_v41  ;;  %1004 = vmatmul.f32.gmra.mxu1 %v3949_v44  ;;  %7164 = vst [vmem:[#allocation31_spill] sm:$0xff] %v4084_v13  ;;  %v4094_v27 = vmul.f32 %v3655_v34, %v209_v14 }
  0x4f   :  { %1237 = vmatpush.msrb.mxu0 %v687_v40  ;;  %1320 = vmatpush.msrb.mxu1 %v719_v45  ;;  %7165 = vst [vmem:[#allocation32_spill] sm:$0xff] %v4097_v32  ;;  %v4109_v40 = vunpack.c.h.bf16 %v3609_v16  ;;  %v336_v45 = vperm.slane %v3624_v21, 4  ;;  %v218_v16 = vunpack.c.l.bf16 %v68_v39  ;;  %v131_v21 = vunpack.c.h.bf16 %v19_v55 }
  0x50   :  { %1389 = vmatpush.msra.mxu2 %v779_v2  ;;  %1472 = vmatpush.msra.mxu3 %v811_v7  ;;  %7167 = vst [vmem:[#allocation34_spill] sm:$0xff] %v4117_v52  ;;  %v4134_v7 = vmul.f32 %v3657_v36, %v219_v58  ;;  %v132_v36 = vunpack.c.l.bf16 %v20_v25 }
  0x51   :  { %1566 = vmatpush.msra.mxu0 %v821_v1  ;;  %1637 = vmatpush.msra.mxu1 %v590_v5  ;;  %v130_v1 = vunpack.c.l.bf16 %v19_v55  ;;  %v4124_v2 = vperm.slane %v336_v45, 0  ;;  %v4126_v5 = vperm.slane %v337_v50, 0  ;;  %v4131_v6 = vmul.f32 %v3655_v34, %v218_v16  ;;  %v24_v45 = vld [vmem:[%s6923_s2 + $0x2c] sm:$0xff] }
  0x52   :  { %957 = vmatmul.f32.gmra.mxu2 %v3973_v56  ;;  %1040 = vmatmul.f32.gmra.mxu3 %v3976_v57  ;;  %7168 = vst [vmem:[#allocation35_spill] sm:$0xff] %v4134_v7  ;;  %v338_v14 = vperm.slane %v4109_v40, 0  ;;  %v339_v23 = vperm.slane %v4109_v40, 2  ;;  %v139_v50 = vunpack.c.l.bf16 %v24_v45  ;;  %v140_v55 = vunpack.c.h.bf16 %v24_v45  ;;  %v29_v45 = vld [vmem:[%s6923_s2 + $0x50] sm:$0xff] }
  0x53   :  { %1390 = vmatpush.msra.mxu2 %v777_v37  ;;  %1638 = vmatpush.msra.mxu1 %v588_v38  ;;  %v4145_v26 = vmul.f32 %v4124_v2, %v130_v1  ;;  %v4148_v34 = vmul.f32 %v4126_v5, %v131_v21  ;;  %v133_v38 = vunpack.c.h.bf16 %v20_v25  ;;  %v775_v1 = vld [vmem:[%s6921_s0 + $0x6c0] sm:$0xff]  ;;  %v586_v21 = vld [vmem:[%s6921_s0 + $0xd8] sm:$0xff] }
  0x54   :  { %1473 = vmatpush.msra.mxu3 %v809_v24  ;;  %v4152_v37 = vperm.slane %v338_v14, 0  ;;  %v4154_v39 = vperm.slane %v339_v23, 0  ;;  %v807_v14 = vld [vmem:[%s6921_s0 + $0x7c0] sm:$0xff]  ;;  %v25_v23 = vld [vmem:[%s6923_s2 + $0x34] sm:$0xff]  ;;  %v4180_v24 = vmul.f32 %v4124_v2, %v139_v50  ;;  %v4183_v25 = vmul.f32 %v4126_v5, %v140_v55 }
  0x55   :  { %7169 = vst [vmem:[#allocation36_spill] sm:$0xff] %v4145_v26  ;;  %1391 = vmatpush.msra.mxu2 %v775_v1  ;;  %1639 = vmatpush.msra.mxu1 %v586_v21  ;;  %v148_v1 = vunpack.c.l.bf16 %v29_v45  ;;  %v149_v50 = vunpack.c.h.bf16 %v29_v45 }
  0x56   :  { %924 = vmatmul.f32.gmra.mxu0 %v3986_v3  ;;  %1007 = vmatmul.f32.gmra.mxu1 %v3989_v4  ;;  %7170 = vst [vmem:[#allocation37_spill] sm:$0xff] %v4148_v34  ;;  %v4162_v16 = vmul.f32 %v4152_v37, %v132_v36  ;;  %v4165_v58 = vmul.f32 %v4154_v39, %v133_v38  ;;  %v141_v36 = vunpack.c.l.bf16 %v25_v23  ;;  %v142_v38 = vunpack.c.h.bf16 %v25_v23 }
  0x57   :  { %1474 = vmatpush.msra.mxu3 %v807_v14  ;;  %7173 = vst [vmem:[#allocation40_spill] sm:$0xff] %v4180_v24  ;;  %v30_v14 = vld [vmem:[%s6923_s2 + $0x58] sm:$0xff]  ;;  %v4202_v23 = vmul.f32 %v4124_v2, %v148_v1  ;;  %v805_v1 = vld [vmem:[%s6921_s0 + $0x7b0] sm:$0xff] }
  0x58   :  { %7171 = vst [vmem:[#allocation38_spill] sm:$0xff] %v4162_v16  ;;  %v4193_v21 = vmul.f32 %v4152_v37, %v141_v36  ;;  %v4196_v55 = vmul.f32 %v4154_v39, %v142_v38  ;;  %v150_v45 = vunpack.c.l.bf16 %v30_v14  ;;  %v151_v36 = vunpack.c.h.bf16 %v30_v14  ;;  %v773_v38 = vld [vmem:[%s6921_s0 + $0x6b0] sm:$0xff] }
  0x59   :  { %7172 = vst [vmem:[#allocation39_spill] sm:$0xff] %v4165_v58  ;;  %1392 = vmatpush.msra.mxu2 %v773_v38  ;;  %1475 = vmatpush.msra.mxu3 %v805_v1 }
  0x5a   :  { %960 = vmatmul.f32.gmra.mxu2 %v4010_v15  ;;  %1043 = vmatmul.f32.gmra.mxu3 %v4013_v17  ;;  %7174 = vst [vmem:[#allocation41_spill] sm:$0xff] %v4183_v25  ;;  %v35_v17 = vld [vmem:[%s6923_s2 + $0x7c] sm:$0xff] }
  0x5b   :  { %7175 = vst [vmem:[#allocation42_spill] sm:$0xff] %v4193_v21  ;;  %v159_v1 = vunpack.c.l.bf16 %v35_v17 }
  0x5c   :  { %7176 = vst [vmem:[#allocation43_spill] sm:$0xff] %v4196_v55 }
  0x5d   :  { %7177 = vst [vmem:[#allocation44_spill] sm:$0xff] %v4202_v23 }
  0x5e   :  { %927 = vmatmul.f32.gmra.mxu0 %v4023_v28  ;;  %1010 = vmatmul.f32.gmra.mxu1 %v4026_v31 }
  0x62   :  { %963 = vmatmul.f32.gmra.mxu2 %v4047_v48  ;;  %1046 = vmatmul.f32.gmra.mxu3 %v4050_v49  ;;  %v4227_v49 = vmul.f32 %v4154_v39, %v151_v36  ;;  %v819_v36 = vld [vmem:[%s6921_s0 + $0x820] sm:$0xff] }
  0x63   :  { %1567 = vmatpush.msra.mxu0 %v819_v36  ;;  %v803_v36 = vld [vmem:[%s6921_s0 + $0x7a0] sm:$0xff] }
  0x64   :  { %7180 = vst [vmem:[#allocation47_spill] sm:$0xff] %v4227_v49  ;;  %1476 = vmatpush.msra.mxu3 %v803_v36 }
  0x66   :  { %930 = vmatmul.f32.gmra.mxu0 %v4060_v59  ;;  %1013 = vmatmul.f32.gmra.mxu1 %v4063_v62 }
  0x6a   :  { %966 = vmatmul.f32.gmra.mxu2 %v4081_v12  ;;  %1049 = vmatmul.f32.gmra.mxu3 %v4084_v13  ;;  %v4224_v13 = vmul.f32 %v4152_v37, %v150_v45  ;;  %v160_v45 = vunpack.c.h.bf16 %v35_v17 }
  0x6c   :  { %7179 = vst [vmem:[#allocation46_spill] sm:$0xff] %v4224_v13  ;;  %v4255_v57 = vmul.f32 %v4154_v39, %v160_v45 }
  0x6e   :  { %933 = vmatmul.f32.gmra.mxu0 %v4094_v27  ;;  %1016 = vmatmul.f32.gmra.mxu1 %v4097_v32  ;;  %7184 = vst [vmem:[#allocation51_spill] sm:$0xff] %v4255_v57 }
  0x72   :  { %969 = vmatmul.f32.gmra.mxu2 %v4114_v51  ;;  %1052 = vmatmul.f32.gmra.mxu3 %v4117_v52  ;;  %v584_v52 = vld [vmem:[%s6921_s0 + $0xc8] sm:$0xff] }
  0x73   :  { %1640 = vmatpush.msra.mxu1 %v584_v52 }
  0x75   :  { %1641 = vmatpush.msra.mxu1 %v582_v30  ;;  %v175_v30 = vunpack.c.l.bf16 %v44_v47 }
  0x76   :  { %936 = vmatmul.f32.gmra.mxu0 %v4131_v6  ;;  %1019 = vmatmul.f32.gmra.mxu1 %v4134_v7 }
  0x77   :  { %v4292_v20 = vmul.f32 %v4124_v2, %v175_v30  ;;  %v801_v30 = vld [vmem:[%s6921_s0 + $0x790] sm:$0xff] }
  0x78   :  { %1477 = vmatpush.msra.mxu3 %v801_v30 }
  0x79   :  { %7189 = vst [vmem:[#allocation56_spill] sm:$0xff] %v4292_v20 }
  0x7a   :  { %1072 = vmatmul.f32.vlgmr.msrb.gmra.mxu2 %v4145_v26  ;;  %1155 = vmatmul.f32.vlgmr.msrb.gmra.mxu3 %v4148_v34 }
  0x7e   :  { %1238 = vmatmul.f32.vlgmr.msrb.gmra.mxu0 %v4162_v16  ;;  %1321 = vmatmul.f32.vlgmr.msrb.gmra.mxu1 %v4165_v58  ;;  %v4205_v58 = vmul.f32 %v4126_v5, %v149_v50  ;;  %v34_v50 = vld [vmem:[%s6923_s2 + $0x74] sm:$0xff] }
  0x7f   :  { %v157_v14 = vunpack.c.l.bf16 %v34_v50 }
  0x80   :  { %7178 = vst [vmem:[#allocation45_spill] sm:$0xff] %v4205_v58 }
  0x81   :  { %v4233_v38 = vmul.f32 %v4124_v2, %v157_v14  ;;  %v39_v14 = vld [vmem:[%s6923_s2 + $0x98] sm:$0xff] }
  0x82   :  { %1075 = vmatmul.f32.gmra.mxu2 %v4180_v24  ;;  %1158 = vmatmul.f32.gmra.mxu3 %v4183_v25  ;;  %v167_v17 = vunpack.c.h.bf16 %v39_v14  ;;  %v238_v25 = vunpack.c.l.bf16 %v79_v35 }
  0x83   :  { %7181 = vst [vmem:[#allocation48_spill] sm:$0xff] %v4233_v38 }
  0x84   :  { %v4270_v45 = vmul.f32 %v4126_v5, %v167_v17 }
  0x86   :  { %1241 = vmatmul.f32.gmra.mxu0 %v4193_v21  ;;  %1324 = vmatmul.f32.gmra.mxu1 %v4196_v55  ;;  %v158_v55 = vunpack.c.h.bf16 %v34_v50  ;;  %v771_v50 = vld [vmem:[%s6921_s0 + $0x6a0] sm:$0xff]  ;;  %7186 = vst [vmem:[#allocation53_spill] sm:$0xff] %v4270_v45 }
  0x87   :  { %1393 = vmatpush.msra.mxu2 %v771_v50  ;;  %v40_v50 = vld [vmem:[%s6923_s2 + $0xa0] sm:$0xff] }
  0x88   :  { %v4236_v52 = vmul.f32 %v4126_v5, %v158_v55  ;;  %v166_v55 = vunpack.c.l.bf16 %v39_v14  ;;  %v168_v14 = vunpack.c.l.bf16 %v40_v50  ;;  %v169_v11 = vunpack.c.h.bf16 %v40_v50  ;;  %v769_v50 = vld [vmem:[%s6921_s0 + $0x690] sm:$0xff] }
  0x89   :  { %1394 = vmatpush.msra.mxu2 %v769_v50  ;;  %v580_v50 = vld [vmem:[%s6921_s0 + $0xa8] sm:$0xff] }
  0x8a   :  { %1078 = vmatmul.f32.gmra.mxu2 %v4202_v23  ;;  %1161 = vmatmul.f32.gmra.mxu3 %v4205_v58  ;;  %7182 = vst [vmem:[#allocation49_spill] sm:$0xff] %v4236_v52  ;;  %v4280_v36 = vmul.f32 %v4152_v37, %v168_v14  ;;  %v4283_v17 = vmul.f32 %v4154_v39, %v169_v11  ;;  %v49_v11 = vld [vmem:[%s6923_s2 + $0xe0] sm:$0xff] }
  0x8b   :  { %1642 = vmatpush.msra.mxu1 %v580_v50  ;;  %v50_v50 = vld [vmem:[%s6923_s2 + $0xe8] sm:$0xff] }
  0x8c   :  { %7187 = vst [vmem:[#allocation54_spill] sm:$0xff] %v4280_v36  ;;  %v186_v4 = vunpack.c.l.bf16 %v50_v50 }
  0x8d   :  { %7188 = vst [vmem:[#allocation55_spill] sm:$0xff] %v4283_v17 }
  0x8e   :  { %1244 = vmatmul.f32.gmra.mxu0 %v4224_v13  ;;  %1327 = vmatmul.f32.gmra.mxu1 %v4227_v49  ;;  %v4252_v49 = vmul.f32 %v4152_v37, %v159_v1  ;;  %v4267_v1 = vmul.f32 %v4124_v2, %v166_v55  ;;  %v176_v55 = vunpack.c.h.bf16 %v44_v47 }
  0x90   :  { %7183 = vst [vmem:[#allocation50_spill] sm:$0xff] %v4252_v49  ;;  %v4295_v47 = vmul.f32 %v4126_v5, %v176_v55  ;;  %v184_v55 = vunpack.c.l.bf16 %v49_v11 }
  0x91   :  { %7185 = vst [vmem:[#allocation52_spill] sm:$0xff] %v4267_v1 }
  0x92   :  { %1081 = vmatmul.f32.gmra.mxu2 %v4233_v38  ;;  %1164 = vmatmul.f32.gmra.mxu3 %v4236_v52  ;;  %7190 = vst [vmem:[#allocation57_spill] sm:$0xff] %v4295_v47  ;;  %v4324_v31 = vmul.f32 %v4124_v2, %v184_v55  ;;  %v767_v55 = vld [vmem:[%s6921_s0 + $0x680] sm:$0xff] }
  0x93   :  { %1395 = vmatpush.msra.mxu2 %v767_v55 }
  0x94   :  { %7193 = vst [vmem:[#allocation60_spill] sm:$0xff] %v4324_v31 }
  0x96   :  { %1247 = vmatmul.f32.gmra.mxu0 %v4252_v49  ;;  %1330 = vmatmul.f32.gmra.mxu1 %v4255_v57  ;;  %v45_v57 = vld [vmem:[%s6923_s2 + $0xc4] sm:$0xff] }
  0x97   :  { %v177_v14 = vunpack.c.l.bf16 %v45_v57  ;;  %v178_v61 = vunpack.c.h.bf16 %v45_v57 }
  0x99   :  { %v4311_v43 = vmul.f32 %v4152_v37, %v177_v14  ;;  %v4314_v57 = vmul.f32 %v4154_v39, %v178_v61 }
  0x9a   :  { %1084 = vmatmul.f32.gmra.mxu2 %v4267_v1  ;;  %1167 = vmatmul.f32.gmra.mxu3 %v4270_v45 }
  0x9b   :  { %7191 = vst [vmem:[#allocation58_spill] sm:$0xff] %v4311_v43 }
  0x9c   :  { %7192 = vst [vmem:[#allocation59_spill] sm:$0xff] %v4314_v57 }
  0x9e   :  { %1250 = vmatmul.f32.gmra.mxu0 %v4280_v36  ;;  %1333 = vmatmul.f32.gmra.mxu1 %v4283_v17  ;;  %v185_v17 = vunpack.c.h.bf16 %v49_v11  ;;  %v54_v11 = vld [vmem:[%s6923_s2 + $0x104] sm:$0xff] }
  0xa0   :  { %v4332_v61 = vmul.f32 %v4126_v5, %v185_v17  ;;  %v193_v17 = vunpack.c.l.bf16 %v54_v11 }
  0xa2   :  { %1087 = vmatmul.f32.gmra.mxu2 %v4292_v20  ;;  %1170 = vmatmul.f32.gmra.mxu3 %v4295_v47  ;;  %7194 = vst [vmem:[#allocation61_spill] sm:$0xff] %v4332_v61  ;;  %v187_v47 = vunpack.c.h.bf16 %v50_v50  ;;  %v578_v20 = vld [vmem:[%s6921_s0 + $0x98] sm:$0xff]  ;;  %v194_v50 = vunpack.c.h.bf16 %v54_v11 }
  0xa3   :  { %v4316_v7 = vpop.f32.mrf.mxu0  ;;  %v4318_v32 = vpop.f32.mrf.mxu1  ;;  %1643 = vmatpush.msra.mxu1 %v578_v20  ;;  %v55_v20 = vld [vmem:[%s6923_s2 + $0x10c] sm:$0xff] }
  0xa4   :  { %v196_v36 = vunpack.c.h.bf16 %v55_v20 }
  0xa5   :  { %v940_v30 = vpop.f32.mrf.mxu2  ;;  %v1023_v62 = vpop.f32.mrf.mxu3 }
  0xa6   :  { %v4329_v14 = vadd.f32 %v1023_v62, %v940_v30  ;;  %1253 = vmatmul.f32.gmra.mxu0 %v4311_v43  ;;  %1336 = vmatmul.f32.gmra.mxu1 %v4314_v57  ;;  %v799_v62 = vld [vmem:[%s6921_s0 + $0x780] sm:$0xff]  ;;  %v4348_v30 = vmul.f32 %v4152_v37, %v186_v4  ;;  %v4351_v57 = vmul.f32 %v4154_v39, %v187_v47  ;;  %v59_v47 = vld [vmem:[%s6923_s2 + $0x128] sm:$0xff] }
  0xa7   :  { %1478 = vmatpush.msra.mxu3 %v799_v62  ;;  %v4366_v4 = vmul.f32 %v4126_v5, %v194_v50  ;;  %v202_v45 = vunpack.c.l.bf16 %v59_v47  ;;  %v4379_v50 = vmul.f32 %v4154_v39, %v196_v36  ;;  %v60_v36 = vld [vmem:[%s6923_s2 + $0x130] sm:$0xff] }
  0xa8   :  { %7195 = vst [vmem:[#allocation62_spill] sm:$0xff] %v4348_v30 }
  0xa9   :  { %7196 = vst [vmem:[#allocation63_spill] sm:$0xff] %v4351_v57 }
  0xaa   :  { %1090 = vmatmul.f32.gmra.mxu2 %v4324_v31  ;;  %1173 = vmatmul.f32.gmra.mxu3 %v4332_v61  ;;  %v4361_v31 = vmul.f32 %v4124_v2, %v193_v17  ;;  %7198 = vst [vmem:[#allocation65_spill] sm:$0xff] %v4366_v4  ;;  %v195_v61 = vunpack.c.l.bf16 %v55_v20  ;;  %v203_v17 = vunpack.c.h.bf16 %v59_v47  ;;  %v576_v20 = vld [vmem:[%s6921_s0 + $0x88] sm:$0xff] }
  0xab   :  { %v4353_v43 = vpop.f32.mrf.mxu0  ;;  %v4355_v44 = vpop.f32.mrf.mxu1  ;;  %7200 = vst [vmem:[#allocation67_spill] sm:$0xff] %v4379_v50  ;;  %1644 = vmatpush.msra.mxu1 %v576_v20  ;;  %v204_v20 = vunpack.c.l.bf16 %v60_v36 }
  0xac   :  { %7197 = vst [vmem:[#allocation64_spill] sm:$0xff] %v4361_v31  ;;  %v4403_v22 = vmul.f32 %v4126_v5, %v203_v17 }
  0xad   :  { %v943_v55 = vpop.f32.mrf.mxu2  ;;  %v1026_v62 = vpop.f32.mrf.mxu3  ;;  %1645 = vmatpush.msra.mxu1 %v574_v0  ;;  %v70_v0 = vld [vmem:[%s6923_s2 + $0x178] sm:$0xff] }
  0xae   :  { %v4363_v11 = vadd.f32 %v1026_v62, %v943_v55  ;;  %1256 = vmatmul.f32.gmra.mxu0 %v4348_v30  ;;  %1339 = vmatmul.f32.gmra.mxu1 %v4351_v57  ;;  %v4376_v55 = vmul.f32 %v4152_v37, %v195_v61  ;;  %v765_v62 = vld [vmem:[%s6921_s0 + $0x670] sm:$0xff]  ;;  %v4398_v30 = vmul.f32 %v4124_v2, %v202_v45  ;;  %v223_v58 = vunpack.c.h.bf16 %v70_v0 }
  0xaf   :  { %v797_v57 = vld [vmem:[%s6921_s0 + $0x770] sm:$0xff]  ;;  %1396 = vmatpush.msra.mxu2 %v765_v62  ;;  %7202 = vst [vmem:[#allocation69_spill] sm:$0xff] %v4403_v22  ;;  %v4413_v45 = vmul.f32 %v4152_v37, %v204_v20 }
  0xb0   :  { %7199 = vst [vmem:[#allocation66_spill] sm:$0xff] %v4376_v55  ;;  %1479 = vmatpush.msra.mxu3 %v797_v57  ;;  %v64_v62 = vld [vmem:[%s6923_s2 + $0x14c] sm:$0xff]  ;;  %v205_v57 = vunpack.c.h.bf16 %v60_v36  ;;  %v65_v36 = vld [vmem:[%s6923_s2 + $0x154] sm:$0xff] }
  0xb1   :  { %7201 = vst [vmem:[#allocation68_spill] sm:$0xff] %v4398_v30  ;;  %v211_v49 = vunpack.c.l.bf16 %v64_v62  ;;  %v213_v38 = vunpack.c.l.bf16 %v65_v36 }
  0xb2   :  { %1093 = vmatmul.f32.gmra.mxu2 %v4361_v31  ;;  %1176 = vmatmul.f32.gmra.mxu3 %v4366_v4  ;;  %7203 = vst [vmem:[#allocation70_spill] sm:$0xff] %v4413_v45  ;;  %v4416_v17 = vmul.f32 %v4154_v39, %v205_v57  ;;  %v69_v57 = vld [vmem:[%s6923_s2 + $0x170] sm:$0xff] }
  0xb3   :  { %v4390_v4 = vpop.f32.mrf.mxu0  ;;  %v4392_v47 = vpop.f32.mrf.mxu1  ;;  %v4429_v20 = vmul.f32 %v4124_v2, %v211_v49  ;;  %v763_v49 = vld [vmem:[%s6921_s0 + $0x660] sm:$0xff] }
  0xb4   :  { %7204 = vst [vmem:[#allocation71_spill] sm:$0xff] %v4416_v17  ;;  %1397 = vmatpush.msra.mxu2 %v763_v49 }
  0xb5   :  { %v946_v61 = vpop.f32.mrf.mxu2  ;;  %v1029_v31 = vpop.f32.mrf.mxu3  ;;  %7205 = vst [vmem:[#allocation72_spill] sm:$0xff] %v4429_v20 }
  0xb6   :  { %v4400_v1 = vadd.f32 %v1029_v31, %v946_v61  ;;  %1259 = vmatmul.f32.gmra.mxu0 %v4376_v55  ;;  %1342 = vmatmul.f32.gmra.mxu1 %v4379_v50  ;;  %v212_v31 = vunpack.c.h.bf16 %v64_v62  ;;  %v817_v61 = vld [vmem:[%s6921_s0 + $0x810] sm:$0xff] }
  0xb7   :  { %1568 = vmatpush.msra.mxu0 %v817_v61  ;;  %v214_v61 = vunpack.c.h.bf16 %v65_v36  ;;  %v221_v36 = vunpack.c.h.bf16 %v69_v57 }
  0xb8   :  { %v4437_v52 = vmul.f32 %v4126_v5, %v212_v31  ;;  %v220_v31 = vunpack.c.l.bf16 %v69_v57 }
  0xba   :  { %1096 = vmatmul.f32.gmra.mxu2 %v4398_v30  ;;  %1179 = vmatmul.f32.gmra.mxu3 %v4403_v22  ;;  %7206 = vst [vmem:[#allocation73_spill] sm:$0xff] %v4437_v52 }
  0xbb   :  { %v4421_v50 = vpop.f32.mrf.mxu0  ;;  %v4423_v55 = vpop.f32.mrf.mxu1 }
  0xbd   :  { %v949_v62 = vpop.f32.mrf.mxu2  ;;  %v1032_v22 = vpop.f32.mrf.mxu3 }
  0xbe   :  { %v4434_v30 = vadd.f32 %v1032_v22, %v949_v62  ;;  %1262 = vmatmul.f32.gmra.mxu0 %v4413_v45  ;;  %1345 = vmatmul.f32.gmra.mxu1 %v4416_v17  ;;  %v795_v22 = vld [vmem:[%s6921_s0 + $0x760] sm:$0xff]  ;;  %v4453_v62 = vmul.f32 %v4152_v37, %v213_v38  ;;  %v4456_v17 = vmul.f32 %v4154_v39, %v214_v61  ;;  %v74_v61 = vld [vmem:[%s6923_s2 + $0x194] sm:$0xff] }
  0xbf   :  { %1480 = vmatpush.msra.mxu3 %v795_v22  ;;  %v4471_v38 = vmul.f32 %v4126_v5, %v221_v36  ;;  %v229_v36 = vunpack.c.l.bf16 %v74_v61 }
  0xc0   :  { %7207 = vst [vmem:[#allocation74_spill] sm:$0xff] %v4453_v62 }
  0xc1   :  { %7208 = vst [vmem:[#allocation75_spill] sm:$0xff] %v4456_v17 }
  0xc2   :  { %1099 = vmatmul.f32.gmra.mxu2 %v4429_v20  ;;  %1182 = vmatmul.f32.gmra.mxu3 %v4437_v52  ;;  %v4466_v20 = vmul.f32 %v4124_v2, %v220_v31  ;;  %7210 = vst [vmem:[#allocation77_spill] sm:$0xff] %v4471_v38  ;;  %v222_v52 = vunpack.c.l.bf16 %v70_v0  ;;  %v761_v31 = vld [vmem:[%s6921_s0 + $0x650] sm:$0xff]  ;;  %v4490_v0 = vmul.f32 %v4154_v39, %v223_v58 }
  0xc3   :  { %v4458_v45 = vpop.f32.mrf.mxu0  ;;  %v4460_v13 = vpop.f32.mrf.mxu1  ;;  %1398 = vmatpush.msra.mxu2 %v761_v31 }
  0xc4   :  { %7209 = vst [vmem:[#allocation76_spill] sm:$0xff] %v4466_v20 }
  0xc5   :  { %v952_v49 = vpop.f32.mrf.mxu2  ;;  %v1035_v22 = vpop.f32.mrf.mxu3  ;;  %7212 = vst [vmem:[#allocation79_spill] sm:$0xff] %v4490_v0 }
  0xc6   :  { %v4468_v57 = vadd.f32 %v1035_v22, %v952_v49  ;;  %1265 = vmatmul.f32.gmra.mxu0 %v4453_v62  ;;  %1348 = vmatmul.f32.gmra.mxu1 %v4456_v17  ;;  %v572_v49 = vld [vmem:[%s6921_s0 + $0x68] sm:$0xff]  ;;  %v230_v22 = vunpack.c.h.bf16 %v74_v61  ;;  %v4487_v17 = vmul.f32 %v4152_v37, %v222_v52  ;;  %v793_v62 = vld [vmem:[%s6921_s0 + $0x750] sm:$0xff]  ;;  %v4503_v52 = vmul.f32 %v4124_v2, %v229_v36 }
  0xc7   :  { %1646 = vmatpush.msra.mxu1 %v572_v49  ;;  %v75_v49 = vld [vmem:[%s6923_s2 + $0x19c] sm:$0xff]  ;;  %1481 = vmatpush.msra.mxu3 %v793_v62 }
  0xc8   :  { %7211 = vst [vmem:[#allocation78_spill] sm:$0xff] %v4487_v17  ;;  %v231_v21 = vunpack.c.l.bf16 %v75_v49  ;;  %v232_v62 = vunpack.c.h.bf16 %v75_v49  ;;  %v570_v49 = vld [vmem:[%s6921_s0 + $0x58] sm:$0xff] }
  0xc9   :  { %7213 = vst [vmem:[#allocation80_spill] sm:$0xff] %v4503_v52  ;;  %1647 = vmatpush.msra.mxu1 %v570_v49 }
  0xca   :  { %1102 = vmatmul.f32.gmra.mxu2 %v4466_v20  ;;  %1185 = vmatmul.f32.gmra.mxu3 %v4471_v38  ;;  %v4508_v20 = vmul.f32 %v4126_v5, %v230_v22  ;;  %v4518_v36 = vmul.f32 %v4152_v37, %v231_v21  ;;  %v4521_v22 = vmul.f32 %v4154_v39, %v232_v62 }
  0xcb   :  { %v4495_v23 = vpop.f32.mrf.mxu0  ;;  %v4497_v31 = vpop.f32.mrf.mxu1 }
  0xcc   :  { %7214 = vst [vmem:[#allocation81_spill] sm:$0xff] %v4508_v20 }
  0xcd   :  { %v955_v61 = vpop.f32.mrf.mxu2  ;;  %v1038_v38 = vpop.f32.mrf.mxu3  ;;  %7215 = vst [vmem:[#allocation82_spill] sm:$0xff] %v4518_v36 }
  0xce   :  { %v4505_v58 = vadd.f32 %v1038_v38, %v955_v61  ;;  %1268 = vmatmul.f32.gmra.mxu0 %v4487_v17  ;;  %1351 = vmatmul.f32.gmra.mxu1 %v4490_v0  ;;  %v239_v38 = vunpack.c.h.bf16 %v79_v35  ;;  %7216 = vst [vmem:[#allocation83_spill] sm:$0xff] %v4521_v22  ;;  %v759_v61 = vld [vmem:[%s6921_s0 + $0x640] sm:$0xff] }
  0xcf   :  { %v80_v35 = vld [vmem:[%s6923_s2 + $0x1c0] sm:$0xff]  ;;  %1399 = vmatpush.msra.mxu2 %v759_v61 }
  0xd0   :  { %v4542_v24 = vmul.f32 %v4126_v5, %v239_v38  ;;  %v240_v61 = vunpack.c.l.bf16 %v80_v35  ;;  %v241_v49 = vunpack.c.h.bf16 %v80_v35  ;;  %v248_v38 = vunpack.c.h.bf16 %v84_v10 }
  0xd2   :  { %1105 = vmatmul.f32.gmra.mxu2 %v4503_v52  ;;  %1188 = vmatmul.f32.gmra.mxu3 %v4508_v20  ;;  %v4537_v20 = vmul.f32 %v4124_v2, %v238_v25  ;;  %7218 = vst [vmem:[#allocation85_spill] sm:$0xff] %v4542_v24  ;;  %v791_v25 = vld [vmem:[%s6921_s0 + $0x740] sm:$0xff] }
  0xd3   :  { %v4529_v0 = vpop.f32.mrf.mxu0  ;;  %v4531_v52 = vpop.f32.mrf.mxu1  ;;  %1482 = vmatpush.msra.mxu3 %v791_v25  ;;  %v85_v25 = vld [vmem:[%s6923_s2 + $0x1e4] sm:$0xff] }
  0xd4   :  { %7217 = vst [vmem:[#allocation84_spill] sm:$0xff] %v4537_v20  ;;  %v250_v26 = vunpack.c.h.bf16 %v85_v25 }
  0xd5   :  { %v958_v21 = vpop.f32.mrf.mxu2  ;;  %v1041_v62 = vpop.f32.mrf.mxu3 }
  0xd6   :  { %v4539_v17 = vadd.f32 %v1041_v62, %v958_v21  ;;  %1271 = vmatmul.f32.gmra.mxu0 %v4518_v36  ;;  %1354 = vmatmul.f32.gmra.mxu1 %v4521_v22  ;;  %v247_v21 = vunpack.c.l.bf16 %v84_v10  ;;  %v4555_v62 = vmul.f32 %v4152_v37, %v240_v61  ;;  %v4558_v22 = vmul.f32 %v4154_v39, %v241_v49  ;;  %v89_v49 = vld [vmem:[%s6923_s2 + $0x200] sm:$0xff] }
  0xd7   :  { %v4573_v61 = vmul.f32 %v4126_v5, %v248_v38  ;;  %v256_v38 = vunpack.c.l.bf16 %v89_v49 }
  0xd8   :  { %7219 = vst [vmem:[#allocation86_spill] sm:$0xff] %v4555_v62 }
  0xd9   :  { %7220 = vst [vmem:[#allocation87_spill] sm:$0xff] %v4558_v22 }
  0xda   :  { %1108 = vmatmul.f32.gmra.mxu2 %v4537_v20  ;;  %1191 = vmatmul.f32.gmra.mxu3 %v4542_v24  ;;  %v4568_v20 = vmul.f32 %v4124_v2, %v247_v21  ;;  %7222 = vst [vmem:[#allocation89_spill] sm:$0xff] %v4573_v61  ;;  %v249_v24 = vunpack.c.l.bf16 %v85_v25  ;;  %v757_v21 = vld [vmem:[%s6921_s0 + $0x630] sm:$0xff]  ;;  %v257_v25 = vunpack.c.h.bf16 %v89_v49 }
  0xdb   :  { %v4560_v36 = vpop.f32.mrf.mxu0  ;;  %v4562_v35 = vpop.f32.mrf.mxu1  ;;  %1400 = vmatpush.msra.mxu2 %v757_v21  ;;  %v4595_v21 = vmul.f32 %v4154_v39, %v250_v26  ;;  %v94_v26 = vld [vmem:[%s6923_s2 + $0x224] sm:$0xff] }
  0xdc   :  { %7221 = vst [vmem:[#allocation88_spill] sm:$0xff] %v4568_v20  ;;  %v265_v48 = vunpack.c.l.bf16 %v94_v26 }
  0xdd   :  { %v961_v16 = vpop.f32.mrf.mxu2  ;;  %v1044_v34 = vpop.f32.mrf.mxu3  ;;  %7224 = vst [vmem:[#allocation91_spill] sm:$0xff] %v4595_v21 }
  0xde   :  { %v4570_v10 = vadd.f32 %v1044_v34, %v961_v16  ;;  %1274 = vmatmul.f32.gmra.mxu0 %v4555_v62  ;;  %1357 = vmatmul.f32.gmra.mxu1 %v4558_v22  ;;  %v568_v34 = vld [vmem:[%s6921_s0 + $0x48] sm:$0xff]  ;;  %v789_v16 = vld [vmem:[%s6921_s0 + $0x730] sm:$0xff]  ;;  %v4592_v22 = vmul.f32 %v4152_v37, %v249_v24  ;;  %v4610_v24 = vmul.f32 %v4126_v5, %v257_v25 }
  0xdf   :  { %1648 = vmatpush.msra.mxu1 %v568_v34  ;;  %1483 = vmatpush.msra.mxu3 %v789_v16  ;;  %v90_v34 = vld [vmem:[%s6923_s2 + $0x208] sm:$0xff] }
  0xe0   :  { %7223 = vst [vmem:[#allocation90_spill] sm:$0xff] %v4592_v22  ;;  %v259_v12 = vunpack.c.h.bf16 %v90_v34 }
  0xe1   :  { %7227 = vst [vmem:[#allocation94_spill] sm:$0xff] %v4610_v24 }
  0xe2   :  { %1111 = vmatmul.f32.gmra.mxu2 %v4568_v20  ;;  %1194 = vmatmul.f32.gmra.mxu3 %v4573_v61  ;;  %v4605_v20 = vmul.f32 %v4124_v2, %v256_v38  ;;  %v258_v61 = vunpack.c.l.bf16 %v90_v34  ;;  %v815_v38 = vld [vmem:[%s6921_s0 + $0x800] sm:$0xff] }
  0xe3   :  { %v4597_v62 = vpop.f32.mrf.mxu0  ;;  %v4599_v54 = vpop.f32.mrf.mxu1  ;;  %1569 = vmatpush.msra.mxu0 %v815_v38  ;;  %v755_v34 = vld [vmem:[%s6921_s0 + $0x620] sm:$0xff] }
  0xe4   :  { %7225 = vst [vmem:[#allocation92_spill] sm:$0xff] %v4605_v20  ;;  %v4623_v25 = vmul.f32 %v4152_v37, %v258_v61  ;;  %v95_v61 = vld [vmem:[%s6923_s2 + $0x22c] sm:$0xff]  ;;  %1401 = vmatpush.msra.mxu2 %v755_v34 }
  0xe5   :  { %v964_v16 = vpop.f32.mrf.mxu2  ;;  %v1047_v51 = vpop.f32.mrf.mxu3  ;;  %v267_v34 = vunpack.c.l.bf16 %v95_v61  ;;  %v268_v29 = vunpack.c.h.bf16 %v95_v61  ;;  %v100_v61 = vld [vmem:[%s6923_s2 + $0x250] sm:$0xff] }
  0xe6   :  { %v4607_v49 = vadd.f32 %v1047_v51, %v964_v16  ;;  %1277 = vmatmul.f32.gmra.mxu0 %v4592_v22  ;;  %1360 = vmatmul.f32.gmra.mxu1 %v4595_v21  ;;  %v266_v51 = vunpack.c.h.bf16 %v94_v26  ;;  %7228 = vst [vmem:[#allocation95_spill] sm:$0xff] %v4623_v25  ;;  %v4626_v16 = vmul.f32 %v4154_v39, %v259_v12  ;;  %v566_v21 = vld [vmem:[%s6921_s0 + $0x38] sm:$0xff]  ;;  %v787_v12 = vld [vmem:[%s6921_s0 + $0x720] sm:$0xff]  ;;  %v276_v46 = vunpack.c.l.bf16 %v100_v61 }
  0xe7   :  { %1649 = vmatpush.msra.mxu1 %v566_v21  ;;  %v4645_v22 = vmul.f32 %v4124_v2, %v265_v48  ;;  %1484 = vmatpush.msra.mxu3 %v787_v12  ;;  %v99_v21 = vld [vmem:[%s6923_s2 + $0x248] sm:$0xff] }
  0xe8   :  { %7226 = vst [vmem:[#allocation93_spill] sm:$0xff] %v4607_v49  ;;  %v4650_v56 = vmul.f32 %v4126_v5, %v266_v51  ;;  %v274_v8 = vunpack.c.l.bf16 %v99_v21  ;;  %v275_v48 = vunpack.c.h.bf16 %v99_v21  ;;  %v4663_v51 = vmul.f32 %v4154_v39, %v268_v29 }
  0xe9   :  { %7229 = vst [vmem:[#allocation96_spill] sm:$0xff] %v4626_v16 }
  0xea   :  { %1114 = vmatmul.f32.gmra.mxu2 %v4605_v20  ;;  %1197 = vmatmul.f32.gmra.mxu3 %v4610_v24  ;;  %7230 = vst [vmem:[#allocation97_spill] sm:$0xff] %v4645_v22 }
  0xeb   :  { %v4634_v38 = vpop.f32.mrf.mxu0  ;;  %v4636_v20 = vpop.f32.mrf.mxu1  ;;  %7232 = vst [vmem:[#allocation99_spill] sm:$0xff] %v4650_v56 }
  0xec   :  { %7234 = vst [vmem:[#allocation101_spill] sm:$0xff] %v4663_v51 }
  0xed   :  { %v967_v26 = vpop.f32.mrf.mxu2  ;;  %v1050_v24 = vpop.f32.mrf.mxu3 }
  0xee   :  { %v4647_v15 = vadd.f32 %v1050_v24, %v967_v26  ;;  %1280 = vmatmul.f32.gmra.mxu0 %v4623_v25  ;;  %1363 = vmatmul.f32.gmra.mxu1 %v4626_v16  ;;  %v4660_v24 = vmul.f32 %v4152_v37, %v267_v34  ;;  %v753_v16 = vld [vmem:[%s6921_s0 + $0x610] sm:$0xff]  ;;  %v4676_v34 = vmul.f32 %v4124_v2, %v274_v8  ;;  %v564_v8 = vld [vmem:[%s6921_s0 + $0x28] sm:$0xff] }
  0xef   :  { %1402 = vmatpush.msra.mxu2 %v753_v16  ;;  %v104_v25 = vld [vmem:[%s6923_s2 + $0x26c] sm:$0xff]  ;;  %1650 = vmatpush.msra.mxu1 %v564_v8  ;;  %v991_v8 = vadd.f32 %v4318_v32, %v4316_v7  ;;  %v751_v7 = vld [vmem:[%s6921_s0 + $0x600] sm:$0xff] }
  0xf0   :  { %7231 = vst [vmem:[#allocation98_spill] sm:$0xff] %v4647_v15  ;;  %v277_v15 = vunpack.c.h.bf16 %v100_v61  ;;  %v283_v16 = vunpack.c.l.bf16 %v104_v25 }
  0xf1   :  { %7233 = vst [vmem:[#allocation100_spill] sm:$0xff] %v4660_v24  ;;  %1403 = vmatpush.msra.mxu2 %v751_v7 }
  0xf2   :  { %1117 = vmatmul.f32.gmra.mxu2 %v4645_v22  ;;  %1200 = vmatmul.f32.gmra.mxu3 %v4650_v56  ;;  %7235 = vst [vmem:[#allocation102_spill] sm:$0xff] %v4676_v34  ;;  %v4681_v22 = vmul.f32 %v4126_v5, %v275_v48  ;;  %v284_v48 = vunpack.c.h.bf16 %v104_v25  ;;  %v4700_v61 = vmul.f32 %v4154_v39, %v277_v15  ;;  %v109_v15 = vld [vmem:[%s6923_s2 + $0x290] sm:$0xff] }
  0xf3   :  { %v4665_v12 = vpop.f32.mrf.mxu0  ;;  %v4667_v26 = vpop.f32.mrf.mxu1 }
  0xf4   :  { %7237 = vst [vmem:[#allocation104_spill] sm:$0xff] %v4681_v22 }
  0xf5   :  { %v970_v56 = vpop.f32.mrf.mxu2  ;;  %v1053_v21 = vpop.f32.mrf.mxu3  ;;  %7239 = vst [vmem:[#allocation106_spill] sm:$0xff] %v4700_v61 }
  0xf6   :  { %v4678_v29 = vadd.f32 %v1053_v21, %v970_v56  ;;  %1283 = vmatmul.f32.gmra.mxu0 %v4660_v24  ;;  %1366 = vmatmul.f32.gmra.mxu1 %v4663_v51  ;;  %v785_v56 = vld [vmem:[%s6921_s0 + $0x710] sm:$0xff]  ;;  %v4697_v21 = vmul.f32 %v4152_v37, %v276_v46  ;;  %v4711_v46 = vmul.f32 %v4126_v5, %v284_v48  ;;  %v292_v48 = vunpack.c.l.bf16 %v109_v15 }
  0xf7   :  { %1485 = vmatpush.msra.mxu3 %v785_v56 }
  0xf8   :  { %7236 = vst [vmem:[#allocation103_spill] sm:$0xff] %v4678_v29  ;;  %v105_v29 = vld [vmem:[%s6923_s2 + $0x274] sm:$0xff] }
  0xf9   :  { %7238 = vst [vmem:[#allocation105_spill] sm:$0xff] %v4697_v21  ;;  %v285_v19 = vunpack.c.l.bf16 %v105_v29  ;;  %v286_v49 = vunpack.c.h.bf16 %v105_v29 }
  0xfa   :  { %1120 = vmatmul.f32.gmra.mxu2 %v4676_v34  ;;  %1203 = vmatmul.f32.gmra.mxu3 %v4681_v22  ;;  %v4708_v22 = vmul.f32 %v4124_v2, %v283_v16  ;;  %7241 = vst [vmem:[#allocation108_spill] sm:$0xff] %v4711_v46  ;;  %v562_v16 = vld [vmem:[%s6921_s0 + $0x18] sm:$0xff] }
  0xfb   :  { %v1239_v51 = vpop.f32.mrf.mxu0  ;;  %v1322_v24 = vpop.f32.mrf.mxu1  ;;  %1651 = vmatpush.msra.mxu1 %v562_v16  ;;  %v4727_v29 = vmul.f32 %v4152_v37, %v285_v19 }
  0xfc   :  { %7240 = vst [vmem:[#allocation107_spill] sm:$0xff] %v4708_v22 }
  0xfd   :  { %v1073_v56 = vpop.f32.mrf.mxu2  ;;  %v1156_v34 = vpop.f32.mrf.mxu3  ;;  %7242 = vst [vmem:[#allocation109_spill] sm:$0xff] %v4727_v29 }
  0xfe   :  { %v1074_v25 = vadd.f32 %v1073_v56, %v991_v8  ;;  %1286 = vmatmul.f32.gmra.mxu0 %v4697_v21  ;;  %1369 = vmatmul.f32.gmra.mxu1 %v4700_v61  ;;  %v293_v56 = vunpack.c.h.bf16 %v109_v15  ;;  %v994_v15 = vadd.f32 %v4355_v44, %v4353_v43 }
 0x100   :  { %v1157_v32 = vadd.f32 %v1156_v34, %v1074_v25  ;;  %v4730_v34 = vmul.f32 %v4154_v39, %v286_v49  ;;  %v783_v25 = vld [vmem:[%s6921_s0 + $0x700] sm:$0xff]  ;;  %v4743_v49 = vmul.f32 %v4124_v2, %v292_v48 }
 0x101   :  { %1486 = vmatpush.msra.mxu3 %v783_v25  ;;  %v114_v25 = vld [vmem:[%s6923_s2 + $0x2b4] sm:$0xff] }
 0x102   :  { %v1240_v8 = vadd.f32 %v1239_v51, %v1157_v32  ;;  %1123 = vmatmul.f32.gmra.mxu2 %v4708_v22  ;;  %1206 = vmatmul.f32.gmra.mxu3 %v4711_v46  ;;  %7243 = vst [vmem:[#allocation110_spill] sm:$0xff] %v4730_v34  ;;  %v110_v51 = vld [vmem:[%s6923_s2 + $0x298] sm:$0xff]  ;;  %v4746_v46 = vmul.f32 %v4126_v5, %v293_v56  ;;  %v302_v48 = vunpack.c.h.bf16 %v114_v25 }
 0x103   :  { %v1242_v61 = vpop.f32.mrf.mxu0  ;;  %v1325_v21 = vpop.f32.mrf.mxu1  ;;  %7244 = vst [vmem:[#allocation111_spill] sm:$0xff] %v4743_v49  ;;  %v294_v43 = vunpack.c.l.bf16 %v110_v51  ;;  %v295_v44 = vunpack.c.h.bf16 %v110_v51 }
 0x104   :  { %v4740_v32 = vadd.f32 %v1322_v24, %v1240_v8  ;;  %7245 = vst [vmem:[#allocation112_spill] sm:$0xff] %v4746_v46  ;;  %v301_v8 = vunpack.c.l.bf16 %v114_v25  ;;  %v560_v25 = vld [vmem:[%s6921_s0 + $0x8] sm:$0xff] }
 0x105   :  { %v1076_v19 = vpop.f32.mrf.mxu2  ;;  %v1159_v7 = vpop.f32.mrf.mxu3  ;;  %v4756_v56 = vmul.f32 %v4152_v37, %v294_v43  ;;  %v654_v43 = vld [vmem:[%s6921_s0 + $0x2f8] sm:$0xff]  ;;  %1652 = vmatpush.msra.mxu1 %v560_v25 }
 0x106   :  { %v1077_v16 = vadd.f32 %v1076_v19, %v994_v15  ;;  %1289 = vmatmul.f32.gmra.mxu0 %v4727_v29  ;;  %1372 = vmatmul.f32.gmra.mxu1 %v4730_v34  ;;  %v4759_v15 = vmul.f32 %v4154_v39, %v295_v44  ;;  %v622_v19 = vld [vmem:[%s6921_s0 + $0x1f8] sm:$0xff] }
 0x107   :  { %1720 = vmatpush.msrb.mxu2 %v622_v19  ;;  %1803 = vmatpush.msrb.mxu3 %v654_v43 }
 0x108   :  { %v1160_v24 = vadd.f32 %v1159_v7, %v1077_v16  ;;  %7246 = vst [vmem:[#allocation113_spill] sm:$0xff] %v4759_v15  ;;  %v997_v7 = vadd.f32 %v4392_v47, %v4390_v4  ;;  %v4781_v4 = vmul.f32 %v4126_v5, %v302_v48  ;;  %v119_v47 = vld [vmem:[%s6923_s2 + $0x2d8] sm:$0xff] }
 0x109   :  { %v310_v29 = vunpack.c.l.bf16 %v119_v47 }
 0x10a   :  { %v1243_v22 = vadd.f32 %v1242_v61, %v1160_v24  ;;  %1126 = vmatmul.f32.gmra.mxu2 %v4743_v49  ;;  %1209 = vmatmul.f32.gmra.mxu3 %v4746_v46  ;;  %v115_v61 = vld [vmem:[%s6923_s2 + $0x2bc] sm:$0xff]  ;;  %v4778_v46 = vmul.f32 %v4124_v2, %v301_v8  ;;  %7247 = vst [vmem:[#allocation114_spill] sm:$0xff] %v4781_v4 }
 0x10b   :  { %v1245_v34 = vpop.f32.mrf.mxu0  ;;  %v1328_v51 = vpop.f32.mrf.mxu1 }
 0x10c   :  { %v4769_v16 = vadd.f32 %v1325_v21, %v1243_v22  ;;  %v303_v22 = vunpack.c.l.bf16 %v115_v61  ;;  %v304_v21 = vunpack.c.h.bf16 %v115_v61  ;;  %v120_v61 = vld [vmem:[%s6923_s2 + $0x2e0] sm:$0xff] }
 0x10d   :  { %v1079_v44 = vpop.f32.mrf.mxu2  ;;  %v1162_v24 = vpop.f32.mrf.mxu3 }
 0x10e   :  { %v1080_v19 = vadd.f32 %v1079_v44, %v997_v7  ;;  %1292 = vmatmul.f32.gmra.mxu0 %v4756_v56  ;;  %1375 = vmatmul.f32.gmra.mxu1 %v4759_v15  ;;  %v311_v7 = vunpack.c.h.bf16 %v119_v47  ;;  %v4791_v48 = vmul.f32 %v4152_v37, %v303_v22  ;;  %v4794_v25 = vmul.f32 %v4154_v39, %v304_v21 }
 0x10f   :  { %v4807_v22 = vmul.f32 %v4124_v2, %v310_v29  ;;  %v620_v29 = vld [vmem:[%s6921_s0 + $0x1e8] sm:$0xff] }
 0x110   :  { %v1163_v49 = vadd.f32 %v1162_v24, %v1080_v19  ;;  %7248 = vst [vmem:[#allocation115_spill] sm:$0xff] %v4791_v48  ;;  %v686_v24 = vld [vmem:[%s6921_s0 + $0x3f8] sm:$0xff]  ;;  %v4810_v15 = vmul.f32 %v4126_v5, %v311_v7  ;;  %1721 = vmatpush.msrb.mxu2 %v620_v29 }
 0x111   :  { %7249 = vst [vmem:[#allocation116_spill] sm:$0xff] %v4794_v25  ;;  %1886 = vmatpush.msrb.mxu0 %v686_v24 }
 0x112   :  { %v1246_v8 = vadd.f32 %v1245_v34, %v1163_v49  ;;  %1129 = vmatmul.f32.gmra.mxu2 %v4778_v46  ;;  %1212 = vmatmul.f32.gmra.mxu3 %v4781_v4  ;;  %v1000_v34 = vadd.f32 %v4423_v55, %v4421_v50  ;;  %7250 = vst [vmem:[#allocation117_spill] sm:$0xff] %v4807_v22  ;;  %v124_v55 = vld [vmem:[%s6923_s2 + $0x2fc] sm:$0xff]  ;;  %v312_v50 = vunpack.c.l.bf16 %v120_v61 }
 0x113   :  { %v1248_v43 = vpop.f32.mrf.mxu0  ;;  %v1331_v44 = vpop.f32.mrf.mxu1  ;;  %7251 = vst [vmem:[#allocation118_spill] sm:$0xff] %v4810_v15  ;;  %v319_v24 = vunpack.c.l.bf16 %v124_v55 }
 0x114   :  { %v4801_v49 = vadd.f32 %v1328_v51, %v1246_v8  ;;  %v313_v51 = vunpack.c.h.bf16 %v120_v61  ;;  %v718_v8 = vld [vmem:[%s6921_s0 + $0x4f8] sm:$0xff]  ;;  %v4829_v61 = vmul.f32 %v4152_v37, %v312_v50 }
 0x115   :  { %v1082_v19 = vpop.f32.mrf.mxu2  ;;  %v1165_v47 = vpop.f32.mrf.mxu3  ;;  %1969 = vmatpush.msrb.mxu1 %v718_v8 }
 0x116   :  { %v1083_v21 = vadd.f32 %v1082_v19, %v1000_v34  ;;  %1295 = vmatmul.f32.gmra.mxu0 %v4791_v48  ;;  %1378 = vmatmul.f32.gmra.mxu1 %v4794_v25  ;;  %v652_v34 = vld [vmem:[%s6921_s0 + $0x2e8] sm:$0xff]  ;;  %v320_v19 = vunpack.c.h.bf16 %v124_v55  ;;  %v4832_v48 = vmul.f32 %v4154_v39, %v313_v51  ;;  %v1003_v55 = vadd.f32 %v4460_v13, %v4458_v45  ;;  %v21_v13 = vld [vmem:[%s6923_s2 + $0x18] sm:$0xff] }
 0x117   :  { %1804 = vmatpush.msrb.mxu3 %v652_v34  ;;  %v4845_v51 = vmul.f32 %v4124_v2, %v319_v24  ;;  %v134_v24 = vunpack.c.l.bf16 %v21_v13 }
 0x118   :  { %v1166_v7 = vadd.f32 %v1165_v47, %v1083_v21  ;;  %7252 = vst [vmem:[#allocation119_spill] sm:$0xff] %v4832_v48  ;;  %v125_v21 = vld [vmem:[%s6923_s2 + $0x304] sm:$0xff]  ;;  %v4848_v34 = vmul.f32 %v4126_v5, %v320_v19 }
 0x119   :  { %v321_v45 = vunpack.c.l.bf16 %v125_v21  ;;  %v684_v5 = vld [vmem:[%s6921_s0 + $0x3e8] sm:$0xff] }
 0x11a   :  { %v1249_v25 = vadd.f32 %v1248_v43, %v1166_v7  ;;  %1132 = vmatmul.f32.gmra.mxu2 %v4807_v22  ;;  %1215 = vmatmul.f32.gmra.mxu3 %v4810_v15  ;;  %v327_v43 = vld [vmem:[%s6922_s1 + $0x8] sm:$0x1]  ;;  %v340_v15 = vperm.slane %v4109_v40, 4  ;;  %v341_v22 = vperm.slane %v4109_v40, 6  ;;  %v618_v40 = vld [vmem:[%s6921_s0 + $0x1d8] sm:$0xff] }
 0x11b   :  { %v1251_v29 = vpop.f32.mrf.mxu0  ;;  %v1334_v47 = vpop.f32.mrf.mxu1  ;;  %v330_v2 = vunpack.c.l.bf16 %v327_v43  ;;  %1887 = vmatpush.msrb.mxu0 %v684_v5  ;;  %1722 = vmatpush.msrb.mxu2 %v618_v40 }
 0x11c   :  { %v4842_v8 = vadd.f32 %v1331_v44, %v1249_v25  ;;  %v322_v25 = vunpack.c.h.bf16 %v125_v21  ;;  %v4863_v19 = vperm.slane %v340_v15, 0  ;;  %v716_v15 = vld [vmem:[%s6921_s0 + $0x4e8] sm:$0xff] }
 0x11d   :  { %v1085_v50 = vpop.f32.mrf.mxu2  ;;  %v1168_v7 = vpop.f32.mrf.mxu3  ;;  %v342_v43 = vperm.slane %v330_v2, 0  ;;  %1970 = vmatpush.msrb.mxu1 %v716_v15 }
 0x11e   :  { %v1086_v4 = vadd.f32 %v1085_v50, %v1003_v55  ;;  %1298 = vmatmul.f32.gmra.mxu0 %v4829_v61  ;;  %1381 = vmatmul.f32.gmra.mxu1 %v4832_v48  ;;  %v135_v55 = vunpack.c.h.bf16 %v21_v13  ;;  %v4865_v50 = vperm.slane %v341_v22, 0  ;;  %v4873_v21 = vmul.f32 %v4154_v39, %v322_v25  ;;  %v650_v22 = vld [vmem:[%s6921_s0 + $0x2d8] sm:$0xff]  ;;  %v22_v13 = vld [vmem:[%s6923_s2 + $0x20] sm:$0xf] }
 0x11f   :  { %1805 = vmatpush.msrb.mxu3 %v650_v22  ;;  %v4889_v2 = vmul.f32 %v4863_v19, %v134_v24  ;;  %v136_v40 = vunpack.c.l.bf16 %v22_v13  ;;  %v4896_v15 = vperm.slane %v342_v43, 0  ;;  %v682_v43 = vld [vmem:[%s6921_s0 + $0x3d8] sm:$0xff] }
 0x120   :  { %v1169_v44 = vadd.f32 %v1168_v7, %v1086_v4  ;;  %v4870_v4 = vmul.f32 %v4152_v37, %v321_v45  ;;  %7253 = vst [vmem:[#allocation120_spill] sm:$0xff] %v4873_v21  ;;  %v1006_v37 = vadd.f32 %v4497_v31, %v4495_v23  ;;  %v4893_v5 = vmul.f32 %v4865_v50, %v135_v55  ;;  %v26_v23 = vld [vmem:[%s6923_s2 + $0x3c] sm:$0xff] }
 0x121   :  { %v144_v24 = vunpack.c.h.bf16 %v26_v23  ;;  %v4904_v55 = vmul.f32 %v4896_v15, %v136_v40  ;;  %1888 = vmatpush.msrb.mxu0 %v682_v43 }
 0x122   :  { %v1252_v48 = vadd.f32 %v1251_v29, %v1169_v44  ;;  %1135 = vmatmul.f32.gmra.mxu2 %v4845_v51  ;;  %1218 = vmatmul.f32.gmra.mxu3 %v4848_v34 }
 0x123   :  { %v1254_v29 = vpop.f32.mrf.mxu0  ;;  %v1337_v7 = vpop.f32.mrf.mxu1 }
 0x124   :  { %v4886_v39 = vadd.f32 %v1334_v47, %v1252_v48  ;;  %v143_v47 = vunpack.c.l.bf16 %v26_v23 }
 0x125   :  { %v1088_v45 = vpop.f32.mrf.mxu2  ;;  %v1171_v25 = vpop.f32.mrf.mxu3 }
 0x126   :  { %v1089_v44 = vadd.f32 %v1088_v45, %v1006_v37  ;;  %1301 = vmatmul.f32.gmra.mxu0 %v4870_v4  ;;  %1384 = vmatmul.f32.gmra.mxu1 %v4873_v21  ;;  %v1009_v37 = vadd.f32 %v4531_v52, %v4529_v0  ;;  %v4923_v43 = vmul.f32 %v4863_v19, %v143_v47 }
 0x127   :  { %v4926_v0 = vmul.f32 %v4865_v50, %v144_v24 }
 0x128   :  { %v1172_v31 = vadd.f32 %v1171_v25, %v1089_v44  ;;  %v616_v25 = vld [vmem:[%s6921_s0 + $0x1c8] sm:$0xff]  ;;  %v714_v44 = vld [vmem:[%s6921_s0 + $0x4d8] sm:$0xff] }
 0x129   :  { %1723 = vmatpush.msrb.mxu2 %v616_v25  ;;  %1971 = vmatpush.msrb.mxu1 %v714_v44 }
 0x12a   :  { %v1255_v48 = vadd.f32 %v1254_v29, %v1172_v31  ;;  %1404 = vmatmul.f32.vlgmr.msra.gmra.mxu2 %v4889_v2  ;;  %1487 = vmatmul.f32.vlgmr.msra.gmra.mxu3 %v4893_v5  ;;  %v27_v29 = vld [vmem:[%s6923_s2 + $0x44] sm:$0xf] }
 0x12b   :  { %v1257_v22 = vpop.f32.mrf.mxu0  ;;  %v1340_v13 = vpop.f32.mrf.mxu1  ;;  %v145_v52 = vunpack.c.l.bf16 %v27_v29 }
 0x12c   :  { %v4914_v45 = vadd.f32 %v1337_v7, %v1255_v48  ;;  %v648_v7 = vld [vmem:[%s6921_s0 + $0x2c8] sm:$0xff]  ;;  %v31_v48 = vld [vmem:[%s6923_s2 + $0x60] sm:$0xff] }
 0x12d   :  { %v1091_v40 = vpop.f32.mrf.mxu2  ;;  %v1174_v23 = vpop.f32.mrf.mxu3  ;;  %1806 = vmatpush.msrb.mxu3 %v648_v7  ;;  %v152_v24 = vunpack.c.l.bf16 %v31_v48  ;;  %v153_v25 = vunpack.c.h.bf16 %v31_v48  ;;  %v1012_v7 = vadd.f32 %v4562_v35, %v4560_v36  ;;  %v680_v36 = vld [vmem:[%s6921_s0 + $0x3c8] sm:$0xff]  ;;  %v614_v35 = vld [vmem:[%s6921_s0 + $0x1b8] sm:$0xff] }
 0x12e   :  { %v1092_v31 = vadd.f32 %v1091_v40, %v1009_v37  ;;  %3349 = vmatmul.msk.f32.vlgmr.msra.gmra.mxu0 %vm823_vm0, %v4904_v55  ;;  %1653 = vmatmul.f32.vlgmr.msra.gmra.mxu1 %v3698_v53  ;;  %v4940_v53 = vmul.f32 %v4896_v15, %v145_v52  ;;  %v32_v40 = vld [vmem:[%s6923_s2 + $0x68] sm:$0xf] }
 0x12f   :  { %v4950_v21 = vmul.f32 %v4863_v19, %v152_v24  ;;  %v4953_v52 = vmul.f32 %v4865_v50, %v153_v25  ;;  %v154_v48 = vunpack.c.l.bf16 %v32_v40  ;;  %1889 = vmatpush.msrb.mxu0 %v680_v36  ;;  %1724 = vmatpush.msrb.mxu2 %v614_v35  ;;  %v646_v24 = vld [vmem:[%s6921_s0 + $0x2b8] sm:$0xff]  ;;  %v37_v36 = vld [vmem:[%s6923_s2 + $0x8c] sm:$0xf]  ;;  %v1015_v35 = vadd.f32 %v4599_v54, %v4597_v62 }
 0x130   :  { %v1175_v47 = vadd.f32 %v1174_v23, %v1092_v31  ;;  %1807 = vmatpush.msrb.mxu3 %v646_v24  ;;  %v41_v54 = vld [vmem:[%s6923_s2 + $0xa8] sm:$0xff] }
 0x131   :  { %7254 = vst [vmem:[#allocation121_spill] sm:$0xff] %v4953_v52 }
 0x132   :  { %v1258_v37 = vadd.f32 %v1257_v22, %v1175_v47  ;;  %1407 = vmatmul.f32.gmra.mxu2 %v4923_v43  ;;  %1490 = vmatmul.f32.gmra.mxu3 %v4926_v0 }
 0x133   :  { %v1260_v29 = vpop.f32.mrf.mxu0  ;;  %v1343_v44 = vpop.f32.mrf.mxu1 }
 0x134   :  { %v4947_v23 = vadd.f32 %v1340_v13, %v1258_v37  ;;  %v36_v13 = vld [vmem:[%s6923_s2 + $0x84] sm:$0xff] }
 0x135   :  { %v1094_v22 = vpop.f32.mrf.mxu2  ;;  %v1177_v31 = vpop.f32.mrf.mxu3  ;;  %v161_v40 = vunpack.c.l.bf16 %v36_v13 }
 0x136   :  { %v1095_v47 = vadd.f32 %v1094_v22, %v1012_v7  ;;  %3350 = vmatmul.msk.f32.gmra.mxu0 %vm823_vm0, %v4940_v53  ;;  %1656 = vmatmul.f32.gmra.mxu1 %v3750_v9  ;;  %v712_v9 = vld [vmem:[%s6921_s0 + $0x4c8] sm:$0xff]  ;;  %v162_v7 = vunpack.c.h.bf16 %v36_v13  ;;  %v4976_v22 = vmul.f32 %v4896_v15, %v154_v48  ;;  %v163_v13 = vunpack.c.l.bf16 %v37_v36 }
 0x137   :  { %1972 = vmatpush.msrb.mxu1 %v712_v9  ;;  %v612_v36 = vld [vmem:[%s6921_s0 + $0x1a8] sm:$0xff] }
 0x138   :  { %v1178_v37 = vadd.f32 %v1177_v31, %v1095_v47  ;;  %7255 = vst [vmem:[#allocation122_spill] sm:$0xff] %v4976_v22  ;;  %v4989_v48 = vmul.f32 %v4865_v50, %v162_v7  ;;  %v171_v7 = vunpack.c.h.bf16 %v41_v54  ;;  %1725 = vmatpush.msrb.mxu2 %v612_v36 }
 0x13a   :  { %v1261_v25 = vadd.f32 %v1260_v29, %v1178_v37  ;;  %1410 = vmatmul.f32.gmra.mxu2 %v4950_v21  ;;  %1493 = vmatmul.f32.gmra.mxu3 %v4953_v52  ;;  %v4986_v52 = vmul.f32 %v4863_v19, %v161_v40  ;;  %7257 = vst [vmem:[#allocation124_spill] sm:$0xff] %v4989_v48  ;;  %v170_v40 = vunpack.c.l.bf16 %v41_v54  ;;  %v644_v54 = vld [vmem:[%s6921_s0 + $0x2a8] sm:$0xff] }
 0x13b   :  { %v1263_v31 = vpop.f32.mrf.mxu0  ;;  %v1346_v47 = vpop.f32.mrf.mxu1  ;;  %1808 = vmatpush.msrb.mxu3 %v644_v54  ;;  %v610_v54 = vld [vmem:[%s6921_s0 + $0x198] sm:$0xff] }
 0x13c   :  { %v4983_v9 = vadd.f32 %v1343_v44, %v1261_v25  ;;  %7256 = vst [vmem:[#allocation123_spill] sm:$0xff] %v4986_v52  ;;  %v678_v44 = vld [vmem:[%s6921_s0 + $0x3b8] sm:$0xff]  ;;  %1726 = vmatpush.msrb.mxu2 %v610_v54 }
 0x13d   :  { %v1097_v29 = vpop.f32.mrf.mxu2  ;;  %v1180_v37 = vpop.f32.mrf.mxu3  ;;  %1890 = vmatpush.msrb.mxu0 %v678_v44 }
 0x13e   :  { %v1098_v24 = vadd.f32 %v1097_v29, %v1015_v35  ;;  %3351 = vmatmul.msk.f32.gmra.mxu0 %vm823_vm0, %v4976_v22  ;;  %1659 = vmatmul.f32.gmra.mxu1 %v3808_v33  ;;  %v5003_v33 = vmul.f32 %v4896_v15, %v163_v13  ;;  %v710_v35 = vld [vmem:[%s6921_s0 + $0x4b8] sm:$0xff]  ;;  %v5025_v22 = vmul.f32 %v4865_v50, %v171_v7 }
 0x13f   :  { %1973 = vmatpush.msrb.mxu1 %v710_v35 }
 0x140   :  { %v1181_v62 = vadd.f32 %v1180_v37, %v1098_v24  ;;  %v1018_v24 = vadd.f32 %v4636_v20, %v4634_v38  ;;  %v46_v38 = vld [vmem:[%s6923_s2 + $0xcc] sm:$0xff] }
 0x141   :  { %v180_v36 = vunpack.c.h.bf16 %v46_v38 }
 0x142   :  { %v1264_v25 = vadd.f32 %v1263_v31, %v1181_v62  ;;  %1413 = vmatmul.f32.gmra.mxu2 %v4986_v52  ;;  %1496 = vmatmul.f32.gmra.mxu3 %v4989_v48  ;;  %v42_v31 = vld [vmem:[%s6923_s2 + $0xb0] sm:$0xf]  ;;  %v5022_v52 = vmul.f32 %v4863_v19, %v170_v40  ;;  %v179_v40 = vunpack.c.l.bf16 %v46_v38 }
 0x143   :  { %v1266_v29 = vpop.f32.mrf.mxu0  ;;  %v1349_v37 = vpop.f32.mrf.mxu1  ;;  %v172_v20 = vunpack.c.l.bf16 %v42_v31  ;;  %v1021_v31 = vadd.f32 %v4667_v26, %v4665_v12  ;;  %v5055_v12 = vmul.f32 %v4865_v50, %v180_v36 }
 0x144   :  { %v5016_v13 = vadd.f32 %v1346_v47, %v1264_v25  ;;  %v5052_v38 = vmul.f32 %v4863_v19, %v179_v40 }
 0x145   :  { %v1100_v62 = vpop.f32.mrf.mxu2  ;;  %v1183_v44 = vpop.f32.mrf.mxu3  ;;  %v5036_v7 = vmul.f32 %v4896_v15, %v172_v20 }
 0x146   :  { %v1101_v48 = vadd.f32 %v1100_v62, %v1018_v24  ;;  %3352 = vmatmul.msk.f32.gmra.mxu0 %vm823_vm0, %v5003_v33  ;;  %1662 = vmatmul.f32.gmra.mxu1 %v3866_v63  ;;  %v47_v63 = vld [vmem:[%s6923_s2 + $0xd4] sm:$0xf] }
 0x147   :  { %7258 = vst [vmem:[#allocation125_spill] sm:$0xff] %v5036_v7  ;;  %v181_v26 = vunpack.c.l.bf16 %v47_v63 }
 0x148   :  { %v1184_v47 = vadd.f32 %v1183_v44, %v1101_v48 }
 0x14a   :  { %v1267_v25 = vadd.f32 %v1266_v29, %v1184_v47  ;;  %1416 = vmatmul.f32.gmra.mxu2 %v5022_v52  ;;  %1499 = vmatmul.f32.gmra.mxu3 %v5025_v22  ;;  %v676_v29 = vld [vmem:[%s6921_s0 + $0x3a8] sm:$0xff]  ;;  %v642_v47 = vld [vmem:[%s6921_s0 + $0x298] sm:$0xff] }
 0x14b   :  { %v1269_v35 = vpop.f32.mrf.mxu0  ;;  %v1352_v24 = vpop.f32.mrf.mxu1  ;;  %1891 = vmatpush.msrb.mxu0 %v676_v29  ;;  %1809 = vmatpush.msrb.mxu3 %v642_v47 }
 0x14c   :  { %v5043_v48 = vadd.f32 %v1349_v37, %v1267_v25  ;;  %v708_v37 = vld [vmem:[%s6921_s0 + $0x4a8] sm:$0xff]  ;;  %v51_v25 = vld [vmem:[%s6923_s2 + $0xf0] sm:$0xff] }
 0x14d   :  { %v1103_v62 = vpop.f32.mrf.mxu2  ;;  %v1186_v44 = vpop.f32.mrf.mxu3  ;;  %1974 = vmatpush.msrb.mxu1 %v708_v37  ;;  %v189_v63 = vunpack.c.h.bf16 %v51_v25 }
 0x14e   :  { %v1104_v20 = vadd.f32 %v1103_v62, %v1021_v31  ;;  %3353 = vmatmul.msk.f32.gmra.mxu0 %vm823_vm0, %v5036_v7  ;;  %1665 = vmatmul.f32.gmra.mxu1 %v3906_v18  ;;  %v188_v18 = vunpack.c.l.bf16 %v51_v25  ;;  %v5072_v31 = vmul.f32 %v4896_v15, %v181_v26  ;;  %v52_v62 = vld [vmem:[%s6923_s2 + $0xf8] sm:$0xf] }
 0x14f   :  { %v5084_v47 = vmul.f32 %v4865_v50, %v189_v63  ;;  %v190_v26 = vunpack.c.l.bf16 %v52_v62 }
 0x150   :  { %v1187_v40 = vadd.f32 %v1186_v44, %v1104_v20  ;;  %v5081_v20 = vmul.f32 %v4863_v19, %v188_v18 }
 0x151   :  { %7259 = vst [vmem:[#allocation126_spill] sm:$0xff] %v5084_v47  ;;  %v5104_v62 = vmul.f32 %v4896_v15, %v190_v26 }
 0x152   :  { %v1270_v36 = vadd.f32 %v1269_v35, %v1187_v40  ;;  %1419 = vmatmul.f32.gmra.mxu2 %v5052_v38  ;;  %1502 = vmatmul.f32.gmra.mxu3 %v5055_v12  ;;  %v608_v40 = vld [vmem:[%s6921_s0 + $0x188] sm:$0xff] }
 0x153   :  { %v1272_v29 = vpop.f32.mrf.mxu0  ;;  %v1355_v54 = vpop.f32.mrf.mxu1  ;;  %1727 = vmatpush.msrb.mxu2 %v608_v40  ;;  %7260 = vst [vmem:[#allocation127_spill] sm:$0xff] %v5104_v62 }
 0x154   :  { %v5077_v7 = vadd.f32 %v1352_v24, %v1270_v36  ;;  %v674_v24 = vld [vmem:[%s6921_s0 + $0x398] sm:$0xff] }
 0x155   :  { %v1106_v37 = vpop.f32.mrf.mxu2  ;;  %v1189_v44 = vpop.f32.mrf.mxu3  ;;  %1892 = vmatpush.msrb.mxu0 %v674_v24  ;;  %v706_v36 = vld [vmem:[%s6921_s0 + $0x498] sm:$0xff] }
 0x156   :  { %v1107_v35 = vadd.f32 %v1106_v37, %v4329_v14  ;;  %3354 = vmatmul.msk.f32.gmra.mxu0 %vm823_vm0, %v5072_v31  ;;  %1668 = vmatmul.f32.gmra.mxu1 %v3946_v41  ;;  %v56_v14 = vld [vmem:[%s6923_s2 + $0x114] sm:$0xff]  ;;  %v640_v37 = vld [vmem:[%s6921_s0 + $0x288] sm:$0xff]  ;;  %v57_v24 = vld [vmem:[%s6923_s2 + $0x11c] sm:$0xf] }
 0x157   :  { %1975 = vmatpush.msrb.mxu1 %v706_v36  ;;  %v197_v18 = vunpack.c.l.bf16 %v56_v14  ;;  %v198_v63 = vunpack.c.h.bf16 %v56_v14  ;;  %1810 = vmatpush.msrb.mxu3 %v640_v37 }
 0x158   :  { %v1190_v25 = vadd.f32 %v1189_v44, %v1107_v35 }
 0x159   :  { %v5116_v26 = vmul.f32 %v4863_v19, %v197_v18  ;;  %v5119_v36 = vmul.f32 %v4865_v50, %v198_v63 }
 0x15a   :  { %v1273_v41 = vadd.f32 %v1272_v29, %v1190_v25  ;;  %1422 = vmatmul.f32.gmra.mxu2 %v5081_v20  ;;  %1505 = vmatmul.f32.gmra.mxu3 %v5084_v47  ;;  %v199_v47 = vunpack.c.l.bf16 %v57_v24  ;;  %v606_v24 = vld [vmem:[%s6921_s0 + $0x178] sm:$0xff] }
 0x15b   :  { %v1275_v44 = vpop.f32.mrf.mxu0  ;;  %v1358_v35 = vpop.f32.mrf.mxu1  ;;  %7261 = vst [vmem:[#allocation128_spill] sm:$0xff] %v5116_v26  ;;  %1728 = vmatpush.msrb.mxu2 %v606_v24 }
 0x15c   :  { %v5112_v29 = vadd.f32 %v1355_v54, %v1273_v41  ;;  %7262 = vst [vmem:[#allocation129_spill] sm:$0xff] %v5119_v36  ;;  %v61_v54 = vld [vmem:[%s6923_s2 + $0x138] sm:$0xff]  ;;  %v5130_v63 = vmul.f32 %v4896_v15, %v199_v47  ;;  %v704_v47 = vld [vmem:[%s6921_s0 + $0x488] sm:$0xff] }
 0x15d   :  { %v1109_v25 = vpop.f32.mrf.mxu2  ;;  %v1192_v40 = vpop.f32.mrf.mxu3  ;;  %v207_v18 = vunpack.c.h.bf16 %v61_v54  ;;  %1976 = vmatpush.msrb.mxu1 %v704_v47 }
 0x15e   :  { %v1110_v14 = vadd.f32 %v1109_v25, %v4363_v11  ;;  %3355 = vmatmul.msk.f32.gmra.mxu0 %vm823_vm0, %v5104_v62  ;;  %1671 = vmatmul.f32.gmra.mxu1 %v3986_v3  ;;  %v206_v11 = vunpack.c.l.bf16 %v61_v54  ;;  %v672_v3 = vld [vmem:[%s6921_s0 + $0x388] sm:$0xff]  ;;  %v638_v54 = vld [vmem:[%s6921_s0 + $0x278] sm:$0xff] }
 0x15f   :  { %1893 = vmatpush.msrb.mxu0 %v672_v3  ;;  %1811 = vmatpush.msrb.mxu3 %v638_v54  ;;  %v66_v3 = vld [vmem:[%s6923_s2 + $0x15c] sm:$0xff] }
 0x160   :  { %v1193_v41 = vadd.f32 %v1192_v40, %v1110_v14  ;;  %v5151_v62 = vmul.f32 %v4863_v19, %v206_v11  ;;  %v216_v11 = vunpack.c.h.bf16 %v66_v3 }
 0x162   :  { %v1276_v37 = vadd.f32 %v1275_v44, %v1193_v41  ;;  %1425 = vmatmul.f32.gmra.mxu2 %v5116_v26  ;;  %1508 = vmatmul.f32.gmra.mxu3 %v5119_v36  ;;  %v62_v44 = vld [vmem:[%s6923_s2 + $0x140] sm:$0xf]  ;;  %7263 = vst [vmem:[#allocation130_spill] sm:$0xff] %v5151_v62 }
 0x163   :  { %v1278_v25 = vpop.f32.mrf.mxu0  ;;  %v1361_v40 = vpop.f32.mrf.mxu1 }
 0x164   :  { %v5141_v14 = vadd.f32 %v1358_v35, %v1276_v37  ;;  %v5154_v35 = vmul.f32 %v4865_v50, %v207_v18  ;;  %v208_v37 = vunpack.c.l.bf16 %v62_v44 }
 0x165   :  { %v1112_v41 = vpop.f32.mrf.mxu2  ;;  %v1195_v36 = vpop.f32.mrf.mxu3 }
 0x166   :  { %v1113_v26 = vadd.f32 %v1112_v41, %v4400_v1  ;;  %7264 = vst [vmem:[#allocation131_spill] sm:$0xff] %v5154_v35  ;;  %3356 = vmatmul.msk.f32.gmra.mxu0 %vm823_vm0, %v5130_v63  ;;  %1674 = vmatmul.f32.gmra.mxu1 %v4023_v28  ;;  %v215_v1 = vunpack.c.l.bf16 %v66_v3  ;;  %v5165_v18 = vmul.f32 %v4896_v15, %v208_v37  ;;  %v67_v28 = vld [vmem:[%s6923_s2 + $0x164] sm:$0xf] }
 0x168   :  { %v1196_v24 = vadd.f32 %v1195_v36, %v1113_v26  ;;  %7265 = vst [vmem:[#allocation132_spill] sm:$0xff] %v5165_v18  ;;  %v670_v26 = vld [vmem:[%s6921_s0 + $0x378] sm:$0xff]  ;;  %v5177_v37 = vmul.f32 %v4863_v19, %v215_v1  ;;  %v71_v1 = vld [vmem:[%s6923_s2 + $0x180] sm:$0xff] }
 0x169   :  { %1894 = vmatpush.msrb.mxu0 %v670_v26  ;;  %v224_v26 = vunpack.c.l.bf16 %v71_v1 }
 0x16a   :  { %v1279_v47 = vadd.f32 %v1278_v25, %v1196_v24  ;;  %1428 = vmatmul.f32.gmra.mxu2 %v5151_v62  ;;  %1511 = vmatmul.f32.gmra.mxu3 %v5154_v35  ;;  %v5180_v24 = vmul.f32 %v4865_v50, %v216_v11 }
 0x16b   :  { %v1281_v54 = vpop.f32.mrf.mxu0  ;;  %v1364_v41 = vpop.f32.mrf.mxu1 }
 0x16c   :  { %v5170_v44 = vadd.f32 %v1361_v40, %v1279_v47  ;;  %7266 = vst [vmem:[#allocation133_spill] sm:$0xff] %v5180_v24  ;;  %v217_v40 = vunpack.c.l.bf16 %v67_v28  ;;  %v604_v47 = vld [vmem:[%s6921_s0 + $0x168] sm:$0xff] }
 0x16d   :  { %v1115_v36 = vpop.f32.mrf.mxu2  ;;  %v1198_v25 = vpop.f32.mrf.mxu3  ;;  %1729 = vmatpush.msrb.mxu2 %v604_v47 }
 0x16e   :  { %v1116_v3 = vadd.f32 %v1115_v36, %v4434_v30  ;;  %3357 = vmatmul.msk.f32.gmra.mxu0 %vm823_vm0, %v5165_v18  ;;  %1677 = vmatmul.f32.gmra.mxu1 %v4060_v59  ;;  %v702_v30 = vld [vmem:[%s6921_s0 + $0x478] sm:$0xff]  ;;  %v636_v59 = vld [vmem:[%s6921_s0 + $0x268] sm:$0xff]  ;;  %v225_v36 = vunpack.c.h.bf16 %v71_v1  ;;  %v5200_v18 = vmul.f32 %v4896_v15, %v217_v40 }
 0x16f   :  { %1977 = vmatpush.msrb.mxu1 %v702_v30  ;;  %1812 = vmatpush.msrb.mxu3 %v636_v59 }
 0x170   :  { %v1199_v11 = vadd.f32 %v1198_v25, %v1116_v3  ;;  %7267 = vst [vmem:[#allocation134_spill] sm:$0xff] %v5200_v18  ;;  %v72_v25 = vld [vmem:[%s6923_s2 + $0x188] sm:$0xf]  ;;  %v5212_v1 = vmul.f32 %v4865_v50, %v225_v36 }
 0x171   :  { %v226_v40 = vunpack.c.l.bf16 %v72_v25 }
 0x172   :  { %v1282_v28 = vadd.f32 %v1281_v54, %v1199_v11  ;;  %1431 = vmatmul.f32.gmra.mxu2 %v5177_v37  ;;  %1514 = vmatmul.f32.gmra.mxu3 %v5180_v24  ;;  %v5209_v11 = vmul.f32 %v4863_v19, %v224_v26  ;;  %7269 = vst [vmem:[#allocation136_spill] sm:$0xff] %v5212_v1 }
 0x173   :  { %v1284_v35 = vpop.f32.mrf.mxu0  ;;  %v1367_v62 = vpop.f32.mrf.mxu1  ;;  %v5229_v25 = vmul.f32 %v4896_v15, %v226_v40 }
 0x174   :  { %v5205_v3 = vadd.f32 %v1364_v41, %v1282_v28  ;;  %7268 = vst [vmem:[#allocation135_spill] sm:$0xff] %v5209_v11  ;;  %v76_v41 = vld [vmem:[%s6923_s2 + $0x1a4] sm:$0xff]  ;;  %v602_v28 = vld [vmem:[%s6921_s0 + $0x158] sm:$0xff] }
 0x175   :  { %v1118_v47 = vpop.f32.mrf.mxu2  ;;  %v1201_v30 = vpop.f32.mrf.mxu3  ;;  %1730 = vmatpush.msrb.mxu2 %v602_v28  ;;  %v234_v36 = vunpack.c.h.bf16 %v76_v41  ;;  %7270 = vst [vmem:[#allocation137_spill] sm:$0xff] %v5229_v25 }
 0x176   :  { %v1119_v54 = vadd.f32 %v1118_v47, %v4468_v57  ;;  %3358 = vmatmul.msk.f32.gmra.mxu0 %vm823_vm0, %v5200_v18  ;;  %1680 = vmatmul.f32.gmra.mxu1 %v4094_v27  ;;  %v668_v57 = vld [vmem:[%s6921_s0 + $0x368] sm:$0xff]  ;;  %v233_v27 = vunpack.c.l.bf16 %v76_v41 }
 0x177   :  { %1895 = vmatpush.msrb.mxu0 %v668_v57  ;;  %v700_v47 = vld [vmem:[%s6921_s0 + $0x468] sm:$0xff] }
 0x178   :  { %v1202_v59 = vadd.f32 %v1201_v30, %v1119_v54  ;;  %v634_v30 = vld [vmem:[%s6921_s0 + $0x258] sm:$0xff]  ;;  %1978 = vmatpush.msrb.mxu1 %v700_v47 }
 0x179   :  { %1813 = vmatpush.msrb.mxu3 %v634_v30 }
 0x17a   :  { %v1285_v26 = vadd.f32 %v1284_v35, %v1202_v59  ;;  %1434 = vmatmul.f32.gmra.mxu2 %v5209_v11  ;;  %1517 = vmatmul.f32.gmra.mxu3 %v5212_v1  ;;  %v77_v35 = vld [vmem:[%s6923_s2 + $0x1ac] sm:$0xf]  ;;  %v5244_v1 = vmul.f32 %v4863_v19, %v233_v27  ;;  %v5247_v11 = vmul.f32 %v4865_v50, %v234_v36 }
 0x17b   :  { %v1287_v54 = vpop.f32.mrf.mxu0  ;;  %v1370_v57 = vpop.f32.mrf.mxu1  ;;  %v235_v18 = vunpack.c.l.bf16 %v77_v35 }
 0x17c   :  { %v5240_v41 = vadd.f32 %v1367_v62, %v1285_v26  ;;  %7271 = vst [vmem:[#allocation138_spill] sm:$0xff] %v5244_v1  ;;  %v81_v62 = vld [vmem:[%s6923_s2 + $0x1c8] sm:$0xff] }
 0x17d   :  { %v1121_v40 = vpop.f32.mrf.mxu2  ;;  %v1204_v59 = vpop.f32.mrf.mxu3  ;;  %7272 = vst [vmem:[#allocation139_spill] sm:$0xff] %v5247_v11  ;;  %v243_v27 = vunpack.c.h.bf16 %v81_v62  ;;  %v5258_v36 = vmul.f32 %v4896_v15, %v235_v18  ;;  %v698_v18 = vld [vmem:[%s6921_s0 + $0x458] sm:$0xff] }
 0x17e   :  { %v1122_v28 = vadd.f32 %v1121_v40, %v4505_v58  ;;  %3359 = vmatmul.msk.f32.gmra.mxu0 %vm823_vm0, %v5229_v25  ;;  %1683 = vmatmul.f32.gmra.mxu1 %v4131_v6  ;;  %v242_v58 = vunpack.c.l.bf16 %v81_v62  ;;  %v666_v6 = vld [vmem:[%s6921_s0 + $0x358] sm:$0xff]  ;;  %v82_v40 = vld [vmem:[%s6923_s2 + $0x1d0] sm:$0xf] }
 0x17f   :  { %7273 = vst [vmem:[#allocation140_spill] sm:$0xff] %v5258_v36  ;;  %1896 = vmatpush.msrb.mxu0 %v666_v6  ;;  %1979 = vmatpush.msrb.mxu1 %v698_v18  ;;  %v632_v6 = vld [vmem:[%s6921_s0 + $0x248] sm:$0xff]  ;;  %v7288_v25 = vld [vmem:[#allocation12_spill] sm:$0xff] }
 0x180   :  { %v1205_v26 = vadd.f32 %v1204_v59, %v1122_v28  ;;  %v600_v59 = vld [vmem:[%s6921_s0 + $0x148] sm:$0xff]  ;;  %1814 = vmatpush.msrb.mxu3 %v632_v6 }
 0x181   :  { %1731 = vmatpush.msrb.mxu2 %v600_v59 }
 0x182   :  { %v1288_v47 = vadd.f32 %v1287_v54, %v1205_v26  ;;  %1437 = vmatmul.f32.gmra.mxu2 %v5244_v1  ;;  %1520 = vmatmul.f32.gmra.mxu3 %v5247_v11  ;;  %v5276_v11 = vmul.f32 %v4863_v19, %v242_v58 }
 0x183   :  { %v1290_v30 = vpop.f32.mrf.mxu0  ;;  %v1373_v35 = vpop.f32.mrf.mxu1 }
 0x184   :  { %v5266_v54 = vadd.f32 %v1370_v57, %v1288_v47  ;;  %7274 = vst [vmem:[#allocation141_spill] sm:$0xff] %v5276_v11  ;;  %v5279_v57 = vmul.f32 %v4865_v50, %v243_v27  ;;  %v244_v47 = vunpack.c.l.bf16 %v82_v40 }
 0x185   :  { %v1124_v28 = vpop.f32.mrf.mxu2  ;;  %v1207_v62 = vpop.f32.mrf.mxu3 }
 0x186   :  { %v1125_v26 = vadd.f32 %v1124_v28, %v4539_v17  ;;  %7275 = vst [vmem:[#allocation142_spill] sm:$0xff] %v5279_v57  ;;  %3360 = vmatmul.msk.f32.gmra.mxu0 %vm823_vm0, %v5258_v36  ;;  %1686 = vmatmul.f32.gmra.mxu1 %v3675_v42  ;;  %v86_v17 = vld [vmem:[%s6923_s2 + $0x1ec] sm:$0xff]  ;;  %v5293_v42 = vmul.f32 %v4896_v15, %v244_v47  ;;  %v87_v36 = vld [vmem:[%s6923_s2 + $0x1f4] sm:$0xf] }
 0x187   :  { %v251_v27 = vunpack.c.l.bf16 %v86_v17  ;;  %v252_v18 = vunpack.c.h.bf16 %v86_v17  ;;  %v253_v47 = vunpack.c.l.bf16 %v87_v36  ;;  %v630_v36 = vld [vmem:[%s6921_s0 + $0x238] sm:$0xff] }
 0x188   :  { %v1208_v58 = vadd.f32 %v1207_v62, %v1125_v26  ;;  %7276 = vst [vmem:[#allocation143_spill] sm:$0xff] %v5293_v42  ;;  %1815 = vmatpush.msrb.mxu3 %v630_v36 }
 0x189   :  { %v5302_v26 = vmul.f32 %v4863_v19, %v251_v27  ;;  %v5305_v17 = vmul.f32 %v4865_v50, %v252_v18 }
 0x18a   :  { %v1291_v59 = vadd.f32 %v1290_v30, %v1208_v58  ;;  %1440 = vmatmul.f32.gmra.mxu2 %v5276_v11  ;;  %1523 = vmatmul.f32.gmra.mxu3 %v5279_v57  ;;  %v91_v58 = vld [vmem:[%s6923_s2 + $0x210] sm:$0xff] }
 0x18b   :  { %v1293_v40 = vpop.f32.mrf.mxu0  ;;  %v1376_v28 = vpop.f32.mrf.mxu1  ;;  %7277 = vst [vmem:[#allocation144_spill] sm:$0xff] %v5302_v26  ;;  %v260_v18 = vunpack.c.l.bf16 %v91_v58 }
 0x18c   :  { %v5298_v1 = vadd.f32 %v1373_v35, %v1291_v59  ;;  %7278 = vst [vmem:[#allocation145_spill] sm:$0xff] %v5305_v17  ;;  %v664_v35 = vld [vmem:[%s6921_s0 + $0x348] sm:$0xff] }
 0x18d   :  { %v1127_v6 = vpop.f32.mrf.mxu2  ;;  %v1210_v62 = vpop.f32.mrf.mxu3  ;;  %1897 = vmatpush.msrb.mxu0 %v664_v35  ;;  %v5328_v35 = vmul.f32 %v4896_v15, %v253_v47  ;;  %v7283_v47 = vld [vmem:[#allocation9_spill] sm:$0xff] }
 0x18e   :  { %v1128_v30 = vadd.f32 %v1127_v6, %v4570_v10  ;;  %3361 = vmatmul.msk.f32.gmra.mxu0 %vm823_vm0, %v5293_v42  ;;  %1689 = vmatmul.f32.gmra.mxu1 %v3719_v60  ;;  %v598_v10 = vld [vmem:[%s6921_s0 + $0x138] sm:$0xff]  ;;  %v696_v60 = vld [vmem:[%s6921_s0 + $0x448] sm:$0xff]  ;;  %v261_v6 = vunpack.c.h.bf16 %v91_v58 }
 0x18f   :  { %1732 = vmatpush.msrb.mxu2 %v598_v10  ;;  %1980 = vmatpush.msrb.mxu1 %v696_v60  ;;  %7279 = vst [vmem:[#allocation146_spill] sm:$0xff] %v5328_v35  ;;  %v92_v10 = vld [vmem:[%s6923_s2 + $0x218] sm:$0xf] }
 0x190   :  { %v1211_v59 = vadd.f32 %v1210_v62, %v1128_v30  ;;  %v5340_v58 = vmul.f32 %v4865_v50, %v261_v6 }
 0x192   :  { %v1294_v27 = vadd.f32 %v1293_v40, %v1211_v59  ;;  %1443 = vmatmul.f32.gmra.mxu2 %v5302_v26  ;;  %1526 = vmatmul.f32.gmra.mxu3 %v5305_v17  ;;  %v7280_v40 = vld [vmem:[#allocation93_spill] sm:$0xff]  ;;  %v5337_v26 = vmul.f32 %v4863_v19, %v260_v18  ;;  %7282 = vst [vmem:[#allocation147_spill] sm:$0xff] %v5340_v58  ;;  %v262_v17 = vunpack.c.l.bf16 %v92_v10  ;;  %v596_v10 = vld [vmem:[%s6921_s0 + $0x128] sm:$0xff] }
 0x193   :  { %v1296_v62 = vpop.f32.mrf.mxu0  ;;  %v1379_v30 = vpop.f32.mrf.mxu1  ;;  %1733 = vmatpush.msrb.mxu2 %v596_v10 }
 0x194   :  { %v5333_v42 = vadd.f32 %v1376_v28, %v1294_v27  ;;  %7281 = vst [vmem:[#allocation93_spill] sm:$0xff] %v5337_v26  ;;  %v96_v28 = vld [vmem:[%s6923_s2 + $0x234] sm:$0xff] }
 0x195   :  { %v1130_v60 = vpop.f32.mrf.mxu2  ;;  %v1213_v36 = vpop.f32.mrf.mxu3  ;;  %v269_v6 = vunpack.c.l.bf16 %v96_v28 }
 0x196   :  { %v1131_v59 = vadd.f32 %v1130_v60, %v7280_v40  ;;  %3362 = vmatmul.msk.f32.gmra.mxu0 %vm823_vm0, %v5328_v35  ;;  %1692 = vmatmul.f32.gmra.mxu1 %v7283_v47  ;;  %v662_v60 = vld [vmem:[%s6921_s0 + $0x338] sm:$0xff]  ;;  %v270_v40 = vunpack.c.h.bf16 %v96_v28  ;;  %v5354_v47 = vmul.f32 %v4896_v15, %v262_v17 }
 0x197   :  { %1898 = vmatpush.msrb.mxu0 %v662_v60  ;;  %v97_v28 = vld [vmem:[%s6923_s2 + $0x23c] sm:$0xf]  ;;  %v5372_v57 = vmul.f32 %v4863_v19, %v269_v6 }
 0x198   :  { %v1214_v27 = vadd.f32 %v1213_v36, %v1131_v59  ;;  %7284 = vst [vmem:[#allocation9_spill] sm:$0xff] %v5354_v47  ;;  %v694_v36 = vld [vmem:[%s6921_s0 + $0x438] sm:$0xff]  ;;  %v5375_v11 = vmul.f32 %v4865_v50, %v270_v40  ;;  %v271_v10 = vunpack.c.l.bf16 %v97_v28 }
 0x199   :  { %1981 = vmatpush.msrb.mxu1 %v694_v36 }
 0x19a   :  { %v1297_v18 = vadd.f32 %v1296_v62, %v1214_v27  ;;  %1446 = vmatmul.f32.gmra.mxu2 %v5337_v26  ;;  %1529 = vmatmul.f32.gmra.mxu3 %v5340_v58  ;;  %v628_v62 = vld [vmem:[%s6921_s0 + $0x228] sm:$0xff]  ;;  %7287 = vst [vmem:[#allocation148_spill] sm:$0xff] %v5375_v11  ;;  %v5386_v40 = vmul.f32 %v4896_v15, %v271_v10 }
 0x19b   :  { %v1299_v59 = vpop.f32.mrf.mxu0  ;;  %v1382_v27 = vpop.f32.mrf.mxu1  ;;  %1816 = vmatpush.msrb.mxu3 %v628_v62  ;;  %v7285_v26 = vld [vmem:[#allocation98_spill] sm:$0xff]  ;;  %v594_v62 = vld [vmem:[%s6921_s0 + $0x118] sm:$0xff] }
 0x19c   :  { %v5368_v17 = vadd.f32 %v1379_v30, %v1297_v18  ;;  %7286 = vst [vmem:[#allocation98_spill] sm:$0xff] %v5372_v57  ;;  %v101_v30 = vld [vmem:[%s6923_s2 + $0x258] sm:$0xff]  ;;  %1734 = vmatpush.msrb.mxu2 %v594_v62 }
 0x19d   :  { %v1133_v60 = vpop.f32.mrf.mxu2  ;;  %v1216_v58 = vpop.f32.mrf.mxu3  ;;  %v279_v6 = vunpack.c.h.bf16 %v101_v30  ;;  %7289 = vst [vmem:[#allocation12_spill] sm:$0xff] %v5386_v40 }
 0x19e   :  { %v1134_v35 = vadd.f32 %v1133_v60, %v7285_v26  ;;  %3363 = vmatmul.msk.f32.gmra.mxu0 %vm823_vm0, %v5354_v47  ;;  %1695 = vmatmul.f32.gmra.mxu1 %v7288_v25  ;;  %v278_v26 = vunpack.c.l.bf16 %v101_v30  ;;  %v660_v25 = vld [vmem:[%s6921_s0 + $0x328] sm:$0xff]  ;;  %v7290_v30 = vld [vmem:[#allocation103_spill] sm:$0xff] }
 0x19f   :  { %1899 = vmatpush.msrb.mxu0 %v660_v25  ;;  %v7292_v47 = vld [vmem:[#allocation15_spill] sm:$0xff] }
 0x1a0   :  { %v1217_v18 = vadd.f32 %v1216_v58, %v1134_v35  ;;  %v102_v58 = vld [vmem:[%s6923_s2 + $0x260] sm:$0xf] }
 0x1a1   :  { %v280_v24 = vunpack.c.l.bf16 %v102_v58 }
 0x1a2   :  { %v1300_v36 = vadd.f32 %v1299_v59, %v1217_v18  ;;  %1449 = vmatmul.f32.gmra.mxu2 %v5372_v57  ;;  %1532 = vmatmul.f32.gmra.mxu3 %v5375_v11  ;;  %v5401_v11 = vmul.f32 %v4863_v19, %v278_v26  ;;  %v5404_v57 = vmul.f32 %v4865_v50, %v279_v6  ;;  %v106_v26 = vld [vmem:[%s6923_s2 + $0x27c] sm:$0xff] }
 0x1a3   :  { %v1302_v28 = vpop.f32.mrf.mxu0  ;;  %v1385_v35 = vpop.f32.mrf.mxu1  ;;  %v288_v62 = vunpack.c.h.bf16 %v106_v26  ;;  %v5421_v58 = vmul.f32 %v4896_v15, %v280_v24  ;;  %v7296_v24 = vld [vmem:[#allocation18_spill] sm:$0xff] }
 0x1a4   :  { %v5397_v59 = vadd.f32 %v1382_v27, %v1300_v36  ;;  %7291 = vst [vmem:[#allocation103_spill] sm:$0xff] %v5404_v57  ;;  %v692_v27 = vld [vmem:[%s6921_s0 + $0x428] sm:$0xff]  ;;  %v626_v36 = vld [vmem:[%s6921_s0 + $0x218] sm:$0xff] }
 0x1a5   :  { %v1136_v60 = vpop.f32.mrf.mxu2  ;;  %v1219_v10 = vpop.f32.mrf.mxu3  ;;  %1982 = vmatpush.msrb.mxu1 %v692_v27  ;;  %1817 = vmatpush.msrb.mxu3 %v626_v36  ;;  %7293 = vst [vmem:[#allocation15_spill] sm:$0xff] %v5421_v58 }
 0x1a6   :  { %v1137_v18 = vadd.f32 %v1136_v60, %v7290_v30  ;;  %3364 = vmatmul.msk.f32.gmra.mxu0 %vm823_vm0, %v5386_v40  ;;  %1698 = vmatmul.f32.gmra.mxu1 %v7292_v47  ;;  %v287_v47 = vunpack.c.l.bf16 %v106_v26  ;;  %v107_v40 = vld [vmem:[%s6923_s2 + $0x284] sm:$0xf]  ;;  %v5435_v26 = vmul.f32 %v4865_v50, %v288_v62  ;;  %v690_v62 = vld [vmem:[%s6921_s0 + $0x418] sm:$0xff] }
 0x1a7   :  { %1983 = vmatpush.msrb.mxu1 %v690_v62 }
 0x1a8   :  { %v1220_v6 = vadd.f32 %v1219_v10, %v1137_v18  ;;  %v5432_v36 = vmul.f32 %v4863_v19, %v287_v47  ;;  %7295 = vst [vmem:[#allocation150_spill] sm:$0xff] %v5435_v26  ;;  %v592_v47 = vld [vmem:[%s6921_s0 + $0x108] sm:$0xff] }
 0x1a9   :  { %1735 = vmatpush.msrb.mxu2 %v592_v47 }
 0x1aa   :  { %v1303_v25 = vadd.f32 %v1302_v28, %v1220_v6  ;;  %1452 = vmatmul.f32.gmra.mxu2 %v5401_v11  ;;  %1535 = vmatmul.f32.gmra.mxu3 %v5404_v57  ;;  %7294 = vst [vmem:[#allocation149_spill] sm:$0xff] %v5432_v36  ;;  %v289_v6 = vunpack.c.l.bf16 %v107_v40 }
 0x1ab   :  { %v1571_v60 = vpop.f32.mrf.mxu0  ;;  %v5423_v30 = vpop.f32.mrf.mxu1 }
 0x1ac   :  { %v5428_v27 = vadd.f32 %v1385_v35, %v1303_v25  ;;  %v658_v35 = vld [vmem:[%s6921_s0 + $0x318] sm:$0xff] }
 0x1ad   :  { %v1405_v10 = vpop.f32.mrf.mxu2  ;;  %v1488_v28 = vpop.f32.mrf.mxu3  ;;  %1900 = vmatpush.msrb.mxu0 %v658_v35 }
 0x1ae   :  { %v1406_v18 = vadd.f32 %v1405_v10, %v4740_v32  ;;  %3365 = vmatmul.msk.f32.gmra.mxu0 %vm823_vm0, %v5421_v58  ;;  %1701 = vmatmul.f32.gmra.mxu1 %v7296_v24  ;;  %v111_v32 = vld [vmem:[%s6923_s2 + $0x2a0] sm:$0xff] }
 0x1af   :  { %v296_v10 = vunpack.c.l.bf16 %v111_v32  ;;  %v297_v24 = vunpack.c.h.bf16 %v111_v32 }
 0x1b0   :  { %v1489_v25 = vadd.f32 %v1488_v28, %v1406_v18  ;;  %v5457_v28 = vmul.f32 %v4896_v15, %v289_v6  ;;  %v624_v18 = vld [vmem:[%s6921_s0 + $0x208] sm:$0xff] }
 0x1b1   :  { %1818 = vmatpush.msrb.mxu3 %v624_v18  ;;  %v5469_v32 = vmul.f32 %v4863_v19, %v296_v10  ;;  %v5472_v6 = vmul.f32 %v4865_v50, %v297_v24  ;;  %v116_v18 = vld [vmem:[%s6923_s2 + $0x2c4] sm:$0xff] }
 0x1b2   :  { %v5452_v40 = vadd.f32 %v1571_v60, %v1489_v25  ;;  %1455 = vmatmul.f32.gmra.mxu2 %v5432_v36  ;;  %1538 = vmatmul.f32.gmra.mxu3 %v5435_v26  ;;  %7298 = vst [vmem:[#allocation151_spill] sm:$0xff] %v5457_v28  ;;  %v112_v60 = vld [vmem:[%s6923_s2 + $0x2a8] sm:$0xf]  ;;  %v306_v10 = vunpack.c.h.bf16 %v116_v18 }
 0x1b3   :  { %v1574_v35 = vpop.f32.mrf.mxu0  ;;  %v5462_v58 = vpop.f32.mrf.mxu1  ;;  %7299 = vst [vmem:[#allocation152_spill] sm:$0xff] %v5469_v32  ;;  %v298_v26 = vunpack.c.l.bf16 %v112_v60  ;;  %v750_v60 = vld [vmem:[%s6921_s0 + $0x5f8] sm:$0xff] }
 0x1b4   :  { %7297 = vst [vmem:[#allocation18_spill] sm:$0xff] %v5452_v40  ;;  %v7301_v40 = vld [vmem:[#allocation21_spill] sm:$0xff]  ;;  %2052 = vmatpush.msra.mxu2 %v750_v60 }
 0x1b5   :  { %v1408_v25 = vpop.f32.mrf.mxu2  ;;  %v1491_v47 = vpop.f32.mrf.mxu3  ;;  %7300 = vst [vmem:[#allocation153_spill] sm:$0xff] %v5472_v6  ;;  %v5485_v24 = vmul.f32 %v4896_v15, %v298_v26  ;;  %v117_v26 = vld [vmem:[%s6923_s2 + $0x2cc] sm:$0xf] }
 0x1b6   :  { %v1409_v62 = vadd.f32 %v1408_v25, %v4769_v16  ;;  %3366 = vmatmul.msk.f32.gmra.mxu0 %vm823_vm0, %v5457_v28  ;;  %1704 = vmatmul.f32.gmra.mxu1 %v7301_v40  ;;  %v305_v16 = vunpack.c.l.bf16 %v116_v18  ;;  %v656_v40 = vld [vmem:[%s6921_s0 + $0x308] sm:$0xff]  ;;  %v307_v60 = vunpack.c.l.bf16 %v117_v26  ;;  %v814_v26 = vld [vmem:[%s6921_s0 + $0x7f8] sm:$0xff] }
 0x1b7   :  { %7303 = vst [vmem:[#allocation154_spill] sm:$0xff] %v5485_v24  ;;  %1901 = vmatpush.msrb.mxu0 %v656_v40  ;;  %v7306_v40 = vld [vmem:[#allocation24_spill] sm:$0xff] }
 0x1b8   :  { %v1492_v36 = vadd.f32 %v1491_v47, %v1409_v62  ;;  %v782_v47 = vld [vmem:[%s6921_s0 + $0x6f8] sm:$0xff] }
 0x1b9   :  { %2135 = vmatpush.msra.mxu3 %v782_v47  ;;  %2218 = vmatpush.msra.mxu0 %v814_v26  ;;  %v748_v26 = vld [vmem:[%s6921_s0 + $0x5e8] sm:$0xff] }
 0x1ba   :  { %v5480_v57 = vadd.f32 %v1574_v35, %v1492_v36  ;;  %1458 = vmatmul.f32.gmra.mxu2 %v5469_v32  ;;  %1541 = vmatmul.f32.gmra.mxu3 %v5472_v6  ;;  %v688_v36 = vld [vmem:[%s6921_s0 + $0x408] sm:$0xff]  ;;  %v5506_v6 = vmul.f32 %v4863_v19, %v305_v16  ;;  %v5509_v32 = vmul.f32 %v4865_v50, %v306_v10 }
 0x1bb   :  { %v1577_v35 = vpop.f32.mrf.mxu0  ;;  %v5496_v25 = vpop.f32.mrf.mxu1  ;;  %1984 = vmatpush.msrb.mxu1 %v688_v36  ;;  %v121_v36 = vld [vmem:[%s6923_s2 + $0x2e8] sm:$0xff]  ;;  %v5522_v10 = vmul.f32 %v4896_v15, %v307_v60  ;;  %2053 = vmatpush.msra.mxu2 %v748_v26 }
 0x1bc   :  { %7302 = vst [vmem:[#allocation21_spill] sm:$0xff] %v5480_v57  ;;  %v315_v16 = vunpack.c.h.bf16 %v121_v36 }
 0x1bd   :  { %v1411_v62 = vpop.f32.mrf.mxu2  ;;  %v1494_v18 = vpop.f32.mrf.mxu3  ;;  %7304 = vst [vmem:[#allocation155_spill] sm:$0xff] %v5506_v6 }
 0x1be   :  { %v1412_v57 = vadd.f32 %v1411_v62, %v4801_v49  ;;  %7305 = vst [vmem:[#allocation156_spill] sm:$0xff] %v5509_v32  ;;  %3367 = vmatmul.msk.f32.gmra.mxu0 %vm823_vm0, %v5485_v24  ;;  %1707 = vmatmul.f32.gmra.mxu1 %v7306_v40  ;;  %v314_v49 = vunpack.c.l.bf16 %v121_v36  ;;  %v5537_v60 = vmul.f32 %v4865_v50, %v315_v16 }
 0x1bf   :  { %7308 = vst [vmem:[#allocation157_spill] sm:$0xff] %v5522_v10 }
 0x1c0   :  { %v1495_v47 = vadd.f32 %v1494_v18, %v1412_v57  ;;  %v122_v57 = vld [vmem:[%s6923_s2 + $0x2f0] sm:$0xf]  ;;  %v5534_v36 = vmul.f32 %v4863_v19, %v314_v49  ;;  %7309 = vst [vmem:[#allocation158_spill] sm:$0xff] %v5537_v60 }
 0x1c1   :  { %v126_v49 = vld [vmem:[%s6923_s2 + $0x30c] sm:$0xff] }
 0x1c2   :  { %v5517_v28 = vadd.f32 %v1577_v35, %v1495_v47  ;;  %1461 = vmatmul.f32.gmra.mxu2 %v5506_v6  ;;  %1544 = vmatmul.f32.gmra.mxu3 %v5509_v32  ;;  %v316_v32 = vunpack.c.l.bf16 %v122_v57 }
 0x1c3   :  { %v1580_v62 = vpop.f32.mrf.mxu0  ;;  %v5527_v40 = vpop.f32.mrf.mxu1 }
 0x1c4   :  { %7307 = vst [vmem:[#allocation24_spill] sm:$0xff] %v5517_v28  ;;  %v7310_v28 = vld [vmem:[#allocation27_spill] sm:$0xff]  ;;  %v5559_v6 = vmul.f32 %v4896_v15, %v316_v32  ;;  %v7313_v32 = vld [vmem:[#allocation30_spill] sm:$0xff] }
 0x1c5   :  { %v1414_v35 = vpop.f32.mrf.mxu2  ;;  %v1497_v18 = vpop.f32.mrf.mxu3 }
 0x1c6   :  { %v1415_v47 = vadd.f32 %v1414_v35, %v4842_v8  ;;  %3368 = vmatmul.msk.f32.gmra.mxu0 %vm823_vm0, %v5522_v10  ;;  %1710 = vmatmul.f32.gmra.mxu1 %v7310_v28  ;;  %v822_v8 = vld [vmem:[%s6921_s0 + $0x838] sm:$0xff]  ;;  %v780_v28 = vld [vmem:[%s6921_s0 + $0x6e8] sm:$0xff]  ;;  %v323_v35 = vunpack.c.l.bf16 %v126_v49  ;;  %v324_v10 = vunpack.c.h.bf16 %v126_v49 }
 0x1c7   :  { %2313 = vmatpush.msra.mxu1 %v822_v8  ;;  %2136 = vmatpush.msra.mxu3 %v780_v28 }
 0x1c8   :  { %v1498_v16 = vadd.f32 %v1497_v18, %v1415_v47  ;;  %v127_v18 = vld [vmem:[%s6923_s2 + $0x314] sm:$0xf]  ;;  %v5571_v28 = vmul.f32 %v4865_v50, %v324_v10  ;;  %v778_v10 = vld [vmem:[%s6921_s0 + $0x6d8] sm:$0xff] }
 0x1c9   :  { %v325_v49 = vunpack.c.l.bf16 %v127_v18  ;;  %2137 = vmatpush.msra.mxu3 %v778_v10 }
 0x1ca   :  { %v5554_v57 = vadd.f32 %v1580_v62, %v1498_v16  ;;  %1464 = vmatmul.f32.gmra.mxu2 %v5534_v36  ;;  %1547 = vmatmul.f32.gmra.mxu3 %v5537_v60  ;;  %v5568_v16 = vmul.f32 %v4863_v19, %v323_v35  ;;  %7312 = vst [vmem:[#allocation159_spill] sm:$0xff] %v5571_v28  ;;  %v812_v60 = vld [vmem:[%s6921_s0 + $0x7e8] sm:$0xff] }
 0x1cb   :  { %v1583_v24 = vpop.f32.mrf.mxu0  ;;  %v5561_v26 = vpop.f32.mrf.mxu1  ;;  %2219 = vmatpush.msra.mxu0 %v812_v60  ;;  %v5587_v50 = vmul.f32 %v4896_v15, %v325_v49  ;;  %v810_v49 = vld [vmem:[%s6921_s0 + $0x7d8] sm:$0xff] }
 0x1cc   :  { %7311 = vst [vmem:[#allocation27_spill] sm:$0xff] %v5554_v57 }
 0x1cd   :  { %v1417_v47 = vpop.f32.mrf.mxu2  ;;  %v1500_v8 = vpop.f32.mrf.mxu3  ;;  %7315 = vst [vmem:[#allocation160_spill] sm:$0xff] %v5587_v50  ;;  %2220 = vmatpush.msra.mxu0 %v810_v49  ;;  %v7324_v49 = vld [vmem:[#allocation40_spill] sm:$0xff] }
 0x1ce   :  { %v1418_v62 = vadd.f32 %v1417_v47, %v4886_v39  ;;  %3369 = vmatmul.msk.f32.gmra.mxu0 %vm823_vm0, %v5559_v6  ;;  %1713 = vmatmul.f32.gmra.mxu1 %v7313_v32  ;;  %v746_v39 = vld [vmem:[%s6921_s0 + $0x5d8] sm:$0xff] }
 0x1cf   :  { %2054 = vmatpush.msra.mxu2 %v746_v39  ;;  %v7319_v32 = vld [vmem:[#allocation36_spill] sm:$0xff] }
 0x1d0   :  { %v1501_v57 = vadd.f32 %v1500_v8, %v1418_v62  ;;  %v7318_v62 = vld [vmem:[#allocation6_spill] sm:$0xff] }
 0x1d2   :  { %v5582_v19 = vadd.f32 %v1583_v24, %v1501_v57  ;;  %1467 = vmatmul.f32.gmra.mxu2 %v5568_v16  ;;  %1550 = vmatmul.f32.gmra.mxu3 %v5571_v28  ;;  %v7316_v57 = vld [vmem:[#allocation33_spill] sm:$0xff]  ;;  %v7410_v28 = vld [vmem:[#allocation114_spill] sm:$0xff] }
 0x1d3   :  { %v1586_v35 = vpop.f32.mrf.mxu0  ;;  %v5592_v18 = vpop.f32.mrf.mxu1 }
 0x1d4   :  { %7314 = vst [vmem:[#allocation30_spill] sm:$0xff] %v5582_v19 }
 0x1d5   :  { %v1420_v47 = vpop.f32.mrf.mxu2  ;;  %v1503_v60 = vpop.f32.mrf.mxu3 }
 0x1d6   :  { %v1421_v24 = vadd.f32 %v1420_v47, %v4914_v45  ;;  %3370 = vmatmul.msk.f32.gmra.mxu0 %vm823_vm0, %v5587_v50  ;;  %1716 = vmatmul.f32.gmra.mxu1 %v7316_v57  ;;  %v744_v45 = vld [vmem:[%s6921_s0 + $0x5c8] sm:$0xff] }
 0x1d7   :  { %2055 = vmatpush.msra.mxu2 %v744_v45  ;;  %v7321_v57 = vld [vmem:[#allocation38_spill] sm:$0xff] }
 0x1d8   :  { %v1504_v8 = vadd.f32 %v1503_v60, %v1421_v24  ;;  %v7320_v24 = vld [vmem:[#allocation37_spill] sm:$0xff]  ;;  %v7326_v50 = vld [vmem:[#allocation42_spill] sm:$0xff] }
 0x1da   :  { %v5598_v15 = vadd.f32 %v1586_v35, %v1504_v8  ;;  %1736 = vmatmul.f32.vlgmr.msrb.gmra.mxu2 %v7318_v62  ;;  %1819 = vmatmul.f32.vlgmr.msrb.gmra.mxu3 %v7319_v32  ;;  %v776_v8 = vld [vmem:[%s6921_s0 + $0x6c8] sm:$0xff] }
 0x1db   :  { %v1589_v39 = vpop.f32.mrf.mxu0  ;;  %v5608_v10 = vpop.f32.mrf.mxu1  ;;  %2138 = vmatpush.msra.mxu3 %v776_v8  ;;  %v7328_v8 = vld [vmem:[#allocation11_spill] sm:$0xff] }
 0x1dc   :  { %7317 = vst [vmem:[#allocation33_spill] sm:$0xff] %v5598_v15  ;;  %v7323_v15 = vld [vmem:[#allocation8_spill] sm:$0xff] }
 0x1dd   :  { %v1423_v47 = vpop.f32.mrf.mxu2  ;;  %v1506_v35 = vpop.f32.mrf.mxu3 }
 0x1de   :  { %v1424_v60 = vadd.f32 %v1423_v47, %v4947_v23  ;;  %1902 = vmatmul.f32.vlgmr.msrb.gmra.mxu0 %v7320_v24  ;;  %1985 = vmatmul.f32.vlgmr.msrb.gmra.mxu1 %v7321_v57  ;;  %v7325_v57 = vld [vmem:[#allocation41_spill] sm:$0xff] }
 0x1e0   :  { %v1507_v62 = vadd.f32 %v1506_v35, %v1424_v60  ;;  %v774_v60 = vld [vmem:[%s6921_s0 + $0x6b8] sm:$0xff] }
 0x1e1   :  { %2139 = vmatpush.msra.mxu3 %v774_v60  ;;  %v7333_v60 = vld [vmem:[#allocation14_spill] sm:$0xff] }
 0x1e2   :  { %v5616_v32 = vadd.f32 %v1589_v39, %v1507_v62  ;;  %1739 = vmatmul.f32.gmra.mxu2 %v7323_v15  ;;  %1822 = vmatmul.f32.gmra.mxu3 %v7324_v49  ;;  %v808_v39 = vld [vmem:[%s6921_s0 + $0x7c8] sm:$0xff]  ;;  %v742_v15 = vld [vmem:[%s6921_s0 + $0x5b8] sm:$0xff] }
 0x1e3   :  { %v1592_v45 = vpop.f32.mrf.mxu0  ;;  %v5620_v19 = vpop.f32.mrf.mxu1  ;;  %2221 = vmatpush.msra.mxu0 %v808_v39  ;;  %2056 = vmatpush.msra.mxu2 %v742_v15  ;;  %v7330_v15 = vld [vmem:[#allocation45_spill] sm:$0xff] }
 0x1e4   :  { %7322 = vst [vmem:[#allocation6_spill] sm:$0xff] %v5616_v32  ;;  %v7346_v32 = vld [vmem:[#allocation58_spill] sm:$0xff] }
 0x1e5   :  { %v1426_v23 = vpop.f32.mrf.mxu2  ;;  %v1509_v47 = vpop.f32.mrf.mxu3 }
 0x1e6   :  { %v1427_v24 = vadd.f32 %v1426_v23, %v4983_v9  ;;  %1905 = vmatmul.f32.gmra.mxu0 %v7325_v57  ;;  %1988 = vmatmul.f32.gmra.mxu1 %v7326_v50  ;;  %v7329_v50 = vld [vmem:[#allocation44_spill] sm:$0xff] }
 0x1e8   :  { %v1510_v35 = vadd.f32 %v1509_v47, %v1427_v24  ;;  %v7331_v47 = vld [vmem:[#allocation46_spill] sm:$0xff] }
 0x1ea   :  { %v5634_v9 = vadd.f32 %v1592_v45, %v1510_v35  ;;  %1742 = vmatmul.f32.gmra.mxu2 %v7328_v8  ;;  %1825 = vmatmul.f32.gmra.mxu3 %v7329_v50  ;;  %v806_v45 = vld [vmem:[%s6921_s0 + $0x7b8] sm:$0xff]  ;;  %v820_v50 = vld [vmem:[%s6921_s0 + $0x828] sm:$0xff] }
 0x1eb   :  { %v1595_v62 = vpop.f32.mrf.mxu0  ;;  %v5638_v49 = vpop.f32.mrf.mxu1  ;;  %2222 = vmatpush.msra.mxu0 %v806_v45  ;;  %v7334_v8 = vld [vmem:[#allocation48_spill] sm:$0xff]  ;;  %2314 = vmatpush.msra.mxu1 %v820_v50  ;;  %v7336_v45 = vld [vmem:[#allocation50_spill] sm:$0xff] }
 0x1ec   :  { %7327 = vst [vmem:[#allocation36_spill] sm:$0xff] %v5634_v9  ;;  %v7339_v9 = vld [vmem:[#allocation52_spill] sm:$0xff] }
 0x1ed   :  { %v1429_v23 = vpop.f32.mrf.mxu2  ;;  %v1512_v57 = vpop.f32.mrf.mxu3  ;;  %v738_v50 = vld [vmem:[%s6921_s0 + $0x598] sm:$0xff] }
 0x1ee   :  { %v1430_v39 = vadd.f32 %v1429_v23, %v5016_v13  ;;  %1908 = vmatmul.f32.gmra.mxu0 %v7330_v15  ;;  %1991 = vmatmul.f32.gmra.mxu1 %v7331_v47  ;;  %v740_v13 = vld [vmem:[%s6921_s0 + $0x5a8] sm:$0xff] }
 0x1ef   :  { %v772_v23 = vld [vmem:[%s6921_s0 + $0x6a8] sm:$0xff]  ;;  %2057 = vmatpush.msra.mxu2 %v740_v13 }
 0x1f0   :  { %v1513_v24 = vadd.f32 %v1512_v57, %v1430_v39  ;;  %2140 = vmatpush.msra.mxu3 %v772_v23  ;;  %v804_v13 = vld [vmem:[%s6921_s0 + $0x7a8] sm:$0xff] }
 0x1f1   :  { %2223 = vmatpush.msra.mxu0 %v804_v13  ;;  %2058 = vmatpush.msra.mxu2 %v738_v50  ;;  %v7344_v13 = vld [vmem:[#allocation56_spill] sm:$0xff] }
 0x1f2   :  { %v5646_v35 = vadd.f32 %v1595_v62, %v1513_v24  ;;  %1745 = vmatmul.f32.gmra.mxu2 %v7333_v60  ;;  %1828 = vmatmul.f32.gmra.mxu3 %v7334_v8  ;;  %v7335_v24 = vld [vmem:[#allocation49_spill] sm:$0xff] }
 0x1f3   :  { %v1598_v57 = vpop.f32.mrf.mxu0  ;;  %v5659_v39 = vpop.f32.mrf.mxu1 }
 0x1f4   :  { %7332 = vst [vmem:[#allocation37_spill] sm:$0xff] %v5646_v35  ;;  %v7338_v35 = vld [vmem:[#allocation17_spill] sm:$0xff] }
 0x1f5   :  { %v1432_v62 = vpop.f32.mrf.mxu2  ;;  %v1515_v15 = vpop.f32.mrf.mxu3 }
 0x1f6   :  { %v1433_v47 = vadd.f32 %v1432_v62, %v5043_v48  ;;  %1911 = vmatmul.f32.gmra.mxu0 %v7335_v24  ;;  %1994 = vmatmul.f32.gmra.mxu1 %v7336_v45 }
 0x1f8   :  { %v1516_v60 = vadd.f32 %v1515_v15, %v1433_v47  ;;  %v770_v47 = vld [vmem:[%s6921_s0 + $0x698] sm:$0xff] }
 0x1f9   :  { %2141 = vmatpush.msra.mxu3 %v770_v47 }
 0x1fa   :  { %v5664_v8 = vadd.f32 %v1598_v57, %v1516_v60  ;;  %1748 = vmatmul.f32.gmra.mxu2 %v7338_v35  ;;  %1831 = vmatmul.f32.gmra.mxu3 %v7339_v9  ;;  %v7340_v35 = vld [vmem:[#allocation53_spill] sm:$0xff]  ;;  %v7341_v9 = vld [vmem:[#allocation54_spill] sm:$0xff]  ;;  %v7343_v60 = vld [vmem:[#allocation20_spill] sm:$0xff] }
 0x1fb   :  { %v1601_v48 = vpop.f32.mrf.mxu0  ;;  %v5674_v23 = vpop.f32.mrf.mxu1 }
 0x1fc   :  { %7337 = vst [vmem:[#allocation38_spill] sm:$0xff] %v5664_v8 }
 0x1fd   :  { %v1435_v62 = vpop.f32.mrf.mxu2  ;;  %v1518_v57 = vpop.f32.mrf.mxu3 }
 0x1fe   :  { %v1436_v15 = vadd.f32 %v1435_v62, %v5077_v7  ;;  %1914 = vmatmul.f32.gmra.mxu0 %v7340_v35  ;;  %1997 = vmatmul.f32.gmra.mxu1 %v7341_v9  ;;  %v7345_v9 = vld [vmem:[#allocation57_spill] sm:$0xff] }
 0x200   :  { %v1519_v24 = vadd.f32 %v1518_v57, %v1436_v15  ;;  %v736_v15 = vld [vmem:[%s6921_s0 + $0x588] sm:$0xff] }
 0x201   :  { %2059 = vmatpush.msra.mxu2 %v736_v15  ;;  %v7353_v15 = vld [vmem:[#allocation26_spill] sm:$0xff] }
 0x202   :  { %v5682_v45 = vadd.f32 %v1601_v48, %v1519_v24  ;;  %1751 = vmatmul.f32.gmra.mxu2 %v7343_v60  ;;  %1834 = vmatmul.f32.gmra.mxu3 %v7344_v13  ;;  %v802_v48 = vld [vmem:[%s6921_s0 + $0x798] sm:$0xff]  ;;  %v7348_v24 = vld [vmem:[#allocation23_spill] sm:$0xff] }
 0x203   :  { %v1604_v50 = vpop.f32.mrf.mxu0  ;;  %v5686_v8 = vpop.f32.mrf.mxu1  ;;  %2224 = vmatpush.msra.mxu0 %v802_v48 }
 0x204   :  { %7342 = vst [vmem:[#allocation8_spill] sm:$0xff] %v5682_v45  ;;  %v7381_v45 = vld [vmem:[#allocation86_spill] sm:$0xff] }
 0x205   :  { %v1438_v7 = vpop.f32.mrf.mxu2  ;;  %v1521_v62 = vpop.f32.mrf.mxu3 }
 0x206   :  { %v1439_v35 = vadd.f32 %v1438_v7, %v5112_v29  ;;  %1917 = vmatmul.f32.gmra.mxu0 %v7345_v9  ;;  %2000 = vmatmul.f32.gmra.mxu1 %v7346_v32  ;;  %v7349_v29 = vld [vmem:[#allocation60_spill] sm:$0xff]  ;;  %v768_v32 = vld [vmem:[%s6921_s0 + $0x688] sm:$0xff]  ;;  %v7350_v9 = vld [vmem:[#allocation61_spill] sm:$0xff] }
 0x207   :  { %2142 = vmatpush.msra.mxu3 %v768_v32  ;;  %v734_v32 = vld [vmem:[%s6921_s0 + $0x578] sm:$0xff] }
 0x208   :  { %v1522_v57 = vadd.f32 %v1521_v62, %v1439_v35  ;;  %2060 = vmatpush.msra.mxu2 %v734_v32 }
 0x20a   :  { %v5697_v47 = vadd.f32 %v1604_v50, %v1522_v57  ;;  %1754 = vmatmul.f32.gmra.mxu2 %v7348_v24  ;;  %1837 = vmatmul.f32.gmra.mxu3 %v7349_v29  ;;  %v7351_v50 = vld [vmem:[#allocation62_spill] sm:$0xff]  ;;  %v7354_v24 = vld [vmem:[#allocation64_spill] sm:$0xff] }
 0x20b   :  { %v1607_v60 = vpop.f32.mrf.mxu0  ;;  %v5704_v13 = vpop.f32.mrf.mxu1  ;;  %v800_v29 = vld [vmem:[%s6921_s0 + $0x788] sm:$0xff] }
 0x20c   :  { %7347 = vst [vmem:[#allocation40_spill] sm:$0xff] %v5697_v47  ;;  %2225 = vmatpush.msra.mxu0 %v800_v29  ;;  %v7359_v47 = vld [vmem:[#allocation68_spill] sm:$0xff] }
 0x20d   :  { %v1441_v7 = vpop.f32.mrf.mxu2  ;;  %v1524_v62 = vpop.f32.mrf.mxu3  ;;  %v798_v29 = vld [vmem:[%s6921_s0 + $0x778] sm:$0xff] }
 0x20e   :  { %v1442_v35 = vadd.f32 %v1441_v7, %v5141_v14  ;;  %1920 = vmatmul.f32.gmra.mxu0 %v7350_v9  ;;  %2003 = vmatmul.f32.gmra.mxu1 %v7351_v50  ;;  %v766_v14 = vld [vmem:[%s6921_s0 + $0x678] sm:$0xff]  ;;  %v7355_v50 = vld [vmem:[#allocation65_spill] sm:$0xff] }
 0x20f   :  { %2143 = vmatpush.msra.mxu3 %v766_v14  ;;  %2226 = vmatpush.msra.mxu0 %v798_v29  ;;  %v7364_v29 = vld [vmem:[#allocation72_spill] sm:$0xff] }
 0x210   :  { %v1525_v48 = vadd.f32 %v1524_v62, %v1442_v35 }
 0x212   :  { %v5709_v57 = vadd.f32 %v1607_v60, %v1525_v48  ;;  %1757 = vmatmul.f32.gmra.mxu2 %v7353_v15  ;;  %1840 = vmatmul.f32.gmra.mxu3 %v7354_v24  ;;  %v7356_v48 = vld [vmem:[#allocation66_spill] sm:$0xff] }
 0x213   :  { %v1610_v7 = vpop.f32.mrf.mxu0  ;;  %v5722_v62 = vpop.f32.mrf.mxu1 }
 0x214   :  { %7352 = vst [vmem:[#allocation41_spill] sm:$0xff] %v5709_v57  ;;  %v7358_v57 = vld [vmem:[#allocation29_spill] sm:$0xff] }
 0x215   :  { %v1444_v60 = vpop.f32.mrf.mxu2  ;;  %v1527_v35 = vpop.f32.mrf.mxu3 }
 0x216   :  { %v1445_v9 = vadd.f32 %v1444_v60, %v5170_v44  ;;  %1923 = vmatmul.f32.gmra.mxu0 %v7355_v50  ;;  %2006 = vmatmul.f32.gmra.mxu1 %v7356_v48  ;;  %v7360_v48 = vld [vmem:[#allocation69_spill] sm:$0xff] }
 0x218   :  { %v1528_v15 = vadd.f32 %v1527_v35, %v1445_v9  ;;  %v764_v9 = vld [vmem:[%s6921_s0 + $0x668] sm:$0xff] }
 0x219   :  { %2144 = vmatpush.msra.mxu3 %v764_v9 }
 0x21a   :  { %v5727_v24 = vadd.f32 %v1610_v7, %v1528_v15  ;;  %1760 = vmatmul.f32.gmra.mxu2 %v7358_v57  ;;  %1843 = vmatmul.f32.gmra.mxu3 %v7359_v47  ;;  %v7361_v7 = vld [vmem:[#allocation70_spill] sm:$0xff]  ;;  %v818_v57 = vld [vmem:[%s6921_s0 + $0x818] sm:$0xff] }
 0x21b   :  { %v1613_v32 = vpop.f32.mrf.mxu0  ;;  %v5734_v14 = vpop.f32.mrf.mxu1  ;;  %v732_v47 = vld [vmem:[%s6921_s0 + $0x568] sm:$0xff]  ;;  %2315 = vmatpush.msra.mxu1 %v818_v57  ;;  %v7363_v15 = vld [vmem:[#allocation32_spill] sm:$0xff]  ;;  %v7365_v57 = vld [vmem:[#allocation73_spill] sm:$0xff] }
 0x21c   :  { %7357 = vst [vmem:[#allocation42_spill] sm:$0xff] %v5727_v24  ;;  %2061 = vmatpush.msra.mxu2 %v732_v47 }
 0x21d   :  { %v1447_v44 = vpop.f32.mrf.mxu2  ;;  %v1530_v60 = vpop.f32.mrf.mxu3 }
 0x21e   :  { %v1448_v50 = vadd.f32 %v1447_v44, %v5205_v3  ;;  %1926 = vmatmul.f32.gmra.mxu0 %v7360_v48  ;;  %2009 = vmatmul.f32.gmra.mxu1 %v7361_v7 }
 0x220   :  { %v1531_v35 = vadd.f32 %v1530_v60, %v1448_v50  ;;  %v7366_v60 = vld [vmem:[#allocation74_spill] sm:$0xff] }
 0x222   :  { %v5748_v3 = vadd.f32 %v1613_v32, %v1531_v35  ;;  %1763 = vmatmul.f32.gmra.mxu2 %v7363_v15  ;;  %1846 = vmatmul.f32.gmra.mxu3 %v7364_v29  ;;  %v796_v32 = vld [vmem:[%s6921_s0 + $0x768] sm:$0xff]  ;;  %v730_v35 = vld [vmem:[%s6921_s0 + $0x558] sm:$0xff]  ;;  %v7368_v15 = vld [vmem:[#allocation35_spill] sm:$0xff] }
 0x223   :  { %v1616_v44 = vpop.f32.mrf.mxu0  ;;  %v5752_v48 = vpop.f32.mrf.mxu1  ;;  %2227 = vmatpush.msra.mxu0 %v796_v32  ;;  %2062 = vmatpush.msra.mxu2 %v730_v35  ;;  %v7370_v32 = vld [vmem:[#allocation77_spill] sm:$0xff] }
 0x224   :  { %7362 = vst [vmem:[#allocation11_spill] sm:$0xff] %v5748_v3 }
 0x225   :  { %v1450_v7 = vpop.f32.mrf.mxu2  ;;  %v1533_v24 = vpop.f32.mrf.mxu3 }
 0x226   :  { %v1451_v47 = vadd.f32 %v1450_v7, %v5240_v41  ;;  %1929 = vmatmul.f32.gmra.mxu0 %v7365_v57  ;;  %2012 = vmatmul.f32.gmra.mxu1 %v7366_v60  ;;  %v7369_v41 = vld [vmem:[#allocation76_spill] sm:$0xff] }
 0x228   :  { %v1534_v50 = vadd.f32 %v1533_v24, %v1451_v47  ;;  %v762_v24 = vld [vmem:[%s6921_s0 + $0x658] sm:$0xff] }
 0x229   :  { %2145 = vmatpush.msra.mxu3 %v762_v24  ;;  %v728_v24 = vld [vmem:[%s6921_s0 + $0x548] sm:$0xff] }
 0x22a   :  { %v5763_v9 = vadd.f32 %v1616_v44, %v1534_v50  ;;  %1766 = vmatmul.f32.gmra.mxu2 %v7368_v15  ;;  %1849 = vmatmul.f32.gmra.mxu3 %v7369_v41  ;;  %v7371_v44 = vld [vmem:[#allocation78_spill] sm:$0xff]  ;;  %v7373_v15 = vld [vmem:[#allocation5_spill] sm:$0xff]  ;;  %v7374_v41 = vld [vmem:[#allocation80_spill] sm:$0xff] }
 0x22b   :  { %v1619_v29 = vpop.f32.mrf.mxu0  ;;  %v5770_v7 = vpop.f32.mrf.mxu1  ;;  %2063 = vmatpush.msra.mxu2 %v728_v24 }
 0x22c   :  { %7367 = vst [vmem:[#allocation44_spill] sm:$0xff] %v5763_v9  ;;  %v794_v9 = vld [vmem:[%s6921_s0 + $0x758] sm:$0xff] }
 0x22d   :  { %v1453_v47 = vpop.f32.mrf.mxu2  ;;  %v1536_v57 = vpop.f32.mrf.mxu3  ;;  %2228 = vmatpush.msra.mxu0 %v794_v9  ;;  %v7379_v9 = vld [vmem:[#allocation84_spill] sm:$0xff] }
 0x22e   :  { %v1454_v60 = vadd.f32 %v1453_v47, %v5266_v54  ;;  %1932 = vmatmul.f32.gmra.mxu0 %v7370_v32  ;;  %2015 = vmatmul.f32.gmra.mxu1 %v7371_v44  ;;  %v7375_v32 = vld [vmem:[#allocation81_spill] sm:$0xff]  ;;  %v7376_v44 = vld [vmem:[#allocation82_spill] sm:$0xff] }
 0x230   :  { %v1537_v50 = vadd.f32 %v1536_v57, %v1454_v60 }
 0x232   :  { %v5775_v35 = vadd.f32 %v1619_v29, %v1537_v50  ;;  %1769 = vmatmul.f32.gmra.mxu2 %v7373_v15  ;;  %1852 = vmatmul.f32.gmra.mxu3 %v7374_v41  ;;  %v760_v50 = vld [vmem:[%s6921_s0 + $0x648] sm:$0xff] }
 0x233   :  { %v1622_v54 = vpop.f32.mrf.mxu0  ;;  %v5785_v47 = vpop.f32.mrf.mxu1  ;;  %2146 = vmatpush.msra.mxu3 %v760_v50  ;;  %v7383_v50 = vld [vmem:[#allocation10_spill] sm:$0xff] }
 0x234   :  { %7372 = vst [vmem:[#allocation45_spill] sm:$0xff] %v5775_v35  ;;  %v7378_v35 = vld [vmem:[#allocation7_spill] sm:$0xff] }
 0x235   :  { %v1456_v57 = vpop.f32.mrf.mxu2  ;;  %v1539_v29 = vpop.f32.mrf.mxu3 }
 0x236   :  { %v1457_v60 = vadd.f32 %v1456_v57, %v5298_v1  ;;  %1935 = vmatmul.f32.gmra.mxu0 %v7375_v32  ;;  %2018 = vmatmul.f32.gmra.mxu1 %v7376_v44  ;;  %v7380_v44 = vld [vmem:[#allocation85_spill] sm:$0xff] }
 0x238   :  { %v1540_v15 = vadd.f32 %v1539_v29, %v1457_v60  ;;  %v758_v60 = vld [vmem:[%s6921_s0 + $0x638] sm:$0xff] }
 0x239   :  { %2147 = vmatpush.msra.mxu3 %v758_v60  ;;  %v7388_v60 = vld [vmem:[#allocation13_spill] sm:$0xff] }
 0x23a   :  { %v5793_v41 = vadd.f32 %v1622_v54, %v1540_v15  ;;  %1772 = vmatmul.f32.gmra.mxu2 %v7378_v35  ;;  %1855 = vmatmul.f32.gmra.mxu3 %v7379_v9  ;;  %v792_v54 = vld [vmem:[%s6921_s0 + $0x748] sm:$0xff]  ;;  %v726_v35 = vld [vmem:[%s6921_s0 + $0x538] sm:$0xff] }
 0x23b   :  { %v1625_v24 = vpop.f32.mrf.mxu0  ;;  %v5797_v3 = vpop.f32.mrf.mxu1  ;;  %2229 = vmatpush.msra.mxu0 %v792_v54  ;;  %2064 = vmatpush.msra.mxu2 %v726_v35  ;;  %v7385_v35 = vld [vmem:[#allocation89_spill] sm:$0xff] }
 0x23c   :  { %7377 = vst [vmem:[#allocation46_spill] sm:$0xff] %v5793_v41 }
 0x23d   :  { %v1459_v1 = vpop.f32.mrf.mxu2  ;;  %v1542_v57 = vpop.f32.mrf.mxu3 }
 0x23e   :  { %v1460_v32 = vadd.f32 %v1459_v1, %v5333_v42  ;;  %1938 = vmatmul.f32.gmra.mxu0 %v7380_v44  ;;  %2021 = vmatmul.f32.gmra.mxu1 %v7381_v45  ;;  %v7384_v45 = vld [vmem:[#allocation88_spill] sm:$0xff] }
 0x240   :  { %v1543_v29 = vadd.f32 %v1542_v57, %v1460_v32  ;;  %v7386_v57 = vld [vmem:[#allocation90_spill] sm:$0xff] }
 0x242   :  { %v5811_v42 = vadd.f32 %v1625_v24, %v1543_v29  ;;  %1775 = vmatmul.f32.gmra.mxu2 %v7383_v50  ;;  %1858 = vmatmul.f32.gmra.mxu3 %v7384_v45  ;;  %v790_v24 = vld [vmem:[%s6921_s0 + $0x738] sm:$0xff]  ;;  %v816_v45 = vld [vmem:[%s6921_s0 + $0x808] sm:$0xff] }
 0x243   :  { %v1628_v15 = vpop.f32.mrf.mxu0  ;;  %v5815_v9 = vpop.f32.mrf.mxu1  ;;  %2230 = vmatpush.msra.mxu0 %v790_v24  ;;  %v7389_v50 = vld [vmem:[#allocation92_spill] sm:$0xff]  ;;  %2316 = vmatpush.msra.mxu1 %v816_v45  ;;  %v7391_v24 = vld [vmem:[#allocation95_spill] sm:$0xff] }
 0x244   :  { %7382 = vst [vmem:[#allocation14_spill] sm:$0xff] %v5811_v42 }
 0x245   :  { %v1462_v1 = vpop.f32.mrf.mxu2  ;;  %v1545_v44 = vpop.f32.mrf.mxu3 }
 0x246   :  { %v1463_v54 = vadd.f32 %v1462_v1, %v5368_v17  ;;  %1941 = vmatmul.f32.gmra.mxu0 %v7385_v35  ;;  %2024 = vmatmul.f32.gmra.mxu1 %v7386_v57  ;;  %v724_v17 = vld [vmem:[%s6921_s0 + $0x528] sm:$0xff] }
 0x247   :  { %2065 = vmatpush.msra.mxu2 %v724_v17  ;;  %v7394_v17 = vld [vmem:[#allocation97_spill] sm:$0xff] }
 0x248   :  { %v1546_v32 = vadd.f32 %v1545_v44, %v1463_v54 }
 0x24a   :  { %v5823_v29 = vadd.f32 %v1628_v15, %v1546_v32  ;;  %1778 = vmatmul.f32.gmra.mxu2 %v7388_v60  ;;  %1861 = vmatmul.f32.gmra.mxu3 %v7389_v50  ;;  %v756_v15 = vld [vmem:[%s6921_s0 + $0x628] sm:$0xff] }
 0x24b   :  { %v1631_v1 = vpop.f32.mrf.mxu0  ;;  %v5833_v44 = vpop.f32.mrf.mxu1  ;;  %2148 = vmatpush.msra.mxu3 %v756_v15  ;;  %v7390_v32 = vld [vmem:[#allocation94_spill] sm:$0xff] }
 0x24c   :  { %7387 = vst [vmem:[#allocation48_spill] sm:$0xff] %v5823_v29  ;;  %v7393_v29 = vld [vmem:[#allocation16_spill] sm:$0xff]  ;;  %v788_v15 = vld [vmem:[%s6921_s0 + $0x728] sm:$0xff] }
 0x24d   :  { %v1465_v54 = vpop.f32.mrf.mxu2  ;;  %v1548_v35 = vpop.f32.mrf.mxu3  ;;  %2231 = vmatpush.msra.mxu0 %v788_v15 }
 0x24e   :  { %v1466_v57 = vadd.f32 %v1465_v54, %v5397_v59  ;;  %1944 = vmatmul.f32.gmra.mxu0 %v7390_v32  ;;  %2027 = vmatmul.f32.gmra.mxu1 %v7391_v24  ;;  %v722_v59 = vld [vmem:[%s6921_s0 + $0x518] sm:$0xff] }
 0x24f   :  { %2066 = vmatpush.msra.mxu2 %v722_v59 }
 0x250   :  { %v1549_v60 = vadd.f32 %v1548_v35, %v1466_v57  ;;  %v7396_v35 = vld [vmem:[#allocation100_spill] sm:$0xff] }
 0x251   :  { %v754_v57 = vld [vmem:[%s6921_s0 + $0x618] sm:$0xff] }
 0x252   :  { %v5841_v50 = vadd.f32 %v1631_v1, %v1549_v60  ;;  %1781 = vmatmul.f32.gmra.mxu2 %v7393_v29  ;;  %1864 = vmatmul.f32.gmra.mxu3 %v7394_v17  ;;  %v7395_v29 = vld [vmem:[#allocation99_spill] sm:$0xff] }
 0x253   :  { %v1634_v45 = vpop.f32.mrf.mxu0  ;;  %v5845_v42 = vpop.f32.mrf.mxu1  ;;  %2149 = vmatpush.msra.mxu3 %v754_v57  ;;  %v7398_v17 = vld [vmem:[#allocation19_spill] sm:$0xff]  ;;  %v7402_v57 = vld [vmem:[#allocation22_spill] sm:$0xff] }
 0x254   :  { %7392 = vst [vmem:[#allocation49_spill] sm:$0xff] %v5841_v50  ;;  %v7399_v50 = vld [vmem:[#allocation102_spill] sm:$0xff] }
 0x255   :  { %v1468_v54 = vpop.f32.mrf.mxu2  ;;  %v1551_v32 = vpop.f32.mrf.mxu3 }
 0x256   :  { %v1469_v1 = vadd.f32 %v1468_v54, %v5428_v27  ;;  %1947 = vmatmul.f32.gmra.mxu0 %v7395_v29  ;;  %2030 = vmatmul.f32.gmra.mxu1 %v7396_v35  ;;  %v7400_v29 = vld [vmem:[#allocation104_spill] sm:$0xff]  ;;  %v7401_v35 = vld [vmem:[#allocation105_spill] sm:$0xff] }
 0x258   :  { %v1552_v24 = vadd.f32 %v1551_v32, %v1469_v1  ;;  %v786_v32 = vld [vmem:[%s6921_s0 + $0x718] sm:$0xff] }
 0x259   :  { %2232 = vmatpush.msra.mxu0 %v786_v32  ;;  %v7404_v32 = vld [vmem:[#allocation108_spill] sm:$0xff] }
 0x25a   :  { %v5859_v60 = vadd.f32 %v1634_v45, %v1552_v24  ;;  %1784 = vmatmul.f32.gmra.mxu2 %v7398_v17  ;;  %1867 = vmatmul.f32.gmra.mxu3 %v7399_v50  ;;  %v720_v50 = vld [vmem:[%s6921_s0 + $0x508] sm:$0xff]  ;;  %v7403_v24 = vld [vmem:[#allocation107_spill] sm:$0xff] }
 0x25b   :  { %v1903_v15 = vpop.f32.mrf.mxu0  ;;  %v1986_v59 = vpop.f32.mrf.mxu1  ;;  %2067 = vmatpush.msra.mxu2 %v720_v50 }
 0x25c   :  { %7397 = vst [vmem:[#allocation50_spill] sm:$0xff] %v5859_v60 }
 0x25d   :  { %v1737_v41 = vpop.f32.mrf.mxu2  ;;  %v1820_v27 = vpop.f32.mrf.mxu3 }
 0x25e   :  { %v1738_v54 = vadd.f32 %v1737_v41, %v5423_v30  ;;  %1950 = vmatmul.f32.gmra.mxu0 %v7400_v29  ;;  %2033 = vmatmul.f32.gmra.mxu1 %v7401_v35  ;;  %v752_v30 = vld [vmem:[%s6921_s0 + $0x608] sm:$0xff] }
 0x25f   :  { %2150 = vmatpush.msra.mxu3 %v752_v30  ;;  %v784_v30 = vld [vmem:[%s6921_s0 + $0x708] sm:$0xff]  ;;  %s3532_s0 = smov 16  }
 0x260   :  { %v1821_v45 = vadd.f32 %v1820_v27, %v1738_v54  ;;  %2233 = vmatpush.msra.mxu0 %v784_v30 }
 0x262   :  { %v1904_v1 = vadd.f32 %v1903_v15, %v1821_v45  ;;  %1787 = vmatmul.f32.gmra.mxu2 %v7402_v57  ;;  %1870 = vmatmul.f32.gmra.mxu3 %v7403_v24  ;;  %v7405_v15 = vld [vmem:[#allocation109_spill] sm:$0xff]  ;;  %v7407_v24 = vld [vmem:[#allocation111_spill] sm:$0xff] }
 0x263   :  { %v1906_v41 = vpop.f32.mrf.mxu0  ;;  %v1989_v17 = vpop.f32.mrf.mxu1  ;;  %v7406_v57 = vld [vmem:[#allocation25_spill] sm:$0xff] }
 0x264   :  { %v5877_v29 = vadd.f32 %v1986_v59, %v1904_v1 }
 0x265   :  { %v1740_v27 = vpop.f32.mrf.mxu2  ;;  %v1823_v54 = vpop.f32.mrf.mxu3 }
 0x266   :  { %v1741_v35 = vadd.f32 %v1740_v27, %v5462_v58  ;;  %1953 = vmatmul.f32.gmra.mxu0 %v7404_v32  ;;  %2036 = vmatmul.f32.gmra.mxu1 %v7405_v15  ;;  %v7408_v15 = vld [vmem:[#allocation112_spill] sm:$0xff] }
 0x268   :  { %v1824_v45 = vadd.f32 %v1823_v54, %v1741_v35  ;;  %v7409_v35 = vld [vmem:[#allocation28_spill] sm:$0xff] }
 0x26a   :  { %v1907_v50 = vadd.f32 %v1906_v41, %v1824_v45  ;;  %1790 = vmatmul.f32.gmra.mxu2 %v7406_v57  ;;  %1873 = vmatmul.f32.gmra.mxu3 %v7407_v24 }
 0x26b   :  { %v1909_v59 = vpop.f32.mrf.mxu0  ;;  %v1992_v1 = vpop.f32.mrf.mxu1 }
 0x26c   :  { %v5887_v60 = vadd.f32 %v1989_v17, %v1907_v50 }
 0x26d   :  { %v1743_v58 = vpop.f32.mrf.mxu2  ;;  %v1826_v27 = vpop.f32.mrf.mxu3 }
 0x26e   :  { %v1744_v32 = vadd.f32 %v1743_v58, %v5496_v25  ;;  %1956 = vmatmul.f32.gmra.mxu0 %v7408_v15  ;;  %2039 = vmatmul.f32.gmra.mxu1 %v4756_v56  ;;  %v7411_v25 = vld [vmem:[#allocation115_spill] sm:$0xff] }
 0x270   :  { %v1827_v41 = vadd.f32 %v1826_v27, %v1744_v32  ;;  %v7412_v27 = vld [vmem:[#allocation31_spill] sm:$0xff] }
 0x272   :  { %v1910_v54 = vadd.f32 %v1909_v59, %v1827_v41  ;;  %1793 = vmatmul.f32.gmra.mxu2 %v7409_v35  ;;  %1876 = vmatmul.f32.gmra.mxu3 %v4778_v46  ;;  %v7413_v59 = vld [vmem:[#allocation117_spill] sm:$0xff]  ;;  %v7414_v35 = vld [vmem:[#allocation118_spill] sm:$0xff] }
 0x273   :  { %v1912_v45 = vpop.f32.mrf.mxu0  ;;  %v1995_v57 = vpop.f32.mrf.mxu1 }
 0x274   :  { %v5894_v24 = vadd.f32 %v1992_v1, %v1910_v54 }
 0x275   :  { %v1746_v17 = vpop.f32.mrf.mxu2  ;;  %v1829_v50 = vpop.f32.mrf.mxu3 }
 0x276   :  { %v1747_v30 = vadd.f32 %v1746_v17, %v5527_v40  ;;  %1959 = vmatmul.f32.gmra.mxu0 %v7410_v28  ;;  %2042 = vmatmul.f32.gmra.mxu1 %v7411_v25  ;;  %v2694_v40 = vld [vmem:[%s6924_s3 + $0x8] sm:$0xff]  ;;  %v7107_v28 = vmov 1  }
 0x277   :  { %3431 = vset.pattern.permute.xlu0 %v7107_v28  ;;  %3430 = vset.pattern.permute.xlu1 %v7107_v28  ;;  %v7415_v17 = vld [vmem:[#allocation34_spill] sm:$0xff] }
 0x278   :  { %v1830_v58 = vadd.f32 %v1829_v50, %v1747_v30  ;;  %3140 = vperm.xlu0 %3431, %v2694_v40   ;;  %3432 = vset.pattern.permute.xlu2 %v7107_v28 }
 0x27a   :  { %v1913_v56 = vadd.f32 %v1912_v45, %v1830_v58  ;;  %1796 = vmatmul.f32.gmra.mxu2 %v7412_v27  ;;  %1879 = vmatmul.f32.gmra.mxu3 %v7413_v59 }
 0x27b   :  { %v1915_v32 = vpop.f32.mrf.mxu0  ;;  %v1998_v46 = vpop.f32.mrf.mxu1 }
 0x27c   :  { %v5901_v15 = vadd.f32 %v1995_v57, %v1913_v56  ;;  %v2699_v56 = vld [vmem:[%s6924_s3 + $0x30] sm:$0xff] }
 0x27d   :  { %v1749_v1 = vpop.f32.mrf.mxu2  ;;  %v1832_v41 = vpop.f32.mrf.mxu3 }
 0x27e   :  { %v1750_v54 = vadd.f32 %v1749_v1, %v5561_v26  ;;  %1962 = vmatmul.f32.gmra.mxu0 %v7414_v35  ;;  %2045 = vmatmul.f32.gmra.mxu1 %v4829_v61 }
 0x280   :  { %v1833_v45 = vadd.f32 %v1832_v41, %v1750_v54  ;;  %3165 = vperm.xlu0 %3431, %v2699_v56   ;;  %v2702_v54 = vld [vmem:[%s6924_s3 + $0x48] sm:$0xff] }
 0x282   :  { %v1916_v57 = vadd.f32 %v1915_v32, %v1833_v45  ;;  %1799 = vmatmul.f32.gmra.mxu2 %v7415_v17  ;;  %1882 = vmatmul.f32.gmra.mxu3 %v4845_v51  ;;  %v2693_v51 = vld [vmem:[%s6924_s3] sm:$0xff]  ;;  %v7416_v32 = vld [vmem:[#allocation39_spill] sm:$0xff] }
 0x283   :  { %v1918_v26 = vpop.f32.mrf.mxu0  ;;  %v2001_v61 = vpop.f32.mrf.mxu1  ;;  %3135 = vperm.xlu1 %3430, %v2693_v51   ;;  %v7417_v45 = vld [vmem:[#allocation43_spill] sm:$0xff] }
 0x284   :  { %v5914_v50 = vadd.f32 %v1998_v46, %v1916_v57 }
 0x285   :  { %v1752_v30 = vpop.f32.mrf.mxu2  ;;  %v1835_v25 = vpop.f32.mrf.mxu3 }
 0x286   :  { %v1753_v58 = vadd.f32 %v1752_v30, %v5592_v18  ;;  %1965 = vmatmul.f32.gmra.mxu0 %v4848_v34  ;;  %2048 = vmatmul.f32.gmra.mxu1 %v4870_v4 }
 0x288   :  { %v1836_v27 = vadd.f32 %v1835_v25, %v1753_v58  ;;  %3180 = vperm.xlu0 %3431, %v2702_v54   ;;  %v7418_v58 = vld [vmem:[#allocation47_spill] sm:$0xff] }
 0x28a   :  { %v1919_v59 = vadd.f32 %v1918_v26, %v1836_v27  ;;  %2068 = vmatmul.f32.vlgmr.msra.gmra.mxu2 %v7416_v32  ;;  %2151 = vmatmul.f32.vlgmr.msra.gmra.mxu3 %v4889_v2  ;;  %v2696_v2 = vld [vmem:[%s6924_s3 + $0x18] sm:$0xff]  ;;  %v7420_v32 = vld [vmem:[#allocation122_spill] sm:$0xff] }
 0x28b   :  { %v1921_v18 = vpop.f32.mrf.mxu0  ;;  %v2004_v46 = vpop.f32.mrf.mxu1  ;;  %3150 = vperm.xlu1 %3430, %v2696_v2  }
 0x28c   :  { %v5927_v34 = vadd.f32 %v2001_v61, %v1919_v59  ;;  %v2705_v61 = vld [vmem:[%s6924_s3 + $0x60] sm:$0xff] }
 0x28d   :  { %v1755_v4 = vpop.f32.mrf.mxu2  ;;  %v1838_v1 = vpop.f32.mrf.mxu3  ;;  %v7419_v59 = vld [vmem:[#allocation121_spill] sm:$0xff] }
 0x28e   :  { %v1756_v41 = vadd.f32 %v1755_v4, %v5608_v10  ;;  %2234 = vmatmul.f32.vlgmr.msra.gmra.mxu0 %v4893_v5  ;;  %3371 = vmatmul.msk.f32.vlgmr.msra.gmra.mxu1 %vm823_vm0, %v4904_v55 }
 0x290   :  { %v1839_v35 = vadd.f32 %v1838_v1, %v1756_v41  ;;  %3195 = vperm.xlu0 %3431, %v2705_v61   ;;  %v7421_v1 = vld [vmem:[#allocation51_spill] sm:$0xff] }
 0x291   :  { %v7422_v41 = vld [vmem:[#allocation123_spill] sm:$0xff] }
 0x292   :  { %v1922_v40 = vadd.f32 %v1921_v18, %v1839_v35  ;;  %2071 = vmatmul.f32.gmra.mxu2 %v7417_v45  ;;  %2154 = vmatmul.f32.gmra.mxu3 %v4923_v43  ;;  %v2698_v43 = vld [vmem:[%s6924_s3 + $0x28] sm:$0xff]  ;;  %v2708_v18 = vld [vmem:[%s6924_s3 + $0x78] sm:$0xff]  ;;  %v7424_v61 = vld [vmem:[#allocation55_spill] sm:$0xff] }
 0x293   :  { %v1924_v10 = vpop.f32.mrf.mxu0  ;;  %v2007_v5 = vpop.f32.mrf.mxu1  ;;  %3160 = vperm.xlu1 %3430, %v2698_v43  }
 0x294   :  { %v5941_v57 = vadd.f32 %v2004_v46, %v1922_v40 }
 0x295   :  { %v1758_v55 = vpop.f32.mrf.mxu2  ;;  %v1841_v17 = vpop.f32.mrf.mxu3 }
 0x296   :  { %v1759_v26 = vadd.f32 %v1758_v55, %v5620_v19  ;;  %2237 = vmatmul.f32.gmra.mxu0 %v4926_v0  ;;  %3372 = vmatmul.msk.f32.gmra.mxu1 %vm823_vm0, %v4940_v53 }
 0x298   :  { %v1842_v30 = vadd.f32 %v1841_v17, %v1759_v26  ;;  %3210 = vperm.xlu0 %3431, %v2708_v18   ;;  %v2704_v17 = vld [vmem:[%s6924_s3 + $0x58] sm:$0xff] }
 0x29a   :  { %v1925_v25 = vadd.f32 %v1924_v10, %v1842_v30  ;;  %2074 = vmatmul.f32.gmra.mxu2 %v7418_v58  ;;  %2157 = vmatmul.f32.gmra.mxu3 %v4950_v21  ;;  %v2701_v21 = vld [vmem:[%s6924_s3 + $0x40] sm:$0xff]  ;;  %v7423_v10 = vld [vmem:[#allocation124_spill] sm:$0xff] }
 0x29b   :  { %v1927_v19 = vpop.f32.mrf.mxu0  ;;  %v2010_v0 = vpop.f32.mrf.mxu1  ;;  %3175 = vperm.xlu1 %3430, %v2701_v21   ;;  %v2710_v21 = vld [vmem:[%s6924_s3 + $0x88] sm:$0xff] }
 0x29c   :  { %v5955_v56 = vadd.f32 %v2007_v5, %v1925_v25  ;;  %v2711_v5 = vld [vmem:[%s6924_s3 + $0x90] sm:$0xff] }
 0x29d   :  { %v1761_v53 = vpop.f32.mrf.mxu2  ;;  %v1844_v27 = vpop.f32.mrf.mxu3 }
 0x29e   :  { %v1762_v51 = vadd.f32 %v1761_v53, %v5638_v49  ;;  %2240 = vmatmul.f32.gmra.mxu0 %v7419_v59  ;;  %3373 = vmatmul.msk.f32.gmra.mxu1 %vm823_vm0, %v7420_v32  ;;  %v2707_v53 = vld [vmem:[%s6924_s3 + $0x70] sm:$0xff] }
 0x2a0   :  { %v1845_v46 = vadd.f32 %v1844_v27, %v1762_v51  ;;  %3225 = vperm.xlu0 %3431, %v2711_v5   ;;  %v7426_v27 = vld [vmem:[#allocation59_spill] sm:$0xff]  ;;  %v7431_v5 = vld [vmem:[#allocation128_spill] sm:$0xff] }
 0x2a2   :  { %v1928_v4 = vadd.f32 %v1927_v19, %v1845_v46  ;;  %2077 = vmatmul.f32.gmra.mxu2 %v7421_v1  ;;  %2160 = vmatmul.f32.gmra.mxu3 %v7422_v41  ;;  %v7425_v19 = vld [vmem:[#allocation125_spill] sm:$0xff] }
 0x2a3   :  { %v1930_v49 = vpop.f32.mrf.mxu0  ;;  %v2013_v54 = vpop.f32.mrf.mxu1  ;;  %3190 = vperm.xlu1 %3430, %v2704_v17  }
 0x2a4   :  { %v5969_v35 = vadd.f32 %v2010_v0, %v1928_v4  ;;  %v7427_v4 = vld [vmem:[#allocation63_spill] sm:$0xff] }
 0x2a5   :  { %v1764_v2 = vpop.f32.mrf.mxu2  ;;  %v1847_v40 = vpop.f32.mrf.mxu3 }
 0x2a6   :  { %v1765_v45 = vadd.f32 %v1764_v2, %v5659_v39  ;;  %2243 = vmatmul.f32.gmra.mxu0 %v7423_v10  ;;  %3374 = vmatmul.msk.f32.gmra.mxu1 %vm823_vm0, %v5003_v33  ;;  %v7429_v2 = vld [vmem:[#allocation127_spill] sm:$0xff] }
 0x2a7   :  { %v7430_v10 = vld [vmem:[#allocation67_spill] sm:$0xff] }
 0x2a8   :  { %v1848_v55 = vadd.f32 %v1847_v40, %v1765_v45 }
 0x2aa   :  { %v1931_v26 = vadd.f32 %v1930_v49, %v1848_v55  ;;  %2080 = vmatmul.f32.gmra.mxu2 %v7424_v61  ;;  %2163 = vmatmul.f32.gmra.mxu3 %v5022_v52 }
 0x2ab   :  { %v1933_v39 = vpop.f32.mrf.mxu0  ;;  %v2016_v30 = vpop.f32.mrf.mxu1  ;;  %3205 = vperm.xlu1 %3430, %v2707_v53  }
 0x2ac   :  { %v5983_v43 = vadd.f32 %v2013_v54, %v1931_v26 }
 0x2ad   :  { %v1767_v33 = vpop.f32.mrf.mxu2  ;;  %v1850_v25 = vpop.f32.mrf.mxu3 }
 0x2ae   :  { %v1768_v58 = vadd.f32 %v1767_v33, %v5674_v23  ;;  %2246 = vmatmul.f32.gmra.mxu0 %v5025_v22  ;;  %3375 = vmatmul.msk.f32.gmra.mxu1 %vm823_vm0, %v7425_v19  ;;  %v7434_v19 = vld [vmem:[#allocation130_spill] sm:$0xff] }
 0x2b0   :  { %v1851_v0 = vadd.f32 %v1850_v25, %v1768_v58  ;;  %v7433_v58 = vld [vmem:[#allocation71_spill] sm:$0xff] }
 0x2b2   :  { %v1934_v52 = vadd.f32 %v1933_v39, %v1851_v0  ;;  %2083 = vmatmul.f32.gmra.mxu2 %v7426_v27  ;;  %2166 = vmatmul.f32.gmra.mxu3 %v5052_v38 }
 0x2b3   :  { %v1936_v51 = vpop.f32.mrf.mxu0  ;;  %v2019_v59 = vpop.f32.mrf.mxu1  ;;  %3220 = vperm.xlu1 %3430, %v2710_v21  }
 0x2b4   :  { %v5994_v32 = vadd.f32 %v2016_v30, %v1934_v52  ;;  %v7432_v30 = vld [vmem:[#allocation129_spill] sm:$0xff] }
 0x2b5   :  { %v1770_v23 = vpop.f32.mrf.mxu2  ;;  %v1853_v22 = vpop.f32.mrf.mxu3 }
 0x2b6   :  { %v1771_v18 = vadd.f32 %v1770_v23, %v5686_v8  ;;  %2249 = vmatmul.f32.gmra.mxu0 %v5055_v12  ;;  %3376 = vmatmul.msk.f32.gmra.mxu1 %vm823_vm0, %v5072_v31  ;;  %v7428_v31 = vld [vmem:[#allocation126_spill] sm:$0xff]  ;;  %v7436_v23 = vld [vmem:[#allocation132_spill] sm:$0xff] }
 0x2b8   :  { %v1854_v46 = vadd.f32 %v1853_v22, %v1771_v18 }
 0x2ba   :  { %v1937_v38 = vadd.f32 %v1936_v51, %v1854_v46  ;;  %2086 = vmatmul.f32.gmra.mxu2 %v7427_v4  ;;  %2169 = vmatmul.f32.gmra.mxu3 %v5081_v20  ;;  %v7437_v46 = vld [vmem:[#allocation75_spill] sm:$0xff] }
 0x2bb   :  { %v1939_v1 = vpop.f32.mrf.mxu0  ;;  %v2022_v41 = vpop.f32.mrf.mxu1 }
 0x2bc   :  { %v6005_v49 = vadd.f32 %v2019_v59, %v1937_v38 }
 0x2bd   :  { %v1773_v8 = vpop.f32.mrf.mxu2  ;;  %v1856_v12 = vpop.f32.mrf.mxu3 }
 0x2be   :  { %v1774_v54 = vadd.f32 %v1773_v8, %v5704_v13  ;;  %2252 = vmatmul.f32.gmra.mxu0 %v7428_v31  ;;  %3377 = vmatmul.msk.f32.gmra.mxu1 %vm823_vm0, %v7429_v2  ;;  %v2695_v13 = vld [vmem:[%s6924_s3 + $0x10] sm:$0xff] }
 0x2bf   :  { %3145 = vperm.xlu2 %3432, %v2695_v13   ;;  %v7440_v2 = vld [vmem:[#allocation79_spill] sm:$0xff]  ;;  %v7443_v13 = vld [vmem:[#allocation137_spill] sm:$0xff] }
 0x2c0   :  { %v1857_v40 = vadd.f32 %v1856_v12, %v1774_v54  ;;  %v7438_v12 = vld [vmem:[#allocation133_spill] sm:$0xff]  ;;  %v7439_v54 = vld [vmem:[#allocation134_spill] sm:$0xff] }
 0x2c2   :  { %v1940_v45 = vadd.f32 %v1939_v1, %v1857_v40  ;;  %2089 = vmatmul.f32.gmra.mxu2 %v7430_v10  ;;  %2172 = vmatmul.f32.gmra.mxu3 %v7431_v5  ;;  %v7441_v40 = vld [vmem:[#allocation135_spill] sm:$0xff] }
 0x2c3   :  { %v1942_v20 = vpop.f32.mrf.mxu0  ;;  %v2025_v55 = vpop.f32.mrf.mxu1 }
 0x2c4   :  { %v6013_v17 = vadd.f32 %v2022_v41, %v1940_v45 }
 0x2c5   :  { %v1776_v26 = vpop.f32.mrf.mxu2  ;;  %v1859_v61 = vpop.f32.mrf.mxu3 }
 0x2c6   :  { %v1777_v39 = vadd.f32 %v1776_v26, %v5722_v62  ;;  %2255 = vmatmul.f32.gmra.mxu0 %v7432_v30  ;;  %3378 = vmatmul.msk.f32.gmra.mxu1 %vm823_vm0, %v5130_v63  ;;  %v2697_v62 = vld [vmem:[%s6924_s3 + $0x20] sm:$0xff]  ;;  %v7435_v63 = vld [vmem:[#allocation131_spill] sm:$0xff] }
 0x2c7   :  { %3155 = vperm.xlu2 %3432, %v2697_v62   ;;  %v7446_v62 = vld [vmem:[#allocation139_spill] sm:$0xff] }
 0x2c8   :  { %v1860_v33 = vadd.f32 %v1859_v61, %v1777_v39  ;;  %v7442_v61 = vld [vmem:[#allocation136_spill] sm:$0xff] }
 0x2ca   :  { %v1943_v25 = vadd.f32 %v1942_v20, %v1860_v33  ;;  %2092 = vmatmul.f32.gmra.mxu2 %v7433_v58  ;;  %2175 = vmatmul.f32.gmra.mxu3 %v7434_v19  ;;  %v7444_v33 = vld [vmem:[#allocation83_spill] sm:$0xff] }
 0x2cb   :  { %v1945_v0 = vpop.f32.mrf.mxu0  ;;  %v2028_v53 = vpop.f32.mrf.mxu1 }
 0x2cc   :  { %v6024_v52 = vadd.f32 %v2025_v55, %v1943_v25  ;;  %v7445_v25 = vld [vmem:[#allocation138_spill] sm:$0xff] }
 0x2cd   :  { %v1779_v27 = vpop.f32.mrf.mxu2  ;;  %v1862_v51 = vpop.f32.mrf.mxu3 }
 0x2ce   :  { %v1780_v59 = vadd.f32 %v1779_v27, %v5734_v14  ;;  %2258 = vmatmul.f32.gmra.mxu0 %v7435_v63  ;;  %3379 = vmatmul.msk.f32.gmra.mxu1 %vm823_vm0, %v7436_v23  ;;  %v2700_v14 = vld [vmem:[%s6924_s3 + $0x38] sm:$0xff] }
 0x2cf   :  { %3170 = vperm.xlu2 %3432, %v2700_v14  }
 0x2d0   :  { %v1863_v22 = vadd.f32 %v1862_v51, %v1780_v59  ;;  %v7447_v59 = vld [vmem:[#allocation140_spill] sm:$0xff] }
 0x2d2   :  { %v1946_v18 = vadd.f32 %v1945_v0, %v1863_v22  ;;  %2095 = vmatmul.f32.gmra.mxu2 %v7437_v46  ;;  %2178 = vmatmul.f32.gmra.mxu3 %v5177_v37  ;;  %v7448_v22 = vld [vmem:[#allocation87_spill] sm:$0xff] }
 0x2d3   :  { %v1948_v21 = vpop.f32.mrf.mxu0  ;;  %v2031_v38 = vpop.f32.mrf.mxu1 }
 0x2d4   :  { %v6035_v4 = vadd.f32 %v2028_v53, %v1946_v18  ;;  %v7449_v18 = vld [vmem:[#allocation141_spill] sm:$0xff] }
 0x2d5   :  { %v1782_v1 = vpop.f32.mrf.mxu2  ;;  %v1865_v41 = vpop.f32.mrf.mxu3 }
 0x2d6   :  { %v1783_v8 = vadd.f32 %v1782_v1, %v5752_v48  ;;  %2261 = vmatmul.f32.gmra.mxu0 %v7438_v12  ;;  %3380 = vmatmul.msk.f32.gmra.mxu1 %vm823_vm0, %v7439_v54  ;;  %v2703_v48 = vld [vmem:[%s6924_s3 + $0x50] sm:$0xff] }
 0x2d7   :  { %3185 = vperm.xlu2 %3432, %v2703_v48   ;;  %v7451_v12 = vld [vmem:[#allocation143_spill] sm:$0xff]  ;;  %v7454_v48 = vld [vmem:[#allocation145_spill] sm:$0xff] }
 0x2d8   :  { %v1866_v31 = vadd.f32 %v1865_v41, %v1783_v8  ;;  %v7450_v8 = vld [vmem:[#allocation142_spill] sm:$0xff] }
 0x2da   :  { %v1949_v37 = vadd.f32 %v1948_v21, %v1866_v31  ;;  %2098 = vmatmul.f32.gmra.mxu2 %v7440_v2  ;;  %2181 = vmatmul.f32.gmra.mxu3 %v7441_v40  ;;  %v7453_v2 = vld [vmem:[#allocation144_spill] sm:$0xff] }
 0x2db   :  { %v1951_v45 = vpop.f32.mrf.mxu0  ;;  %v2034_v10 = vpop.f32.mrf.mxu1 }
 0x2dc   :  { %v6046_v5 = vadd.f32 %v2031_v38, %v1949_v37  ;;  %v7452_v37 = vld [vmem:[#allocation91_spill] sm:$0xff] }
 0x2dd   :  { %v1785_v20 = vpop.f32.mrf.mxu2  ;;  %v1868_v55 = vpop.f32.mrf.mxu3 }
 0x2de   :  { %v1786_v26 = vadd.f32 %v1785_v20, %v5770_v7  ;;  %2264 = vmatmul.f32.gmra.mxu0 %v7442_v61  ;;  %3381 = vmatmul.msk.f32.gmra.mxu1 %vm823_vm0, %v7443_v13  ;;  %v2706_v7 = vld [vmem:[%s6924_s3 + $0x68] sm:$0xff] }
 0x2df   :  { %3200 = vperm.xlu2 %3432, %v2706_v7   ;;  %v7459_v7 = vld [vmem:[#allocation9_spill] sm:$0xff] }
 0x2e0   :  { %v1869_v39 = vadd.f32 %v1868_v55, %v1786_v26  ;;  %v7455_v26 = vld [vmem:[#allocation146_spill] sm:$0xff] }
 0x2e2   :  { %v1952_v30 = vadd.f32 %v1951_v45, %v1869_v39  ;;  %2101 = vmatmul.f32.gmra.mxu2 %v7444_v33  ;;  %2184 = vmatmul.f32.gmra.mxu3 %v7445_v25  ;;  %v7456_v39 = vld [vmem:[#allocation96_spill] sm:$0xff] }
 0x2e3   :  { %v1954_v58 = vpop.f32.mrf.mxu0  ;;  %v2037_v19 = vpop.f32.mrf.mxu1 }
 0x2e4   :  { %v6057_v0 = vadd.f32 %v2034_v10, %v1952_v30  ;;  %v7457_v30 = vld [vmem:[#allocation93_spill] sm:$0xff] }
 0x2e5   :  { %v1788_v53 = vpop.f32.mrf.mxu2  ;;  %v1871_v27 = vpop.f32.mrf.mxu3 }
 0x2e6   :  { %v1789_v51 = vadd.f32 %v1788_v53, %v5785_v47  ;;  %2267 = vmatmul.f32.gmra.mxu0 %v7446_v62  ;;  %3382 = vmatmul.msk.f32.gmra.mxu1 %vm823_vm0, %v7447_v59  ;;  %v2709_v47 = vld [vmem:[%s6924_s3 + $0x80] sm:$0xff] }
 0x2e7   :  { %3215 = vperm.xlu2 %3432, %v2709_v47   ;;  %v7460_v59 = vld [vmem:[#allocation101_spill] sm:$0xff] }
 0x2e8   :  { %v1872_v63 = vadd.f32 %v1871_v27, %v1789_v51 }
 0x2ea   :  { %v1955_v23 = vadd.f32 %v1954_v58, %v1872_v63  ;;  %2104 = vmatmul.f32.gmra.mxu2 %v7448_v22  ;;  %2187 = vmatmul.f32.gmra.mxu3 %v7449_v18  ;;  %v7461_v63 = vld [vmem:[#allocation98_spill] sm:$0xff] }
 0x2eb   :  { %v1957_v46 = vpop.f32.mrf.mxu0  ;;  %v2040_v21 = vpop.f32.mrf.mxu1 }
 0x2ec   :  { %v6068_v38 = vadd.f32 %v2037_v19, %v1955_v23 }
 0x2ed   :  { %v1791_v1 = vpop.f32.mrf.mxu2  ;;  %v1874_v41 = vpop.f32.mrf.mxu3 }
 0x2ee   :  { %v1792_v14 = vadd.f32 %v1791_v1, %v5797_v3  ;;  %2270 = vmatmul.f32.gmra.mxu0 %v7450_v8  ;;  %3383 = vmatmul.msk.f32.gmra.mxu1 %vm823_vm0, %v7451_v12  ;;  %v7464_v8 = vld [vmem:[#allocation106_spill] sm:$0xff] }
 0x2f0   :  { %v1875_v54 = vadd.f32 %v1874_v41, %v1792_v14  ;;  %v7463_v41 = vld [vmem:[#allocation12_spill] sm:$0xff] }
 0x2f2   :  { %v1958_v31 = vadd.f32 %v1957_v46, %v1875_v54  ;;  %2107 = vmatmul.f32.gmra.mxu2 %v7452_v37  ;;  %2190 = vmatmul.f32.gmra.mxu3 %v7453_v2 }
 0x2f3   :  { %v1960_v40 = vpop.f32.mrf.mxu0  ;;  %v2043_v45 = vpop.f32.mrf.mxu1 }
 0x2f4   :  { %v6079_v10 = vadd.f32 %v2040_v21, %v1958_v31 }
 0x2f5   :  { %v1794_v20 = vpop.f32.mrf.mxu2  ;;  %v1877_v55 = vpop.f32.mrf.mxu3 }
 0x2f6   :  { %v1795_v3 = vadd.f32 %v1794_v20, %v5815_v9  ;;  %2273 = vmatmul.f32.gmra.mxu0 %v7454_v48  ;;  %3384 = vmatmul.msk.f32.gmra.mxu1 %vm823_vm0, %v7455_v26  ;;  %v7458_v9 = vld [vmem:[#allocation147_spill] sm:$0xff]  ;;  %v7468_v48 = vld [vmem:[#allocation149_spill] sm:$0xff] }
 0x2f8   :  { %v1878_v61 = vadd.f32 %v1877_v55, %v1795_v3  ;;  %v7467_v3 = vld [vmem:[#allocation110_spill] sm:$0xff] }
 0x2fa   :  { %v1961_v13 = vadd.f32 %v1960_v40, %v1878_v61  ;;  %2110 = vmatmul.f32.gmra.mxu2 %v7456_v39  ;;  %2193 = vmatmul.f32.gmra.mxu3 %v7457_v30 }
 0x2fb   :  { %v1963_v33 = vpop.f32.mrf.mxu0  ;;  %v2046_v25 = vpop.f32.mrf.mxu1 }
 0x2fc   :  { %v6087_v58 = vadd.f32 %v2043_v45, %v1961_v13  ;;  %v7466_v45 = vld [vmem:[#allocation15_spill] sm:$0xff] }
 0x2fd   :  { %v1797_v19 = vpop.f32.mrf.mxu2  ;;  %v1880_v53 = vpop.f32.mrf.mxu3 }
 0x2fe   :  { %v1798_v27 = vadd.f32 %v1797_v19, %v5833_v44  ;;  %2276 = vmatmul.f32.gmra.mxu0 %v7458_v9  ;;  %3385 = vmatmul.msk.f32.gmra.mxu1 %vm823_vm0, %v7459_v7  ;;  %v7462_v44 = vld [vmem:[#allocation148_spill] sm:$0xff]  ;;  %v7471_v19 = vld [vmem:[#allocation18_spill] sm:$0xff]  ;;  %v7472_v7 = vld [vmem:[#allocation113_spill] sm:$0xff] }
 0x300   :  { %v1881_v51 = vadd.f32 %v1880_v53, %v1798_v27 }
 0x302   :  { %v1964_v62 = vadd.f32 %v1963_v33, %v1881_v51  ;;  %2113 = vmatmul.f32.gmra.mxu2 %v7460_v59  ;;  %2196 = vmatmul.f32.gmra.mxu3 %v7461_v63  ;;  %v7469_v33 = vld [vmem:[#allocation150_spill] sm:$0xff]  ;;  %v7473_v51 = vld [vmem:[#allocation152_spill] sm:$0xff] }
 0x303   :  { %v1966_v23 = vpop.f32.mrf.mxu0  ;;  %v2049_v22 = vpop.f32.mrf.mxu1 }
 0x304   :  { %v6095_v18 = vadd.f32 %v2046_v25, %v1964_v62  ;;  %v7470_v25 = vld [vmem:[#allocation151_spill] sm:$0xff] }
 0x305   :  { %v1800_v46 = vpop.f32.mrf.mxu2  ;;  %v1883_v21 = vpop.f32.mrf.mxu3 }
 0x306   :  { %v1801_v1 = vadd.f32 %v1800_v46, %v5845_v42  ;;  %2279 = vmatmul.f32.gmra.mxu0 %v7462_v44  ;;  %3386 = vmatmul.msk.f32.gmra.mxu1 %vm823_vm0, %v7463_v41  ;;  %v7465_v42 = vld [vmem:[#allocation103_spill] sm:$0xff]  ;;  %v7476_v44 = vld [vmem:[#allocation21_spill] sm:$0xff] }
 0x308   :  { %v1884_v47 = vadd.f32 %v1883_v21, %v1801_v1  ;;  %v7474_v21 = vld [vmem:[#allocation153_spill] sm:$0xff]  ;;  %v7475_v1 = vld [vmem:[#allocation154_spill] sm:$0xff] }
 0x30a   :  { %v1967_v14 = vadd.f32 %v1966_v23, %v1884_v47  ;;  %2116 = vmatmul.f32.gmra.mxu2 %v7464_v8  ;;  %2199 = vmatmul.f32.gmra.mxu3 %v5401_v11  ;;  %v7477_v8 = vld [vmem:[#allocation116_spill] sm:$0xff] }
 0x30b   :  { %v2235_v12 = vpop.f32.mrf.mxu0  ;;  %v2318_v54 = vpop.f32.mrf.mxu1 }
 0x30c   :  { %v6103_v31 = vadd.f32 %v2049_v22, %v1967_v14 }
 0x30d   :  { %v2069_v37 = vpop.f32.mrf.mxu2  ;;  %v2152_v2 = vpop.f32.mrf.mxu3 }
 0x30e   :  { %v2070_v40 = vadd.f32 %v2069_v37, %v5877_v29  ;;  %2282 = vmatmul.f32.gmra.mxu0 %v7465_v42  ;;  %3387 = vmatmul.msk.f32.gmra.mxu1 %vm823_vm0, %v7466_v45 }
 0x310   :  { %v2153_v20 = vadd.f32 %v2152_v2, %v2070_v40 }
 0x312   :  { %v2236_v55 = vadd.f32 %v2235_v12, %v2153_v20  ;;  %2119 = vmatmul.f32.gmra.mxu2 %v7467_v3  ;;  %2202 = vmatmul.f32.gmra.mxu3 %v7468_v48  ;;  %v7478_v12 = vld [vmem:[#allocation155_spill] sm:$0xff]  ;;  %v7479_v20 = vld [vmem:[#allocation156_spill] sm:$0xff] }
 0x313   :  { %v2238_v11 = vpop.f32.mrf.mxu0  ;;  %v2321_v26 = vpop.f32.mrf.mxu1  ;;  %v7481_v3 = vld [vmem:[#allocation24_spill] sm:$0xff] }
 0x314   :  { %v6111_v61 = vadd.f32 %v2318_v54, %v2236_v55  ;;  %v7480_v55 = vld [vmem:[#allocation157_spill] sm:$0xff] }
 0x315   :  { %v2072_v13 = vpop.f32.mrf.mxu2  ;;  %v2155_v39 = vpop.f32.mrf.mxu3 }
 0x316   :  { %v2073_v29 = vadd.f32 %v2072_v13, %v5887_v60  ;;  %v2385_v30 = vsel %vm2384_vm1, %v6111_v61, 0.0  ;;  %2285 = vmatmul.f32.gmra.mxu0 %v7469_v33  ;;  %3388 = vmatmul.msk.f32.gmra.mxu1 %vm823_vm0, %v7470_v25  ;;  %v7482_v13 = vld [vmem:[#allocation119_spill] sm:$0xff] }
 0x317   :  { %v2386_v53 = vadd.f32 %v2385_v30, %v7471_v19 }
 0x318   :  { %v2156_v27 = vadd.f32 %v2155_v39, %v2073_v29 }
 0x319   :  { %2387 = vadd.xlane.f32.xlu0 %v2386_v53 }
 0x31a   :  { %v2239_v9 = vadd.f32 %v2238_v11, %v2156_v27  ;;  %2122 = vmatmul.f32.gmra.mxu2 %v7472_v7  ;;  %2205 = vmatmul.f32.gmra.mxu3 %v7473_v51  ;;  %v7483_v27 = vld [vmem:[#allocation158_spill] sm:$0xff] }
 0x31b   :  { %v2241_v62 = vpop.f32.mrf.mxu0  ;;  %v2324_v59 = vpop.f32.mrf.mxu1 }
 0x31c   :  { %v6122_v60 = vadd.f32 %v2321_v26, %v2239_v9  ;;  %v7484_v9 = vld [vmem:[#allocation27_spill] sm:$0xff] }
 0x31d   :  { %v2075_v63 = vpop.f32.mrf.mxu2  ;;  %v2158_v23 = vpop.f32.mrf.mxu3 }
 0x31e   :  { %v2076_v22 = vadd.f32 %v2075_v63, %v5894_v24  ;;  %v2389_v46 = vsel %vm2384_vm1, %v6122_v60, 0.0  ;;  %2288 = vmatmul.f32.gmra.mxu0 %v7474_v21  ;;  %3389 = vmatmul.msk.f32.gmra.mxu1 %vm823_vm0, %v7475_v1  ;;  %v7486_v21 = vld [vmem:[#allocation159_spill] sm:$0xff]  ;;  %v7487_v1 = vld [vmem:[#allocation160_spill] sm:$0xff] }
 0x31f   :  { %v2390_v41 = vadd.f32 %v2389_v46, %v7476_v44 }
 0x320   :  { %v2159_v47 = vadd.f32 %v2158_v23, %v2076_v22 }
 0x321   :  { %2391 = vadd.xlane.f32.xlu0 %v2390_v41  ;;  %v7488_v41 = vld [vmem:[#allocation30_spill] sm:$0xff] }
 0x322   :  { %v2242_v14 = vadd.f32 %v2241_v62, %v2159_v47  ;;  %2125 = vmatmul.f32.gmra.mxu2 %v7477_v8  ;;  %2208 = vmatmul.f32.gmra.mxu3 %v7478_v12  ;;  %v7485_v62 = vld [vmem:[#allocation120_spill] sm:$0xff] }
 0x323   :  { %v2244_v54 = vpop.f32.mrf.mxu0  ;;  %v2327_v37 = vpop.f32.mrf.mxu1 }
 0x324   :  { %v6133_v24 = vadd.f32 %v2324_v59, %v2242_v14 }
 0x325   :  { %v2078_v2 = vpop.f32.mrf.mxu2  ;;  %v2161_v40 = vpop.f32.mrf.mxu3 }
 0x326   :  { %v2079_v42 = vadd.f32 %v2078_v2, %v5901_v15  ;;  %v2393_v45 = vsel %vm2384_vm1, %v6133_v24, 0.0  ;;  %2291 = vmatmul.f32.gmra.mxu0 %v7479_v20  ;;  %3390 = vmatmul.msk.f32.gmra.mxu1 %vm823_vm0, %v7480_v55 }
 0x327   :  { %v2394_v48 = vadd.f32 %v2393_v45, %v7481_v3 }
 0x328   :  { %v2162_v11 = vadd.f32 %v2161_v40, %v2079_v42  ;;  %v7489_v42 = vld [vmem:[#allocation33_spill] sm:$0xff] }
 0x329   :  { %2395 = vadd.xlane.f32.xlu1 %v2394_v48 }
 0x32a   :  { %v2245_v26 = vadd.f32 %v2244_v54, %v2162_v11  ;;  %2128 = vmatmul.f32.gmra.mxu2 %v7482_v13  ;;  %2211 = vmatmul.f32.gmra.mxu3 %v5534_v36 }
 0x32b   :  { %v2247_v39 = vpop.f32.mrf.mxu0  ;;  %v2330_v29 = vpop.f32.mrf.mxu1 }
 0x32c   :  { %v6144_v15 = vadd.f32 %v2327_v37, %v2245_v26 }
 0x32d   :  { %v2081_v30 = vpop.f32.mrf.mxu2  ;;  %v2164_v33 = vpop.f32.mrf.mxu3 }
 0x32e   :  { %v2082_v25 = vadd.f32 %v2081_v30, %v5914_v50  ;;  %v2397_v53 = vsel %vm2384_vm1, %v6144_v15, 0.0  ;;  %2294 = vmatmul.f32.gmra.mxu0 %v7483_v27  ;;  %3391 = vmatmul.msk.f32.gmra.mxu1 %vm823_vm0, %v5559_v6 }
 0x32f   :  { %v2398_v7 = vadd.f32 %v2397_v53, %v7484_v9 }
 0x330   :  { %v2165_v51 = vadd.f32 %v2164_v33, %v2082_v25 }
 0x331   :  { %2399 = vadd.xlane.f32.xlu1 %v2398_v7 }
 0x332   :  { %v2248_v36 = vadd.f32 %v2247_v39, %v2165_v51  ;;  %2131 = vmatmul.f32.gmra.mxu2 %v7485_v62  ;;  %2214 = vmatmul.f32.gmra.mxu3 %v5568_v16 }
 0x333   :  { %v2250_v59 = vpop.f32.mrf.mxu0  ;;  %v2333_v63 = vpop.f32.mrf.mxu1 }
 0x334   :  { %v6155_v50 = vadd.f32 %v2330_v29, %v2248_v36 }
 0x335   :  { %v2084_v23 = vpop.f32.mrf.mxu2  ;;  %v2167_v22 = vpop.f32.mrf.mxu3 }
 0x336   :  { %v2085_v46 = vadd.f32 %v2084_v23, %v5927_v34  ;;  %v2401_v6 = vsel %vm2384_vm1, %v6155_v50, 0.0  ;;  %2297 = vmatmul.f32.gmra.mxu0 %v7486_v21  ;;  %3392 = vmatmul.msk.f32.gmra.mxu1 %vm823_vm0, %v7487_v1 }
 0x337   :  { %v2402_v47 = vadd.f32 %v2401_v6, %v7488_v41 }
 0x338   :  { %v2168_v14 = vadd.f32 %v2167_v22, %v2085_v46  ;;  %v6182_v46 = vpop.permute.xlu0 %3140 }
 0x339   :  { %2403 = vadd.xlane.f32.xlu2 %v2402_v47 }
 0x33a   :  { %v2251_v16 = vadd.f32 %v2250_v59, %v2168_v14 }
 0x33b   :  { %v2253_v8 = vpop.f32.mrf.mxu0  ;;  %v2336_v12 = vpop.f32.mrf.mxu1 }
 0x33c   :  { %v6164_v54 = vadd.f32 %v2333_v63, %v2251_v16 }
 0x33d   :  { %v2087_v37 = vpop.f32.mrf.mxu2  ;;  %v2170_v2 = vpop.f32.mrf.mxu3 }
 0x33e   :  { %v2088_v34 = vadd.f32 %v2087_v37, %v5941_v57  ;;  %v2405_v40 = vsel %vm2384_vm1, %v6164_v54, 0.0  ;;  %v7490_v57 = vld [vmem:[#allocation6_spill] sm:$0xff] }
 0x33f   :  { %v2406_v45 = vadd.f32 %v2405_v40, %v7489_v42 }
 0x340   :  { %v2171_v20 = vadd.f32 %v2170_v2, %v2088_v34  ;;  %v6190_v2 = vpop.permute.xlu1 %3135 }
 0x341   :  { %2407 = vadd.xlane.f32.xlu2 %v2406_v45 }
 0x342   :  { %v2254_v55 = vadd.f32 %v2253_v8, %v2171_v20 }
 0x343   :  { %v2256_v48 = vpop.f32.mrf.mxu0  ;;  %v2339_v11 = vpop.f32.mrf.mxu1 }
 0x344   :  { %v6170_v26 = vadd.f32 %v2336_v12, %v2254_v55  ;;  %v7492_v12 = vld [vmem:[#allocation37_spill] sm:$0xff]  ;;  %v6192_v55 = vpop.permute.xlu0 %3165 }
 0x345   :  { %v2090_v13 = vpop.f32.mrf.mxu2  ;;  %v2173_v39 = vpop.f32.mrf.mxu3  ;;  %7493 = vst [vmem:[#allocation17_spill] sm:$0xff] %v6192_v55 }
 0x346   :  { %v2091_v29 = vadd.f32 %v2090_v13, %v5955_v56  ;;  %v2409_v30 = vsel %vm2384_vm1, %v6170_v26, 0.0  ;;  %v7491_v56 = vld [vmem:[#allocation36_spill] sm:$0xff] }
 0x347   :  { %v2410_v33 = vadd.f32 %v2409_v30, %v7490_v57 }
 0x348   :  { %v2174_v25 = vadd.f32 %v2173_v39, %v2091_v29  ;;  %v7494_v29 = vld [vmem:[#allocation38_spill] sm:$0xff] }
 0x349   :  { %2411 = vadd.xlane.f32.xlu0 %v2410_v33 }
 0x34a   :  { %v2257_v53 = vadd.f32 %v2256_v48, %v2174_v25  ;;  %v6200_v25 = vpop.permute.xlu1 %3150 }
 0x34b   :  { %v2259_v27 = vpop.f32.mrf.mxu0  ;;  %v2342_v7 = vpop.f32.mrf.mxu1 }
 0x34c   :  { %v6176_v51 = vadd.f32 %v2339_v11, %v2257_v53 }
 0x34d   :  { %v2093_v36 = vpop.f32.mrf.mxu2  ;;  %v2176_v62 = vpop.f32.mrf.mxu3 }
 0x34e   :  { %v2094_v59 = vadd.f32 %v2093_v36, %v5969_v35  ;;  %v2413_v63 = vsel %vm2384_vm1, %v6176_v51, 0.0 }
 0x34f   :  { %v2414_v23 = vadd.f32 %v2413_v63, %v7491_v56  ;;  %v6204_v63 = vpop.permute.xlu0 %3180 }
 0x350   :  { %v2177_v22 = vadd.f32 %v2176_v62, %v2094_v59  ;;  %7495 = vst [vmem:[#allocation52_spill] sm:$0xff] %v6204_v63 }
 0x351   :  { %2415 = vadd.xlane.f32.xlu1 %v2414_v23 }
 0x352   :  { %v2260_v6 = vadd.f32 %v2259_v27, %v2177_v22  ;;  %v7496_v22 = vld [vmem:[#allocation8_spill] sm:$0xff] }
 0x353   :  { %v2262_v21 = vpop.f32.mrf.mxu0  ;;  %v2345_v1 = vpop.f32.mrf.mxu1 }
 0x354   :  { %v6184_v47 = vadd.f32 %v2342_v7, %v2260_v6 }
 0x355   :  { %v2096_v14 = vpop.f32.mrf.mxu2  ;;  %v2179_v16 = vpop.f32.mrf.mxu3 }
 0x356   :  { %v2097_v8 = vadd.f32 %v2096_v14, %v5983_v43  ;;  %v2417_v35 = vsel %vm2384_vm1, %v6184_v47, 0.0 }
 0x357   :  { %v2418_v37 = vadd.f32 %v2417_v35, %v7492_v12 }
 0x358   :  { %v2180_v34 = vadd.f32 %v2179_v16, %v2097_v8  ;;  %v6210_v8 = vpop.permute.xlu1 %3160 }
 0x359   :  { %2419 = vadd.xlane.f32.xlu2 %v2418_v37  ;;  %7497 = vst [vmem:[#allocation53_spill] sm:$0xff] %v6210_v8 }
 0x35a   :  { %v2263_v40 = vadd.f32 %v2262_v21, %v2180_v34 }
 0x35b   :  { %v2265_v45 = vpop.f32.mrf.mxu0  ;;  %v2348_v20 = vpop.f32.mrf.mxu1 }
 0x35c   :  { %v6194_v48 = vadd.f32 %v2345_v1, %v2263_v40 }
 0x35d   :  { %v2099_v11 = vpop.f32.mrf.mxu2  ;;  %v2182_v13 = vpop.f32.mrf.mxu3 }
 0x35e   :  { %v2100_v43 = vadd.f32 %v2099_v11, %v5994_v32  ;;  %v2421_v39 = vsel %vm2384_vm1, %v6194_v48, 0.0  ;;  %v6218_v11 = vpop.permute.xlu0 %3195 }
 0x35f   :  { %v2422_v30 = vadd.f32 %v2421_v39, %v7494_v29  ;;  %7499 = vst [vmem:[#allocation54_spill] sm:$0xff] %v6218_v11 }
 0x360   :  { %v2183_v33 = vadd.f32 %v2182_v13, %v2100_v43  ;;  %v6220_v43 = vpop.permute.xlu2 %3145 }
 0x361   :  { %2423 = vadd.xlane.f32.xlu0 %v2422_v30 }
 0x362   :  { %v2266_v53 = vadd.f32 %v2265_v45, %v2183_v33  ;;  %v7498_v45 = vld [vmem:[#allocation40_spill] sm:$0xff] }
 0x363   :  { %v2268_v27 = vpop.f32.mrf.mxu0  ;;  %v2351_v7 = vpop.f32.mrf.mxu1 }
 0x364   :  { %v6202_v36 = vadd.f32 %v2348_v20, %v2266_v53 }
 0x365   :  { %v2102_v62 = vpop.f32.mrf.mxu2  ;;  %v2185_v59 = vpop.f32.mrf.mxu3 }
 0x366   :  { %v2103_v32 = vadd.f32 %v2102_v62, %v6005_v49  ;;  %v2425_v23 = vsel %vm2384_vm1, %v6202_v36, 0.0  ;;  %v6224_v62 = vpop.permute.xlu1 %3175 }
 0x367   :  { %v2426_v6 = vadd.f32 %v2425_v23, %v7496_v22 }
 0x368   :  { %v2186_v21 = vadd.f32 %v2185_v59, %v2103_v32  ;;  %v7500_v32 = vld [vmem:[#allocation41_spill] sm:$0xff] }
 0x369   :  { %2427 = vadd.xlane.f32.xlu1 %v2426_v6 }
 0x36a   :  { %v2269_v1 = vadd.f32 %v2268_v27, %v2186_v21  ;;  %v6230_v21 = vpop.permute.xlu0 %3210 }
 0x36b   :  { %v2271_v14 = vpop.f32.mrf.mxu0  ;;  %v2354_v16 = vpop.f32.mrf.mxu1  ;;  %7501 = vst [vmem:[#allocation20_spill] sm:$0xff] %v6230_v21 }
 0x36c   :  { %v6212_v35 = vadd.f32 %v2351_v7, %v2269_v1 }
 0x36d   :  { %v2105_v37 = vpop.f32.mrf.mxu2  ;;  %v2188_v34 = vpop.f32.mrf.mxu3 }
 0x36e   :  { %v2106_v40 = vadd.f32 %v2105_v37, %v6013_v17  ;;  %v2429_v49 = vsel %vm2384_vm1, %v6212_v35, 0.0 }
 0x36f   :  { %v2430_v20 = vadd.f32 %v2429_v49, %v7498_v45 }
 0x370   :  { %v2189_v13 = vadd.f32 %v2188_v34, %v2106_v40 }
 0x371   :  { %2431 = vadd.xlane.f32.xlu2 %v2430_v20 }
 0x372   :  { %v2272_v39 = vadd.f32 %v2271_v14, %v2189_v13  ;;  %v7502_v13 = vld [vmem:[#allocation42_spill] sm:$0xff] }
 0x373   :  { %v2274_v30 = vpop.f32.mrf.mxu0  ;;  %v2357_v33 = vpop.f32.mrf.mxu1 }
 0x374   :  { %v6222_v53 = vadd.f32 %v2354_v16, %v2272_v39  ;;  %v6232_v16 = vpop.permute.xlu2 %3155 }
 0x375   :  { %v2108_v27 = vpop.f32.mrf.mxu2  ;;  %v2191_v7 = vpop.f32.mrf.mxu3 }
 0x376   :  { %v2109_v17 = vadd.f32 %v2108_v27, %v6024_v52  ;;  %v2433_v59 = vsel %vm2384_vm1, %v6222_v53, 0.0  ;;  %v6240_v27 = vpop.permute.xlu1 %3190 }
 0x377   :  { %v2434_v23 = vadd.f32 %v2433_v59, %v7500_v32  ;;  %7503 = vst [vmem:[#allocation56_spill] sm:$0xff] %v6240_v27 }
 0x378   :  { %v2192_v6 = vadd.f32 %v2191_v7, %v2109_v17 }
 0x379   :  { %2435 = vadd.xlane.f32.xlu0 %v2434_v23  ;;  %v6242_v23 = vpop.permute.xlu0 %3225 }
 0x37a   :  { %v2275_v1 = vadd.f32 %v2274_v30, %v2192_v6  ;;  %7504 = vst [vmem:[#allocation57_spill] sm:$0xff] %v6242_v23 }
 0x37b   :  { %v2277_v14 = vpop.f32.mrf.mxu0  ;;  %v2360_v37 = vpop.f32.mrf.mxu1 }
 0x37c   :  { %v6234_v34 = vadd.f32 %v2357_v33, %v2275_v1  ;;  %v6246_v28 = vpop.permute.xlu2 %3170 }
 0x37d   :  { %v2111_v40 = vpop.f32.mrf.mxu2  ;;  %v2194_v49 = vpop.f32.mrf.mxu3  ;;  %7505 = vst [vmem:[#allocation58_spill] sm:$0xff] %v6246_v28 }
 0x37e   :  { %v2112_v52 = vadd.f32 %v2111_v40, %v6035_v4  ;;  %v2437_v20 = vsel %vm2384_vm1, %v6234_v34, 0.0 }
 0x37f   :  { %v2438_v39 = vadd.f32 %v2437_v20, %v7502_v13  ;;  %v7506_v20 = vld [vmem:[#allocation11_spill] sm:$0xff] }
 0x380   :  { %v2195_v7 = vadd.f32 %v2194_v49, %v2112_v52 }
 0x381   :  { %2439 = vadd.xlane.f32.xlu1 %v2438_v39 }
 0x382   :  { %v2278_v30 = vadd.f32 %v2277_v14, %v2195_v7  ;;  %v6252_v14 = vpop.permute.xlu1 %3205 }
 0x383   :  { %v2280_v17 = vpop.f32.mrf.mxu0  ;;  %v2363_v59 = vpop.f32.mrf.mxu1  ;;  %7507 = vst [vmem:[#allocation23_spill] sm:$0xff] %v6252_v14 }
 0x384   :  { %v6244_v33 = vadd.f32 %v2360_v37, %v2278_v30 }
 0x385   :  { %v2114_v6 = vpop.f32.mrf.mxu2  ;;  %v2197_v1 = vpop.f32.mrf.mxu3 }
 0x386   :  { %v2115_v4 = vadd.f32 %v2114_v6, %v6046_v5  ;;  %v2441_v40 = vsel %vm2384_vm1, %v6244_v33, 0.0 }
 0x387   :  { %v2442_v21 = vadd.f32 %v2441_v40, %v7506_v20 }
 0x388   :  { %v2198_v49 = vadd.f32 %v2197_v1, %v2115_v4  ;;  %v6266_v4 = vpop.permute.xlu2 %3185 }
 0x389   :  { %2443 = vadd.xlane.f32.xlu2 %v2442_v21  ;;  %7509 = vst [vmem:[#allocation60_spill] sm:$0xff] %v6266_v4 }
 0x38a   :  { %v2281_v52 = vadd.f32 %v2280_v17, %v2198_v49  ;;  %v7508_v17 = vld [vmem:[#allocation44_spill] sm:$0xff]  ;;  %v6273_v14 = vpop.permute.xlu1 %3220 }
 0x38b   :  { %v2283_v39 = vpop.f32.mrf.mxu0  ;;  %v2366_v7 = vpop.f32.mrf.mxu1  ;;  %7510 = vst [vmem:[#allocation61_spill] sm:$0xff] %v6273_v14 }
 0x38c   :  { %v6254_v37 = vadd.f32 %v2363_v59, %v2281_v52  ;;  %v2388_v30 = vpop.xlane.xlu0 %2387 }
 0x38d   :  { %v2473_v23 = vmul.f32 0.0051020407, %v2388_v30  ;;  %v2117_v8 = vpop.f32.mrf.mxu2  ;;  %v2200_v28 = vpop.f32.mrf.mxu3 }
 0x38e   :  { %v2118_v5 = vadd.f32 %v2117_v8, %v6057_v0  ;;  %v2445_v6 = vsel %vm2384_vm1, %v6254_v37, 0.0 }
 0x38f   :  { %v6260_v40 = vsub.f32 %v7471_v19, %v2473_v23  ;;  %v6263_v21 = vsub.f32 %v6111_v61, %v2473_v23  ;;  %v2446_v1 = vadd.f32 %v2445_v6, %v7508_v17 }
 0x390   :  { %v2201_v59 = vadd.f32 %v2200_v28, %v2118_v5 }
 0x391   :  { %2447 = vadd.xlane.f32.xlu0 %v2446_v1  ;;  %v2539_v49 = vmul.f32 %v6260_v40, %v6260_v40  ;;  %v2540_v0 = vmul.f32 %v6263_v21, %v6263_v21 }
 0x392   :  { %v2284_v8 = vadd.f32 %v2283_v39, %v2201_v59 }
 0x393   :  { %v2583_v52 = vsel %vm2384_vm1, %v2540_v0, 0.0  ;;  %v2286_v19 = vpop.f32.mrf.mxu0  ;;  %v2369_v30 = vpop.f32.mrf.mxu1 }
 0x394   :  { %v2392_v61 = vpop.xlane.xlu0 %2391  ;;  %v2584_v23 = vadd.f32 %v2583_v52, %v2539_v49  ;;  %v6275_v6 = vadd.f32 %v2366_v7, %v2284_v8  ;;  %v6290_v8 = vpop.permute.xlu2 %3200 }
 0x395   :  { %v2474_v4 = vmul.f32 0.0051020407, %v2392_v61  ;;  %v2120_v28 = vpop.f32.mrf.mxu2  ;;  %v2203_v5 = vpop.f32.mrf.mxu3  ;;  %7511 = vst [vmem:[#allocation62_spill] sm:$0xff] %v6290_v8 }
 0x396   :  { %v2121_v1 = vadd.f32 %v2120_v28, %v6068_v38  ;;  %2585 = vadd.xlane.f32.xlu1 %v2584_v23  ;;  %v2449_v49 = vsel %vm2384_vm1, %v6275_v6, 0.0 }
 0x397   :  { %v6279_v11 = vsub.f32 %v7476_v44, %v2474_v4  ;;  %v6282_v39 = vsub.f32 %v6122_v60, %v2474_v4  ;;  %v7512_v60 = vld [vmem:[#allocation45_spill] sm:$0xff] }
 0x398   :  { %v2204_v59 = vadd.f32 %v2203_v5, %v2121_v1  ;;  %v2450_v4 = vadd.f32 %v2449_v49, %v7512_v60 }
 0x399   :  { %v2541_v0 = vmul.f32 %v6279_v11, %v6279_v11  ;;  %v2542_v7 = vmul.f32 %v6282_v39, %v6282_v39 }
 0x39a   :  { %v2287_v38 = vadd.f32 %v2286_v19, %v2204_v59 }
 0x39b   :  { %v2587_v52 = vsel %vm2384_vm1, %v2542_v7, 0.0  ;;  %v2289_v44 = vpop.f32.mrf.mxu0  ;;  %v2372_v28 = vpop.f32.mrf.mxu1 }
 0x39c   :  { %v2396_v61 = vpop.xlane.xlu1 %2395  ;;  %v2588_v23 = vadd.f32 %v2587_v52, %v2541_v0  ;;  %v6294_v5 = vadd.f32 %v2369_v30, %v2287_v38  ;;  %v6310_v38 = vpop.permute.xlu2 %3215 }
 0x39d   :  { %v2475_v1 = vmul.f32 0.0051020407, %v2396_v61  ;;  %v2123_v14 = vpop.f32.mrf.mxu2  ;;  %v2206_v63 = vpop.f32.mrf.mxu3  ;;  %7513 = vst [vmem:[#allocation26_spill] sm:$0xff] %v6310_v38 }
 0x39e   :  { %v2124_v27 = vadd.f32 %v2123_v14, %v6079_v10  ;;  %2589 = vadd.xlane.f32.xlu2 %v2588_v23  ;;  %2451 = vadd.xlane.f32.xlu1 %v2450_v4  ;;  %v2453_v7 = vsel %vm2384_vm1, %v6294_v5, 0.0 }
 0x39f   :  { %v6298_v8 = vsub.f32 %v7481_v3, %v2475_v1  ;;  %v6301_v19 = vsub.f32 %v6133_v24, %v2475_v1  ;;  %v7514_v24 = vld [vmem:[#allocation46_spill] sm:$0xff] }
 0x3a0   :  { %v2207_v59 = vadd.f32 %v2206_v63, %v2124_v27  ;;  %v2454_v61 = vadd.f32 %v2453_v7, %v7514_v24 }
 0x3a1   :  { %v2543_v0 = vmul.f32 %v6298_v8, %v6298_v8  ;;  %v2544_v30 = vmul.f32 %v6301_v19, %v6301_v19 }
 0x3a2   :  { %v2290_v49 = vadd.f32 %v2289_v44, %v2207_v59 }
 0x3a3   :  { %v2591_v10 = vsel %vm2384_vm1, %v2544_v30, 0.0  ;;  %v2292_v14 = vpop.f32.mrf.mxu0  ;;  %v2375_v55 = vpop.f32.mrf.mxu1 }
 0x3a4   :  { %v2400_v3 = vpop.xlane.xlu1 %2399  ;;  %v2592_v52 = vadd.f32 %v2591_v10, %v2543_v0  ;;  %v6313_v63 = vadd.f32 %v2372_v28, %v2290_v49 }
 0x3a5   :  { %v2476_v27 = vmul.f32 0.0051020407, %v2400_v3  ;;  %v2126_v23 = vpop.f32.mrf.mxu2  ;;  %v2209_v4 = vpop.f32.mrf.mxu3  ;;  %v7515_v3 = vld [vmem:[#allocation14_spill] sm:$0xff] }
 0x3a6   :  { %v2127_v1 = vadd.f32 %v2126_v23, %v6087_v58  ;;  %2593 = vadd.xlane.f32.xlu0 %v2592_v52  ;;  %2455 = vadd.xlane.f32.xlu2 %v2454_v61  ;;  %v2457_v0 = vsel %vm2384_vm1, %v6313_v63, 0.0 }
 0x3a7   :  { %v6317_v44 = vsub.f32 %v7484_v9, %v2476_v27  ;;  %v6320_v59 = vsub.f32 %v6144_v15, %v2476_v27  ;;  %v2458_v9 = vadd.f32 %v2457_v0, %v7515_v3 }
 0x3a8   :  { %v2210_v30 = vadd.f32 %v2209_v4, %v2127_v1 }
 0x3a9   :  { %v2545_v28 = vmul.f32 %v6317_v44, %v6317_v44  ;;  %v2546_v7 = vmul.f32 %v6320_v59, %v6320_v59 }
 0x3aa   :  { %v2293_v58 = vadd.f32 %v2292_v14, %v2210_v30 }
 0x3ab   :  { %v2595_v49 = vsel %vm2384_vm1, %v2546_v7, 0.0  ;;  %v2295_v61 = vpop.f32.mrf.mxu0  ;;  %v2378_v7 = vpop.f32.mrf.mxu1 }
 0x3ac   :  { %v2404_v10 = vpop.xlane.xlu2 %2403  ;;  %v2596_v52 = vadd.f32 %v2595_v49, %v2545_v28  ;;  %v6330_v15 = vadd.f32 %v2375_v55, %v2293_v58 }
 0x3ad   :  { %v2477_v27 = vmul.f32 0.0051020407, %v2404_v10  ;;  %v2129_v23 = vpop.f32.mrf.mxu2  ;;  %v2212_v4 = vpop.f32.mrf.mxu3  ;;  %v7516_v10 = vld [vmem:[#allocation48_spill] sm:$0xff] }
 0x3ae   :  { %v2130_v1 = vadd.f32 %v2129_v23, %v6095_v18  ;;  %2459 = vadd.xlane.f32.xlu0 %v2458_v9  ;;  %2597 = vadd.xlane.f32.xlu1 %v2596_v52  ;;  %v2461_v28 = vsel %vm2384_vm1, %v6330_v15, 0.0 }
 0x3af   :  { %v6334_v38 = vsub.f32 %v7488_v41, %v2477_v27  ;;  %v6337_v14 = vsub.f32 %v6155_v50, %v2477_v27  ;;  %v2462_v9 = vadd.f32 %v2461_v28, %v7516_v10 }
 0x3b0   :  { %v2213_v30 = vadd.f32 %v2212_v4, %v2130_v1 }
 0x3b1   :  { %v2547_v0 = vmul.f32 %v6334_v38, %v6334_v38  ;;  %v2548_v55 = vmul.f32 %v6337_v14, %v6337_v14 }
 0x3b2   :  { %v2296_v18 = vadd.f32 %v2295_v61, %v2213_v30 }
 0x3b3   :  { %v2599_v58 = vsel %vm2384_vm1, %v2548_v55, 0.0  ;;  %v2298_v30 = vpop.f32.mrf.mxu0 }
 0x3b4   :  { %v2408_v49 = vpop.xlane.xlu2 %2407  ;;  %v2600_v41 = vadd.f32 %v2599_v58, %v2547_v0  ;;  %v6347_v50 = vadd.f32 %v2378_v7, %v2296_v18  ;;  %v2381_v18 = vpop.f32.mrf.mxu1 }
 0x3b5   :  { %v2478_v52 = vmul.f32 0.0051020407, %v2408_v49  ;;  %v2132_v27 = vpop.f32.mrf.mxu2  ;;  %v2215_v23 = vpop.f32.mrf.mxu3 }
 0x3b6   :  { %v2133_v4 = vadd.f32 %v2132_v27, %v6103_v31  ;;  %2601 = vadd.xlane.f32.xlu2 %v2600_v41  ;;  %2463 = vadd.xlane.f32.xlu1 %v2462_v9  ;;  %v2465_v28 = vsel %vm2384_vm1, %v6347_v50, 0.0  ;;  %v7517_v41 = vld [vmem:[#allocation49_spill] sm:$0xff] }
 0x3b7   :  { %v6351_v1 = vsub.f32 %v7489_v42, %v2478_v52  ;;  %v6354_v61 = vsub.f32 %v6164_v54, %v2478_v52  ;;  %v2466_v54 = vadd.f32 %v2465_v28, %v7517_v41  ;;  %v7518_v28 = vld [vmem:[#allocation50_spill] sm:$0xff] }
 0x3b8   :  { %v2216_v55 = vadd.f32 %v2215_v23, %v2133_v4 }
 0x3b9   :  { %v2549_v0 = vmul.f32 %v6351_v1, %v6351_v1  ;;  %v2550_v7 = vmul.f32 %v6354_v61, %v6354_v61 }
 0x3ba   :  { %v2299_v31 = vadd.f32 %v2298_v30, %v2216_v55 }
 0x3bb   :  { %v2603_v58 = vsel %vm2384_vm1, %v2550_v7, 0.0 }
 0x3bc   :  { %v2412_v42 = vpop.xlane.xlu0 %2411  ;;  %v2604_v49 = vadd.f32 %v2603_v58, %v2549_v0  ;;  %v6364_v9 = vadd.f32 %v2381_v18, %v2299_v31 }
 0x3bd   :  { %v2479_v52 = vmul.f32 0.0051020407, %v2412_v42 }
 0x3be   :  { %2605 = vadd.xlane.f32.xlu0 %v2604_v49  ;;  %2467 = vadd.xlane.f32.xlu2 %v2466_v54  ;;  %v2469_v4 = vsel %vm2384_vm1, %v6364_v9, 0.0 }
 0x3bf   :  { %v6367_v27 = vsub.f32 %v7490_v57, %v2479_v52  ;;  %v6370_v23 = vsub.f32 %v6170_v26, %v2479_v52  ;;  %v2470_v31 = vadd.f32 %v2469_v4, %v7518_v28 }
 0x3c1   :  { %v2551_v30 = vmul.f32 %v6367_v27, %v6367_v27  ;;  %v2552_v55 = vmul.f32 %v6370_v23, %v6370_v23 }
 0x3c3   :  { %v2607_v0 = vsel %vm2384_vm1, %v2552_v55, 0.0 }
 0x3c4   :  { %v2416_v7 = vpop.xlane.xlu1 %2415  ;;  %v2608_v18 = vadd.f32 %v2607_v0, %v2551_v30 }
 0x3c5   :  { %v2480_v57 = vmul.f32 0.0051020407, %v2416_v7 }
 0x3c6   :  { %2471 = vadd.xlane.f32.xlu0 %v2470_v31  ;;  %2609 = vadd.xlane.f32.xlu1 %v2608_v18 }
 0x3c7   :  { %v6381_v26 = vsub.f32 %v7491_v56, %v2480_v57  ;;  %v6384_v58 = vsub.f32 %v6176_v51, %v2480_v57 }
 0x3c9   :  { %v2553_v42 = vmul.f32 %v6381_v26, %v6381_v26  ;;  %v2554_v49 = vmul.f32 %v6384_v58, %v6384_v58 }
 0x3cb   :  { %v2611_v54 = vsel %vm2384_vm1, %v2554_v49, 0.0 }
 0x3cc   :  { %v2420_v52 = vpop.xlane.xlu2 %2419  ;;  %v2612_v4 = vadd.f32 %v2611_v54, %v2553_v42 }
 0x3cd   :  { %v2481_v30 = vmul.f32 0.0051020407, %v2420_v52 }
 0x3ce   :  { %2613 = vadd.xlane.f32.xlu2 %v2612_v4 }
 0x3cf   :  { %v6392_v55 = vsub.f32 %v7492_v12, %v2481_v30  ;;  %v6395_v56 = vsub.f32 %v6184_v47, %v2481_v30 }
 0x3d1   :  { %v2555_v51 = vmul.f32 %v6392_v55, %v6392_v55  ;;  %v2556_v0 = vmul.f32 %v6395_v56, %v6395_v56 }
 0x3d3   :  { %v2615_v7 = vsel %vm2384_vm1, %v2556_v0, 0.0 }
 0x3d4   :  { %v2424_v31 = vpop.xlane.xlu0 %2423  ;;  %v2616_v18 = vadd.f32 %v2615_v7, %v2555_v51 }
 0x3d5   :  { %v2482_v57 = vmul.f32 0.0051020407, %v2424_v31 }
 0x3d6   :  { %2617 = vadd.xlane.f32.xlu0 %v2616_v18 }
 0x3d7   :  { %v6403_v42 = vsub.f32 %v7494_v29, %v2482_v57  ;;  %v6406_v12 = vsub.f32 %v6194_v48, %v2482_v57 }
 0x3d9   :  { %v2557_v47 = vmul.f32 %v6403_v42, %v6403_v42  ;;  %v2558_v49 = vmul.f32 %v6406_v12, %v6406_v12 }
 0x3db   :  { %v2619_v54 = vsel %vm2384_vm1, %v2558_v49, 0.0 }
 0x3dc   :  { %v2428_v52 = vpop.xlane.xlu1 %2427  ;;  %v2620_v4 = vadd.f32 %v2619_v54, %v2557_v47 }
 0x3dd   :  { %v2483_v30 = vmul.f32 0.0051020407, %v2428_v52 }
 0x3de   :  { %2621 = vadd.xlane.f32.xlu1 %v2620_v4 }
 0x3df   :  { %v6414_v51 = vsub.f32 %v7496_v22, %v2483_v30  ;;  %v6417_v29 = vsub.f32 %v6202_v36, %v2483_v30 }
 0x3e1   :  { %7519 = vst [vmem:[#allocation64_spill] sm:$0xff] %v6414_v51  ;;  %v2559_v48 = vmul.f32 %v6414_v51, %v6414_v51  ;;  %v2560_v0 = vmul.f32 %v6417_v29, %v6417_v29 }
 0x3e2   :  { %7520 = vst [vmem:[#allocation65_spill] sm:$0xff] %v6417_v29 }
 0x3e3   :  { %v2623_v7 = vsel %vm2384_vm1, %v2560_v0, 0.0 }
 0x3e4   :  { %v2432_v31 = vpop.xlane.xlu2 %2431  ;;  %v2624_v18 = vadd.f32 %v2623_v7, %v2559_v48 }
 0x3e5   :  { %v2484_v57 = vmul.f32 0.0051020407, %v2432_v31 }
 0x3e6   :  { %2625 = vadd.xlane.f32.xlu2 %v2624_v18 }
 0x3e7   :  { %v6425_v47 = vsub.f32 %v7498_v45, %v2484_v57  ;;  %v6428_v22 = vsub.f32 %v6212_v35, %v2484_v57 }
 0x3e9   :  { %v2561_v36 = vmul.f32 %v6425_v47, %v6425_v47  ;;  %v2562_v49 = vmul.f32 %v6428_v22, %v6428_v22 }
 0x3eb   :  { %v2627_v54 = vsel %vm2384_vm1, %v2562_v49, 0.0 }
 0x3ec   :  { %v2436_v52 = vpop.xlane.xlu0 %2435  ;;  %v2628_v4 = vadd.f32 %v2627_v54, %v2561_v36 }
 0x3ed   :  { %v2485_v30 = vmul.f32 0.0051020407, %v2436_v52 }
 0x3ee   :  { %2629 = vadd.xlane.f32.xlu0 %v2628_v4 }
 0x3ef   :  { %v6436_v48 = vsub.f32 %v7500_v32, %v2485_v30  ;;  %v6439_v45 = vsub.f32 %v6222_v53, %v2485_v30 }
 0x3f1   :  { %v2563_v35 = vmul.f32 %v6436_v48, %v6436_v48  ;;  %v2564_v0 = vmul.f32 %v6439_v45, %v6439_v45 }
 0x3f3   :  { %v2631_v7 = vsel %vm2384_vm1, %v2564_v0, 0.0 }
 0x3f4   :  { %v2440_v31 = vpop.xlane.xlu1 %2439  ;;  %v2632_v18 = vadd.f32 %v2631_v7, %v2563_v35 }
 0x3f5   :  { %v2486_v57 = vmul.f32 0.0051020407, %v2440_v31 }
 0x3f6   :  { %2633 = vadd.xlane.f32.xlu1 %v2632_v18 }
 0x3f7   :  { %v6447_v36 = vsub.f32 %v7502_v13, %v2486_v57  ;;  %v6450_v32 = vsub.f32 %v6234_v34, %v2486_v57 }
 0x3f9   :  { %7521 = vst [vmem:[#allocation66_spill] sm:$0xff] %v6447_v36  ;;  %v2565_v53 = vmul.f32 %v6447_v36, %v6447_v36  ;;  %v2566_v49 = vmul.f32 %v6450_v32, %v6450_v32 }
 0x3fa   :  { %7522 = vst [vmem:[#allocation29_spill] sm:$0xff] %v6450_v32 }
 0x3fb   :  { %v2635_v54 = vsel %vm2384_vm1, %v2566_v49, 0.0 }
 0x3fc   :  { %v2444_v52 = vpop.xlane.xlu2 %2443  ;;  %v2636_v4 = vadd.f32 %v2635_v54, %v2565_v53 }
 0x3fd   :  { %v2487_v30 = vmul.f32 0.0051020407, %v2444_v52 }
 0x3fe   :  { %2637 = vadd.xlane.f32.xlu2 %v2636_v4 }
 0x3ff   :  { %v6458_v35 = vsub.f32 %v7506_v20, %v2487_v30  ;;  %v6461_v13 = vsub.f32 %v6244_v33, %v2487_v30 }
 0x401   :  { %v2567_v34 = vmul.f32 %v6458_v35, %v6458_v35  ;;  %v2568_v0 = vmul.f32 %v6461_v13, %v6461_v13 }
 0x403   :  { %v2639_v7 = vsel %vm2384_vm1, %v2568_v0, 0.0 }
 0x404   :  { %v2448_v31 = vpop.xlane.xlu0 %2447  ;;  %v2640_v18 = vadd.f32 %v2639_v7, %v2567_v34 }
 0x405   :  { %v2488_v57 = vmul.f32 0.0051020407, %v2448_v31 }
 0x406   :  { %2641 = vadd.xlane.f32.xlu0 %v2640_v18 }
 0x407   :  { %v6469_v53 = vsub.f32 %v7508_v17, %v2488_v57  ;;  %v6472_v20 = vsub.f32 %v6254_v37, %v2488_v57  ;;  %v3529_v37 = vmov 0  }
 0x408   :  { %3433 = vset.pattern.permute.xlu2 %v3529_v37  ;;  %3434 = vset.pattern.permute.xlu0 %v3529_v37 }
 0x409   :  { %v2586_v33 = vpop.xlane.xlu1 %2585  ;;  %v2569_v49 = vmul.f32 %v6469_v53, %v6469_v53  ;;  %v2570_v54 = vmul.f32 %v6472_v20, %v6472_v20  ;;  %3435 = vset.pattern.permute.xlu1 %v3529_v37 }
 0x40a   :  { %v2671_v52 = vmul.f32 0.0051020407, %v2586_v33 }
 0x40b   :  { %v2643_v4 = vsel %vm2384_vm1, %v2570_v54, 0.0 }
 0x40c   :  { %v2715_v30 = vadd.f32 1e-05, %v2671_v52  ;;  %v2644_v34 = vadd.f32 %v2643_v4, %v2569_v49 }
 0x40e   :  { %2645 = vadd.xlane.f32.xlu1 %v2644_v34  ;;  %3439 = vrsqrt.f32 %v2715_v30  ;;  %vm2743_vm3 = vweird.f32 %v2715_v30 }
 0x411   :  { %v2590_v0 = vpop.xlane.xlu2 %2589  ;;  %v2452_v17 = vpop.xlane.xlu1 %2451 }
 0x412   :  { %v2672_v7 = vmul.f32 0.0051020407, %v2590_v0  ;;  %v2489_v31 = vmul.f32 0.0051020407, %v2452_v17 }
 0x414   :  { %v2716_v18 = vadd.f32 1e-05, %v2672_v7  ;;  %v6480_v57 = vsub.f32 %v7512_v60, %v2489_v31  ;;  %v6483_v33 = vsub.f32 %v6275_v6, %v2489_v31  ;;  %v3440_v54 = vpop.eup %3439 }
 0x415   :  { %v2738_v34 = vmul.f32 %v3440_v54, %v2715_v30  ;;  %vm2744_vm2 = vweird.f32 %v3440_v54 }
 0x416   :  { %7523 = vst [vmem:[#allocation68_spill] sm:$0xff] %v6480_v57  ;;  %3441 = vrsqrt.f32 %v2716_v18  ;;  %v2571_v49 = vmul.f32 %v6480_v57, %v6480_v57  ;;  %v2572_v52 = vmul.f32 %v6483_v33, %v6483_v33  ;;  %vm2745_vm4 = vmor %vm2743_vm3, %vm2744_vm2  ;;  %vm2753_vm6 = vweird.f32 %v2716_v18 }
 0x417   :  { %7524 = vst [vmem:[#allocation69_spill] sm:$0xff] %v6483_v33  ;;  %v2739_v57 = vmul.f32 %v3440_v54, %v2738_v34 }
 0x418   :  { %v2647_v4 = vsel %vm2384_vm1, %v2572_v52, 0.0 }
 0x419   :  { %v2456_v0 = vpop.xlane.xlu2 %2455  ;;  %v2594_v17 = vpop.xlane.xlu0 %2593  ;;  %v2648_v7 = vadd.f32 %v2647_v4, %v2571_v49 }
 0x41a   :  { %v2490_v37 = vmul.f32 0.0051020407, %v2456_v0  ;;  %v2673_v60 = vmul.f32 0.0051020407, %v2594_v17  ;;  %v2740_v17 = vmul.f32 0.5, %v2739_v57 }
 0x41b   :  { %2649 = vadd.xlane.f32.xlu2 %v2648_v7 }
 0x41c   :  { %v3442_v32 = vpop.eup %3441  ;;  %v6491_v6 = vsub.f32 %v7514_v24, %v2490_v37  ;;  %v6494_v31 = vsub.f32 %v6294_v5, %v2490_v37  ;;  %v2717_v29 = vadd.f32 1e-05, %v2673_v60  ;;  %v2741_v37 = vsub.f32 1.5, %v2740_v17 }
 0x41d   :  { %v2748_v36 = vmul.f32 %v3442_v32, %v2716_v18  ;;  %vm2754_vm5 = vweird.f32 %v3442_v32 }
 0x41e   :  { %7525 = vst [vmem:[#allocation70_spill] sm:$0xff] %v6491_v6  ;;  %v2573_v52 = vmul.f32 %v6491_v6, %v6491_v6  ;;  %v2574_v33 = vmul.f32 %v6494_v31, %v6494_v31  ;;  %3443 = vrsqrt.f32 %v2717_v29  ;;  %vm2755_vm7 = vmor %vm2753_vm6, %vm2754_vm5  ;;  %vm2763_vm9 = vweird.f32 %v2717_v29 }
 0x41f   :  { %7526 = vst [vmem:[#allocation32_spill] sm:$0xff] %v6494_v31  ;;  %v2749_v7 = vmul.f32 %v3442_v32, %v2748_v36 }
 0x420   :  { %v2651_v49 = vsel %vm2384_vm1, %v2574_v33, 0.0 }
 0x421   :  { %v2460_v4 = vpop.xlane.xlu0 %2459  ;;  %v2652_v0 = vadd.f32 %v2651_v49, %v2573_v52  ;;  %v2750_v60 = vmul.f32 0.5, %v2749_v7  ;;  %v3483_v7 = vld [vmem:[%s6924_s3] sm:$0xff]  ;;  %v2598_v18 = vpop.xlane.xlu1 %2597 }
 0x422   :  { %v2491_v24 = vmul.f32 0.0051020407, %v2460_v4  ;;  %v2742_v4 = vmul.f32 %v3440_v54, %v2741_v37  ;;  %v3484_v37 = vld [vmem:[%s6924_s3 + $0x8] sm:$0xff] }
 0x423   :  { %2653 = vadd.xlane.f32.xlu0 %v2652_v0  ;;  %v2751_v49 = vsub.f32 1.5, %v2750_v60 }
 0x424   :  { %v6502_v5 = vsub.f32 %v7515_v3, %v2491_v24  ;;  %v6505_v34 = vsub.f32 %v6313_v63, %v2491_v24  ;;  %v3444_v52 = vpop.eup %3443  ;;  %v2746_v63 = vsel %vm2745_vm4, %v3440_v54, %v2742_v4 }
 0x425   :  { %v2758_v3 = vmul.f32 %v3444_v52, %v2717_v29  ;;  %v2752_v0 = vmul.f32 %v3442_v32, %v2751_v49  ;;  %v2957_v24 = vmul.f32 %v3483_v7, %v2746_v63  ;;  %vm2764_vm8 = vweird.f32 %v3444_v52 }
 0x426   :  { %7527 = vst [vmem:[#allocation72_spill] sm:$0xff] %v6502_v5  ;;  %v2575_v31 = vmul.f32 %v6502_v5, %v6502_v5  ;;  %v2576_v33 = vmul.f32 %v6505_v34, %v6505_v34  ;;  %vm2765_vm10 = vmor %vm2763_vm9, %vm2764_vm8  ;;  %v3486_v5 = vld [vmem:[%s6924_s3 + $0x18] sm:$0xff] }
 0x427   :  { %7528 = vst [vmem:[#allocation73_spill] sm:$0xff] %v6505_v34  ;;  %v2759_v17 = vmul.f32 %v3444_v52, %v2758_v3 }
 0x428   :  { %v2655_v36 = vsel %vm2384_vm1, %v2576_v33, 0.0  ;;  %v2756_v33 = vsel %vm2755_vm7, %v3442_v32, %v2752_v0  ;;  %v3485_v32 = vld [vmem:[%s6924_s3 + $0x10] sm:$0xff] }
 0x429   :  { %v2656_v57 = vadd.f32 %v2655_v36, %v2575_v31  ;;  %v2760_v31 = vmul.f32 0.5, %v2759_v17  ;;  %v2958_v30 = vmul.f32 %v3484_v37, %v2756_v33  ;;  %v2602_v3 = vpop.xlane.xlu2 %2601  ;;  %v2464_v63 = vpop.xlane.xlu1 %2463  ;;  %v2674_v17 = vmul.f32 0.0051020407, %v2598_v18 }
 0x42a   :  { %v2492_v7 = vmul.f32 0.0051020407, %v2464_v63 }
 0x42b   :  { %2657 = vadd.xlane.f32.xlu1 %v2656_v57  ;;  %v2761_v60 = vsub.f32 1.5, %v2760_v31  ;;  %v6521_v31 = vadd.f32 1e-05, %v2674_v17 }
 0x42c   :  { %v6524_v29 = vsub.f32 %v6330_v15, %v2492_v7 }
 0x42d   :  { %v2762_v54 = vmul.f32 %v3444_v52, %v2761_v60  ;;  %3445 = vrsqrt.f32 %v6521_v31  ;;  %v6530_v60 = vsub.f32 %v7516_v10, %v2492_v7  ;;  %vm2773_vm13 = vweird.f32 %v6521_v31 }
 0x42e   :  { %7529 = vst [vmem:[#allocation74_spill] sm:$0xff] %v6524_v29 }
 0x42f   :  { %v2766_v57 = vsel %vm2765_vm10, %v3444_v52, %v2762_v54  ;;  %7530 = vst [vmem:[#allocation35_spill] sm:$0xff] %v6530_v60  ;;  %v2578_v54 = vmul.f32 %v6524_v29, %v6524_v29  ;;  %v2577_v15 = vmul.f32 %v6530_v60, %v6530_v60 }
 0x430   :  { %v2959_v4 = vmul.f32 %v3485_v32, %v2766_v57 }
 0x431   :  { %v2606_v36 = vpop.xlane.xlu0 %2605  ;;  %v2468_v33 = vpop.xlane.xlu2 %2467  ;;  %v2659_v10 = vsel %vm2384_vm1, %v2578_v54, 0.0 }
 0x432   :  { %v2493_v37 = vmul.f32 0.0051020407, %v2468_v33  ;;  %v2660_v7 = vadd.f32 %v2659_v10, %v2577_v15 }
 0x433   :  { %2981 = vperm.xlu2 %3433, %v2957_v24  }
 0x434   :  { %v6536_v18 = vsub.f32 %v6347_v50, %v2493_v37  ;;  %v6543_v32 = vsub.f32 %v7517_v41, %v2493_v37  ;;  %v2676_v50 = vmul.f32 0.0051020407, %v2606_v36 }
 0x436   :  { %7531 = vst [vmem:[#allocation76_spill] sm:$0xff] %v6536_v18  ;;  %v2580_v63 = vmul.f32 %v6536_v18, %v6536_v18  ;;  %v2579_v41 = vmul.f32 %v6543_v32, %v6543_v32 }
 0x437   :  { %2986 = vperm.xlu0 %3434, %v2958_v30   ;;  %v2675_v30 = vmul.f32 0.0051020407, %v2602_v3  ;;  %7532 = vst [vmem:[#allocation77_spill] sm:$0xff] %v6543_v32  ;;  %v6546_v3 = vpop.eup %3445 }
 0x438   :  { %v2663_v37 = vsel %vm2384_vm1, %v2580_v63, 0.0  ;;  %vm2774_vm11 = vweird.f32 %v6546_v3 }
 0x439   :  { %v2472_v49 = vpop.xlane.xlu0 %2471  ;;  %v6538_v57 = vadd.f32 1e-05, %v2675_v30  ;;  %v6560_v30 = vadd.f32 1e-05, %v2676_v50  ;;  %v2664_v10 = vadd.f32 %v2663_v37, %v2579_v41  ;;  %vm6610_vm14 = vmor %vm2773_vm13, %vm2774_vm11 }
 0x43a   :  { %v2494_v54 = vmul.f32 0.0051020407, %v2472_v49 }
 0x43b   :  { %vm2783_vm3 = vweird.f32 %v6538_v57 }
 0x43c   :  { %v6570_v32 = vsub.f32 %v6364_v9, %v2494_v54  ;;  %v6576_v41 = vsub.f32 %v7518_v28, %v2494_v54 }
 0x43e   :  { %7533 = vst [vmem:[#allocation78_spill] sm:$0xff] %v6570_v32  ;;  %v2582_v9 = vmul.f32 %v6570_v32, %v6570_v32 }
 0x43f   :  { %7534 = vst [vmem:[#allocation5_spill] sm:$0xff] %v6576_v41 }
 0x444   :  { %2991 = vperm.xlu1 %3435, %v2959_v4   ;;  %v2610_v4 = vpop.xlane.xlu1 %2609 }
 0x445   :  { %v2677_v17 = vmul.f32 0.0051020407, %v2610_v4 }
 0x447   :  { %v6562_v18 = vadd.f32 1e-05, %v2677_v17 }
 0x449   :  { %v2618_v0 = vpop.xlane.xlu0 %2617  ;;  %vm2803_vm10 = vweird.f32 %v6562_v18 }
 0x44a   :  { %v2679_v24 = vmul.f32 0.0051020407, %v2618_v0 }
 0x44c   :  { %v6526_v52 = vadd.f32 1e-05, %v2679_v24  ;;  %v2768_v24 = vmul.f32 %v6546_v3, %v6521_v31 }
 0x44e   :  { %3447 = vrsqrt.f32 %v6526_v52  ;;  %v2769_v15 = vmul.f32 %v6546_v3, %v2768_v24  ;;  %vm2823_vm15 = vweird.f32 %v6526_v52 }
 0x44f   :  { %3449 = vrsqrt.f32 %v6538_v57 }
 0x450   :  { %3451 = vrsqrt.f32 %v6560_v30  ;;  %v2770_v24 = vmul.f32 0.5, %v2769_v15 }
 0x451   :  { %v2622_v4 = vpop.xlane.xlu1 %2621  ;;  %3453 = vrsqrt.f32 %v6562_v18 }
 0x452   :  { %v2680_v50 = vmul.f32 0.0051020407, %v2622_v4  ;;  %v2771_v4 = vsub.f32 1.5, %v2770_v24 }
 0x454   :  { %v6550_v0 = vpop.eup %3447  ;;  %v6583_v6 = vadd.f32 1e-05, %v2680_v50 }
 0x455   :  { %v2818_v33 = vmul.f32 %v6550_v0, %v6526_v52  ;;  %v6564_v36 = vpop.eup %3449  ;;  %vm2824_vm12 = vweird.f32 %v6550_v0 }
 0x456   :  { %v2778_v49 = vmul.f32 %v6564_v36, %v6538_v57  ;;  %v6586_v34 = vpop.eup %3451  ;;  %vm6618_vm0 = vmor %vm2823_vm15, %vm2824_vm12  ;;  %vm2784_vm2 = vweird.f32 %v6564_v36  ;;  %vm2793_vm12 = vweird.f32 %v6560_v30 }
 0x457   :  { %v2819_v29 = vmul.f32 %v6550_v0, %v2818_v33  ;;  %v6588_v15 = vpop.eup %3453  ;;  %v2788_v24 = vmul.f32 %v6586_v34, %v6560_v30  ;;  %vm2785_vm5 = vmor %vm2783_vm3, %vm2784_vm2  ;;  %vm2794_vm9 = vweird.f32 %v6586_v34 }
 0x458   :  { %vm2804_vm8 = vweird.f32 %v6588_v15  ;;  %vm6698_vm13 = vmor %vm2793_vm12, %vm2794_vm9 }
 0x459   :  { %v2820_v37 = vmul.f32 0.5, %v2819_v29  ;;  %v2581_v29 = vmul.f32 %v6576_v41, %v6576_v41  ;;  %vm2805_vm11 = vmor %vm2803_vm10, %vm2804_vm8 }
 0x45b   :  { %v2821_v54 = vsub.f32 1.5, %v2820_v37  ;;  %v2772_v37 = vmul.f32 %v6546_v3, %v2771_v4 }
 0x45c   :  { %2661 = vadd.xlane.f32.xlu2 %v2660_v7  ;;  %v2614_v7 = vpop.xlane.xlu2 %2613 }
 0x45d   :  { %v2678_v33 = vmul.f32 0.0051020407, %v2614_v7 }
 0x45f   :  { %v6590_v28 = vadd.f32 1e-05, %v2678_v33  ;;  %v2798_v33 = vmul.f32 %v6588_v15, %v6562_v18 }
 0x461   :  { %2665 = vadd.xlane.f32.xlu0 %v2664_v10  ;;  %v2630_v63 = vpop.xlane.xlu0 %2629  ;;  %v2779_v10 = vmul.f32 %v6564_v36, %v2778_v49  ;;  %vm2813_vm3 = vweird.f32 %v6590_v28 }
 0x462   :  { %v2682_v17 = vmul.f32 0.0051020407, %v2630_v63  ;;  %v2667_v63 = vsel %vm2384_vm1, %v2582_v9, 0.0 }
 0x463   :  { %v2668_v9 = vadd.f32 %v2667_v63, %v2581_v29  ;;  %v2799_v29 = vmul.f32 %v6588_v15, %v2798_v33  ;;  %v2776_v63 = vsel %vm6610_vm14, %v6546_v3, %v2772_v37 }
 0x464   :  { %v6578_v60 = vadd.f32 1e-05, %v2682_v17  ;;  %v2780_v17 = vmul.f32 0.5, %v2779_v10  ;;  %v2626_v49 = vpop.xlane.xlu2 %2625  ;;  %v2822_v10 = vmul.f32 %v6550_v0, %v2821_v54  ;;  %v2960_v3 = vmul.f32 %v3486_v5, %v2776_v63 }
 0x465   :  { %v2800_v37 = vmul.f32 0.5, %v2799_v29 }
 0x466   :  { %3455 = vrsqrt.f32 %v6578_v60  ;;  %v2781_v4 = vsub.f32 1.5, %v2780_v17  ;;  %v2789_v17 = vmul.f32 %v6586_v34, %v2788_v24  ;;  %v2826_v52 = vsel %vm6618_vm0, %v6550_v0, %v2822_v10 }
 0x467   :  { %3457 = vrsqrt.f32 %v6583_v6  ;;  %vm2853_vm6 = vweird.f32 %v6578_v60  ;;  %vm2833_vm0 = vweird.f32 %v6583_v6 }
 0x468   :  { %3459 = vrsqrt.f32 %v6590_v28  ;;  %v2782_v24 = vmul.f32 %v6564_v36, %v2781_v4 }
 0x469   :  { %v2634_v7 = vpop.xlane.xlu1 %2633 }
 0x46a   :  { %v2683_v50 = vmul.f32 0.0051020407, %v2634_v7  ;;  %v2681_v7 = vmul.f32 0.0051020407, %v2626_v49 }
 0x46c   :  { %v6602_v32 = vpop.eup %3455  ;;  %v6615_v51 = vadd.f32 1e-05, %v2683_v50  ;;  %v6632_v50 = vadd.f32 1e-05, %v2681_v7  ;;  %v3487_v7 = vld [vmem:[%s6924_s3 + $0x40] sm:$0xff] }
 0x46d   :  { %v2848_v41 = vmul.f32 %v6602_v32, %v6578_v60  ;;  %v6626_v49 = vpop.eup %3457  ;;  %v2965_v54 = vmul.f32 %v3487_v7, %v2826_v52  ;;  %vm2854_vm4 = vweird.f32 %v6602_v32  ;;  %v2801_v52 = vsub.f32 1.5, %v2800_v37 }
 0x46e   :  { %2669 = vadd.xlane.f32.xlu1 %v2668_v9  ;;  %v6634_v9 = vpop.eup %3459  ;;  %3461 = vrsqrt.f32 %v6615_v51  ;;  %v2828_v0 = vmul.f32 %v6626_v49, %v6583_v6  ;;  %vm6657_vm7 = vmor %vm2853_vm6, %vm2854_vm4  ;;  %vm2834_vm14 = vweird.f32 %v6626_v49  ;;  %vm2843_vm12 = vweird.f32 %v6632_v50 }
 0x46f   :  { %v2849_v31 = vmul.f32 %v6602_v32, %v2848_v41  ;;  %v2808_v63 = vmul.f32 %v6634_v9, %v6590_v28  ;;  %3463 = vrsqrt.f32 %v6632_v50  ;;  %vm2814_vm15 = vweird.f32 %v6634_v9  ;;  %vm6722_vm2 = vmor %vm2833_vm0, %vm2834_vm14 }
 0x470   :  { %v2829_v57 = vmul.f32 %v6626_v49, %v2828_v0  ;;  %v3488_v0 = vld [vmem:[%s6924_s3 + $0x20] sm:$0xff]  ;;  %vm6733_vm4 = vmor %vm2813_vm3, %vm2814_vm15 }
 0x471   :  { %v2850_v33 = vmul.f32 0.5, %v2849_v31  ;;  %v2638_v41 = vpop.xlane.xlu2 %2637  ;;  %v2790_v31 = vmul.f32 0.5, %v2789_v17 }
 0x472   :  { %v2684_v4 = vmul.f32 0.0051020407, %v2638_v41 }
 0x473   :  { %v2851_v10 = vsub.f32 1.5, %v2850_v33  ;;  %v2786_v33 = vsel %vm2785_vm5, %v6564_v36, %v2782_v24 }
 0x474   :  { %2996 = vperm.xlu2 %3433, %v2960_v3   ;;  %v6662_v5 = vpop.eup %3461  ;;  %v2791_v3 = vsub.f32 1.5, %v2790_v31  ;;  %v6668_v7 = vadd.f32 1e-05, %v2684_v4  ;;  %v2961_v36 = vmul.f32 %v3488_v0, %v2786_v33  ;;  %v3489_v31 = vld [vmem:[%s6924_s3 + $0x58] sm:$0xff]  ;;  %v2802_v4 = vmul.f32 %v6588_v15, %v2801_v52 }
 0x475   :  { %3021 = vperm.xlu0 %3434, %v2965_v54   ;;  %v2852_v29 = vmul.f32 %v6602_v32, %v2851_v10  ;;  %v2809_v10 = vmul.f32 %v6634_v9, %v2808_v63  ;;  %v6674_v24 = vpop.eup %3463  ;;  %v2830_v54 = vmul.f32 0.5, %v2829_v57  ;;  %vm2864_vm5 = vweird.f32 %v6662_v5 }
 0x476   :  { %3465 = vrsqrt.f32 %v6668_v7  ;;  %v2792_v57 = vmul.f32 %v6586_v34, %v2791_v3  ;;  %v2838_v33 = vmul.f32 %v6674_v24, %v6632_v50  ;;  %v2806_v18 = vsel %vm2805_vm11, %v6588_v15, %v2802_v4  ;;  %v3496_v50 = vld [vmem:[%s6924_s3 + $0x50] sm:$0xff] }
 0x477   :  { %v2856_v41 = vsel %vm6657_vm7, %v6602_v32, %v2852_v29  ;;  %v2858_v32 = vmul.f32 %v6662_v5, %v6615_v51  ;;  %v2810_v17 = vmul.f32 0.5, %v2809_v10  ;;  %v2831_v52 = vsub.f32 1.5, %v2830_v54 }
 0x478   :  { %v2968_v63 = vmul.f32 %v3489_v31, %v2856_v41  ;;  %v2839_v0 = vmul.f32 %v6674_v24, %v2838_v33  ;;  %vm2863_vm7 = vweird.f32 %v6615_v51  ;;  %vm2844_vm10 = vweird.f32 %v6674_v24 }
 0x479   :  { %v2642_v60 = vpop.xlane.xlu0 %2641  ;;  %v2859_v41 = vmul.f32 %v6662_v5, %v2858_v32  ;;  %v2811_v3 = vsub.f32 1.5, %v2810_v17  ;;  %v2832_v31 = vmul.f32 %v6626_v49, %v2831_v52  ;;  %vm6747_vm8 = vmor %vm2863_vm7, %vm2864_vm5  ;;  %vm2873_vm3 = vweird.f32 %v6668_v7 }
 0x47a   :  { %v2685_v37 = vmul.f32 0.0051020407, %v2642_v60  ;;  %v2840_v52 = vmul.f32 0.5, %v2839_v0 }
 0x47b   :  { %v2860_v32 = vmul.f32 0.5, %v2859_v41  ;;  %v2812_v33 = vmul.f32 %v6634_v9, %v2811_v3  ;;  %v2836_v6 = vsel %vm6722_vm2, %v6626_v49, %v2832_v31 }
 0x47c   :  { %v6683_v29 = vadd.f32 1e-05, %v2685_v37  ;;  %3001 = vperm.xlu2 %3433, %v2961_v36   ;;  %v2796_v37 = vsel %vm6698_vm13, %v6586_v34, %v2792_v57  ;;  %v3490_v36 = vld [vmem:[%s6924_s3 + $0x30] sm:$0xff]  ;;  %v6709_v54 = vpop.eup %3465  ;;  %v3491_v34 = vld [vmem:[%s6924_s3 + $0x28] sm:$0xff]  ;;  %vm2845_vm13 = vmor %vm2843_vm12, %vm2844_vm10 }
 0x47d   :  { %3036 = vperm.xlu0 %3434, %v2968_v63   ;;  %v2963_v15 = vmul.f32 %v3490_v36, %v2806_v18  ;;  %v2962_v17 = vmul.f32 %v3491_v34, %v2796_v37  ;;  %v2868_v18 = vmul.f32 %v6709_v54, %v6668_v7  ;;  %v2861_v10 = vsub.f32 1.5, %v2860_v32  ;;  %v3492_v36 = vld [vmem:[%s6924_s3 + $0x48] sm:$0xff] }
 0x47e   :  { %3467 = vrsqrt.f32 %v6683_v29  ;;  %v2816_v0 = vsel %vm6733_vm4, %v6634_v9, %v2812_v33  ;;  %vm2883_vm9 = vweird.f32 %v6683_v29  ;;  %vm2874_vm0 = vweird.f32 %v6709_v54  ;;  %v3498_v7 = vld [vmem:[%s6924_s3 + $0x68] sm:$0xff] }
 0x47f   :  { %v2869_v28 = vmul.f32 %v6709_v54, %v2868_v18  ;;  %v2862_v32 = vmul.f32 %v6662_v5, %v2861_v10  ;;  %vm2875_vm4 = vmor %vm2873_vm3, %vm2874_vm0 }
 0x481   :  { %v2646_v60 = vpop.xlane.xlu1 %2645  ;;  %v2870_v41 = vmul.f32 0.5, %v2869_v28 }
 0x482   :  { %v2686_v30 = vmul.f32 0.0051020407, %v2646_v60 }
 0x483   :  { %v2871_v28 = vsub.f32 1.5, %v2870_v41 }
 0x484   :  { %v3468_v63 = vpop.eup %3467  ;;  %v6713_v4 = vadd.f32 1e-05, %v2686_v30  ;;  %3011 = vperm.xlu2 %3433, %v2963_v15   ;;  %v2841_v30 = vsub.f32 1.5, %v2840_v52  ;;  %v2966_v15 = vmul.f32 %v3492_v36, %v2836_v6  ;;  %v3494_v6 = vld [vmem:[%s6924_s3 + $0x70] sm:$0xff] }
 0x485   :  { %v2878_v57 = vmul.f32 %v3468_v63, %v6683_v29  ;;  %vm2884_vm6 = vweird.f32 %v3468_v63  ;;  %v2866_v29 = vsel %vm6747_vm8, %v6662_v5, %v2862_v32 }
 0x486   :  { %3469 = vrsqrt.f32 %v6713_v4  ;;  %vm2885_vm11 = vmor %vm2883_vm9, %vm2884_vm6  ;;  %v2842_v52 = vmul.f32 %v6674_v24, %v2841_v30  ;;  %vm2893_vm15 = vweird.f32 %v6713_v4 }
 0x487   :  { %v2879_v60 = vmul.f32 %v3468_v63, %v2878_v57  ;;  %3006 = vperm.xlu1 %3435, %v2962_v17   ;;  %v3493_v17 = vld [vmem:[%s6924_s3 + $0x38] sm:$0xff] }
 0x488   :  { %v2964_v57 = vmul.f32 %v3493_v17, %v2816_v0  ;;  %v2846_v36 = vsel %vm2845_vm13, %v6674_v24, %v2842_v52 }
 0x489   :  { %v2880_v37 = vmul.f32 0.5, %v2879_v60 }
 0x48b   :  { %v2881_v49 = vsub.f32 1.5, %v2880_v37 }
 0x48c   :  { %v3470_v31 = vpop.eup %3469  ;;  %3026 = vperm.xlu2 %3433, %v2966_v15   ;;  %v2967_v15 = vmul.f32 %v3496_v50, %v2846_v36  ;;  %v3499_v50 = vld [vmem:[%s6924_s3 + $0x80] sm:$0xff] }
 0x48d   :  { %v2888_v34 = vmul.f32 %v3470_v31, %v6713_v4  ;;  %v2882_v33 = vmul.f32 %v3468_v63, %v2881_v49  ;;  %vm2894_vm14 = vweird.f32 %v3470_v31 }
 0x48e   :  { %v2650_v51 = vpop.xlane.xlu2 %2649  ;;  %vm6774_vm2 = vmor %vm2893_vm15, %vm2894_vm14 }
 0x48f   :  { %v2889_v18 = vmul.f32 %v3470_v31, %v2888_v34  ;;  %v2687_v10 = vmul.f32 0.0051020407, %v2650_v51  ;;  %3016 = vperm.xlu1 %3435, %v2964_v57   ;;  %v2886_v60 = vsel %vm2885_vm11, %v3468_v63, %v2882_v33  ;;  %v3495_v63 = vld [vmem:[%s6924_s3 + $0x60] sm:$0xff]  ;;  %v2872_v34 = vmul.f32 %v6709_v54, %v2871_v28 }
 0x490   :  { %v2971_v3 = vmul.f32 %v3494_v6, %v2886_v60  ;;  %v2969_v30 = vmul.f32 %v3495_v63, %v2866_v29 }
 0x491   :  { %v2890_v37 = vmul.f32 0.5, %v2889_v18  ;;  %v2731_v0 = vadd.f32 1e-05, %v2687_v10 }
 0x492   :  { %3051 = vperm.xlu0 %3434, %v2971_v3  }
 0x493   :  { %v2891_v5 = vsub.f32 1.5, %v2890_v37  ;;  %3471 = vrsqrt.f32 %v2731_v0  ;;  %vm2903_vm6 = vweird.f32 %v2731_v0 }
 0x494   :  { %3041 = vperm.xlu2 %3433, %v2969_v30  }
 0x495   :  { %v2892_v49 = vmul.f32 %v3470_v31, %v2891_v5 }
 0x496   :  { %v2654_v9 = vpop.xlane.xlu0 %2653  ;;  %v2982_v24 = vpop.permute.xlu2 %2981 }
 0x497   :  { %v2688_v17 = vmul.f32 0.0051020407, %v2654_v9  ;;  %v3089_v57 = vmul.f32 %v2982_v24, %v6260_v40  ;;  %v3090_v4 = vmul.f32 %v2982_v24, %v6263_v21  ;;  %3031 = vperm.xlu1 %3435, %v2967_v15   ;;  %v2896_v33 = vsel %vm6774_vm2, %v3470_v31, %v2892_v49  ;;  %v3497_v40 = vld [vmem:[%s6924_s3 + $0x78] sm:$0xff] }
 0x498   :  { %v2972_v60 = vmul.f32 %v3497_v40, %v2896_v33  ;;  %v2876_v21 = vsel %vm2875_vm4, %v6709_v54, %v2872_v34 }
 0x499   :  { %v3472_v41 = vpop.eup %3471  ;;  %v2732_v51 = vadd.f32 1e-05, %v2688_v17  ;;  %v3243_v52 = vadd.f32 %v6190_v2, %v3089_v57  ;;  %v3244_v18 = vadd.f32 %v6190_v2, %v3090_v4  ;;  %v2970_v29 = vmul.f32 %v3498_v7, %v2876_v21 }
 0x49a   :  { %v2898_v10 = vmul.f32 %v3472_v41, %v2731_v0  ;;  %vm2904_vm5 = vweird.f32 %v3472_v41 }
 0x49b   :  { %3473 = vrsqrt.f32 %v2732_v51  ;;  %3287 = vst [vmem:[#allocation2] sm:$0xff] %v3243_v52  ;;  %vm2905_vm7 = vmor %vm2903_vm6, %vm2904_vm5  ;;  %vm2913_vm9 = vweird.f32 %v2732_v51 }
 0x49c   :  { %v2899_v31 = vmul.f32 %v3472_v41, %v2898_v10  ;;  %3288 = vst.msk [vmem:[#allocation2 + $0x8] sm:$0xff] %vm2384_vm1, %v3244_v18  ;;  %3056 = vperm.xlu2 %3433, %v2972_v60   ;;  %v3500_v10 = vld [vmem:[%s6924_s3 + $0x88] sm:$0xff] }
 0x49e   :  { %v2900_v2 = vmul.f32 0.5, %v2899_v31  ;;  %v2658_v6 = vpop.xlane.xlu1 %2657 }
 0x49f   :  { %v2689_v3 = vmul.f32 0.0051020407, %v2658_v6  ;;  %3046 = vperm.xlu1 %3435, %v2970_v29  }
 0x4a0   :  { %v2901_v37 = vsub.f32 1.5, %v2900_v2 }
 0x4a1   :  { %v3474_v28 = vpop.eup %3473  ;;  %v2733_v63 = vadd.f32 1e-05, %v2689_v3 }
 0x4a2   :  { %v2908_v54 = vmul.f32 %v3474_v28, %v2732_v51  ;;  %v2902_v30 = vmul.f32 %v3472_v41, %v2901_v37  ;;  %vm2914_vm8 = vweird.f32 %v3474_v28 }
 0x4a3   :  { %3475 = vrsqrt.f32 %v2733_v63  ;;  %vm2915_vm10 = vmor %vm2913_vm9, %vm2914_vm8  ;;  %vm2923_vm12 = vweird.f32 %v2733_v63 }
 0x4a4   :  { %v2909_v36 = vmul.f32 %v3474_v28, %v2908_v54  ;;  %v2906_v5 = vsel %vm2905_vm7, %v3472_v41, %v2902_v30 }
 0x4a5   :  { %v2973_v15 = vmul.f32 %v3499_v50, %v2906_v5 }
 0x4a6   :  { %v2910_v49 = vmul.f32 0.5, %v2909_v36 }
 0x4a7   :  { %3061 = vperm.xlu1 %3435, %v2973_v15  }
 0x4a8   :  { %v2911_v32 = vsub.f32 1.5, %v2910_v49 }
 0x4a9   :  { %v3476_v9 = vpop.eup %3475  ;;  %v2987_v24 = vpop.permute.xlu0 %2986 }
 0x4aa   :  { %v2918_v34 = vmul.f32 %v3476_v9, %v2733_v63  ;;  %v3091_v0 = vmul.f32 %v2987_v24, %v6279_v11  ;;  %v3092_v17 = vmul.f32 %v2987_v24, %v6282_v39  ;;  %v2912_v57 = vmul.f32 %v3474_v28, %v2911_v32 }
 0x4ab   :  { %vm2924_vm11 = vweird.f32 %v3476_v9 }
 0x4ac   :  { %v2919_v4 = vmul.f32 %v3476_v9, %v2918_v34  ;;  %v3245_v33 = vadd.f32 %v6182_v46, %v3091_v0  ;;  %v3246_v41 = vadd.f32 %v6182_v46, %v3092_v17  ;;  %v2916_v52 = vsel %vm2915_vm10, %v3474_v28, %v2912_v57  ;;  %vm2925_vm13 = vmor %vm2923_vm12, %vm2924_vm11  ;;  %v3501_v46 = vld [vmem:[%s6924_s3 + $0x90] sm:$0xff] }
 0x4ad   :  { %v2974_v40 = vmul.f32 %v3500_v10, %v2916_v52 }
 0x4ae   :  { %v2920_v18 = vmul.f32 0.5, %v2919_v4  ;;  %3289 = vst [vmem:[#allocation2 + $0x10] sm:$0xff] %v3245_v33  ;;  %v6825_v33 = vld [vmem:[%s6924_s3 + $0x98] sm:$0xff] }
 0x4af   :  { %3290 = vst.msk [vmem:[#allocation2 + $0x18] sm:$0xff] %vm2384_vm1, %v3246_v41  ;;  %3066 = vperm.xlu0 %3434, %v2974_v40  }
 0x4b0   :  { %v2921_v11 = vsub.f32 1.5, %v2920_v18 }
 0x4b2   :  { %v2922_v39 = vmul.f32 %v3476_v9, %v2921_v11 }
 0x4b4   :  { %v2926_v51 = vsel %vm2925_vm13, %v3476_v9, %v2922_v39 }
 0x4b5   :  { %v2975_v60 = vmul.f32 %v3501_v46, %v2926_v51 }
 0x4b6   :  { %v2992_v21 = vpop.permute.xlu1 %2991 }
 0x4b7   :  { %v3093_v31 = vmul.f32 %v2992_v21, %v6298_v8  ;;  %v3094_v7 = vmul.f32 %v2992_v21, %v6301_v19  ;;  %3071 = vperm.xlu2 %3433, %v2975_v60   ;;  %v2713_v60 = vld [vmem:[%s6924_s3 + $0xa0] sm:$0xff] }
 0x4b9   :  { %v3247_v29 = vadd.f32 %v6220_v43, %v3093_v31  ;;  %v3248_v2 = vadd.f32 %v6220_v43, %v3094_v7 }
 0x4bb   :  { %3291 = vst [vmem:[#allocation2 + $0x20] sm:$0xff] %v3247_v29  ;;  %v7551_v29 = vld [vmem:[#allocation17_spill] sm:$0xff] }
 0x4bc   :  { %3292 = vst.msk [vmem:[#allocation2 + $0x28] sm:$0xff] %vm2384_vm1, %v3248_v2 }
 0x4cf   :  { %v2662_v6 = vpop.xlane.xlu2 %2661 }
 0x4d0   :  { %v2690_v3 = vmul.f32 0.0051020407, %v2662_v6 }
 0x4d2   :  { %v2734_v37 = vadd.f32 1e-05, %v2690_v3 }
 0x4d4   :  { %3477 = vrsqrt.f32 %v2734_v37  ;;  %v2666_v28 = vpop.xlane.xlu0 %2665  ;;  %vm2933_vm15 = vweird.f32 %v2734_v37 }
 0x4d5   :  { %v2691_v63 = vmul.f32 0.0051020407, %v2666_v28 }
 0x4d7   :  { %v2735_v54 = vadd.f32 1e-05, %v2691_v63  ;;  %v2997_v30 = vpop.permute.xlu2 %2996 }
 0x4d8   :  { %v3095_v8 = vmul.f32 %v2997_v30, %v6317_v44  ;;  %v3096_v19 = vmul.f32 %v2997_v30, %v6320_v59 }
 0x4d9   :  { %3479 = vrsqrt.f32 %v2735_v54  ;;  %vm2943_vm3 = vweird.f32 %v2735_v54 }
 0x4da   :  { %v3478_v36 = vpop.eup %3477  ;;  %v3249_v5 = vadd.f32 %v6200_v25, %v3095_v8  ;;  %v3250_v43 = vadd.f32 %v6200_v25, %v3096_v19  ;;  %v7552_v8 = vmov 1  }
 0x4db   :  { %v2928_v50 = vmul.f32 %v3478_v36, %v2734_v37  ;;  %vm2934_vm14 = vweird.f32 %v3478_v36 }
 0x4dc   :  { %3293 = vst [vmem:[#allocation2 + $0x30] sm:$0xff] %v3249_v5  ;;  %vm2935_vm0 = vmor %vm2933_vm15, %vm2934_vm14 }
 0x4dd   :  { %v2929_v15 = vmul.f32 %v3478_v36, %v2928_v50  ;;  %3294 = vst.msk [vmem:[#allocation2 + $0x38] sm:$0xff] %vm2384_vm1, %v3250_v43  ;;  %v7554_v50 = vld [vmem:[#allocation52_spill] sm:$0xff] }
 0x4df   :  { %v3480_v49 = vpop.eup %3479  ;;  %v2930_v32 = vmul.f32 0.5, %v2929_v15  ;;  %v3002_v9 = vpop.permute.xlu2 %3001 }
 0x4e0   :  { %v2938_v24 = vmul.f32 %v3480_v49, %v2735_v54  ;;  %v3097_v34 = vmul.f32 %v3002_v9, %v6334_v38  ;;  %v3098_v44 = vmul.f32 %v3002_v9, %v6337_v14  ;;  %vm2944_vm2 = vweird.f32 %v3480_v49 }
 0x4e1   :  { %v2931_v59 = vsub.f32 1.5, %v2930_v32  ;;  %v2670_v0 = vpop.xlane.xlu1 %2669  ;;  %vm2945_vm4 = vmor %vm2943_vm3, %vm2944_vm2 }
 0x4e2   :  { %v2939_v17 = vmul.f32 %v3480_v49, %v2938_v24  ;;  %v3251_v57 = vadd.f32 %v6232_v16, %v3097_v34  ;;  %v3252_v25 = vadd.f32 %v6232_v16, %v3098_v44  ;;  %v2692_v4 = vmul.f32 0.0051020407, %v2670_v0 }
 0x4e3   :  { %v2932_v41 = vmul.f32 %v3478_v36, %v2931_v59  ;;  %v7555_v59 = vld [vmem:[#allocation54_spill] sm:$0xff] }
 0x4e4   :  { %v2940_v38 = vmul.f32 0.5, %v2939_v17  ;;  %3295 = vst [vmem:[#allocation2 + $0x40] sm:$0xff] %v3251_v57  ;;  %v2736_v14 = vadd.f32 1e-05, %v2692_v4  ;;  %v7556_v4 = vld [vmem:[#allocation53_spill] sm:$0xff] }
 0x4e5   :  { %3296 = vst.msk [vmem:[#allocation2 + $0x48] sm:$0xff] %vm2384_vm1, %v3252_v25  ;;  %v2936_v52 = vsel %vm2935_vm0, %v3478_v36, %v2932_v41  ;;  %v7553_v36 = vld [vmem:[#allocation56_spill] sm:$0xff] }
 0x4e6   :  { %v2941_v18 = vsub.f32 1.5, %v2940_v38  ;;  %3481 = vrsqrt.f32 %v2736_v14  ;;  %v2976_v10 = vmul.f32 %v2936_v52, %v6825_v33  ;;  %vm2953_vm6 = vweird.f32 %v2736_v14 }
 0x4e7   :  { %v3022_v16 = vpop.permute.xlu0 %3021  ;;  %v3012_v40 = vpop.permute.xlu2 %3011 }
 0x4e8   :  { %v3105_v11 = vmul.f32 %v3022_v16, %v6392_v55  ;;  %v3106_v39 = vmul.f32 %v3022_v16, %v6395_v56  ;;  %v3101_v51 = vmul.f32 %v3012_v40, %v6367_v27  ;;  %v3102_v46 = vmul.f32 %v3012_v40, %v6370_v23  ;;  %3076 = vperm.xlu1 %3435, %v2976_v10   ;;  %v7558_v40 = vld [vmem:[#allocation58_spill] sm:$0xff] }
 0x4e9   :  { %v2942_v21 = vmul.f32 %v3480_v49, %v2941_v18 }
 0x4ea   :  { %v3259_v31 = vadd.f32 %v6224_v62, %v3105_v11  ;;  %v3260_v7 = vadd.f32 %v6224_v62, %v3106_v39  ;;  %v3255_v55 = vadd.f32 %v7551_v29, %v3101_v51  ;;  %v3256_v56 = vadd.f32 %v7551_v29, %v3102_v46  ;;  %v7562_v29 = vld [vmem:[#allocation60_spill] sm:$0xff] }
 0x4eb   :  { %v2946_v2 = vsel %vm2945_vm4, %v3480_v49, %v2942_v21 }
 0x4ec   :  { %v3482_v27 = vpop.eup %3481  ;;  %3303 = vst [vmem:[#allocation2 + $0x80] sm:$0xff] %v3259_v31  ;;  %v2977_v23 = vmul.f32 %v2946_v2, %v2713_v60  ;;  %v7561_v31 = vld [vmem:[#allocation65_spill] sm:$0xff]  ;;  %v7563_v2 = vld [vmem:[#allocation72_spill] sm:$0xff] }
 0x4ed   :  { %v2948_v6 = vmul.f32 %v3482_v27, %v2736_v14  ;;  %3304 = vst.msk [vmem:[#allocation2 + $0x88] sm:$0xff] %vm2384_vm1, %v3260_v7  ;;  %vm2954_vm5 = vweird.f32 %v3482_v27 }
 0x4ee   :  { %3299 = vst [vmem:[#allocation2 + $0x60] sm:$0xff] %v3255_v55  ;;  %3081 = vperm.xlu0 %3434, %v2977_v23   ;;  %vm2955_vm7 = vmor %vm2953_vm6, %vm2954_vm5  ;;  %v7564_v23 = vld [vmem:[#allocation73_spill] sm:$0xff] }
 0x4ef   :  { %v2949_v3 = vmul.f32 %v3482_v27, %v2948_v6  ;;  %3300 = vst.msk [vmem:[#allocation2 + $0x68] sm:$0xff] %vm2384_vm1, %v3256_v56  ;;  %v3037_v37 = vpop.permute.xlu0 %3036  ;;  %v3027_v28 = vpop.permute.xlu2 %3026 }
 0x4f0   :  { %v3111_v62 = vmul.f32 %v3037_v37, %v6425_v47  ;;  %v3112_v63 = vmul.f32 %v3037_v37, %v6428_v22  ;;  %v3107_v54 = vmul.f32 %v3027_v28, %v6403_v42  ;;  %v3108_v30 = vmul.f32 %v3027_v28, %v6406_v12  ;;  %3437 = vset.pattern.permute.xlu1 %v7552_v8  ;;  %v2714_v42 = vld [vmem:[%s6924_s3 + $0xa8] sm:$0xff]  ;;  %v7566_v28 = vld [vmem:[#allocation29_spill] sm:$0xff]  ;;  %s3530_s3 = smov [#allocation2]  }
 0x4f1   :  { %v2950_v19 = vmul.f32 0.5, %v2949_v3  ;;  %3235 = vperm.xlu1 %3437, %v2713_v60   ;;  %v7560_v60 = vld [vmem:[#allocation64_spill] sm:$0xff]  ;;  %v7565_v3 = vld [vmem:[#allocation66_spill] sm:$0xff]  ;;  %s3335_s18 = sshll.u32 %s3530_s3, 4  ;;  %s3336_s18 = int_to_ptr.vmem [resolvable:$true] %s3335_s18 }
 0x4f2   :  { %v3265_v5 = vadd.f32 %v7553_v36, %v3111_v62  ;;  %v3266_v43 = vadd.f32 %v7553_v36, %v3112_v63  ;;  %v3261_v15 = vadd.f32 %v7554_v50, %v3107_v54  ;;  %v3262_v32 = vadd.f32 %v7554_v50, %v3108_v30  ;;  %v7567_v63 = vld [vmem:[#allocation57_spill] sm:$0xff] }
 0x4f3   :  { %v2951_v49 = vsub.f32 1.5, %v2950_v19 }
 0x4f4   :  { %3309 = vst [vmem:[#allocation2 + $0xb0] sm:$0xff] %v3265_v5 }
 0x4f5   :  { %3310 = vst.msk [vmem:[#allocation2 + $0xb8] sm:$0xff] %vm2384_vm1, %v3266_v43  ;;  %v2952_v12 = vmul.f32 %v3482_v27, %v2951_v49  ;;  %v7569_v43 = vld [vmem:[#allocation68_spill] sm:$0xff] }
 0x4f6   :  { %3305 = vst [vmem:[#allocation2 + $0x90] sm:$0xff] %v3261_v15  ;;  %3438 = vset.pattern.permute.xlu0 %v7552_v8  ;;  %v7570_v15 = vld [vmem:[#allocation69_spill] sm:$0xff] }
 0x4f7   :  { %3306 = vst.msk [vmem:[#allocation2 + $0x98] sm:$0xff] %vm2384_vm1, %v3262_v32  ;;  %3240 = vperm.xlu0 %3438, %v2714_v42   ;;  %v2956_v47 = vsel %vm2955_vm7, %v3482_v27, %v2952_v12  ;;  %v3042_v22 = vpop.permute.xlu2 %3041  ;;  %v7571_v32 = vld [vmem:[#allocation26_spill] sm:$0xff] }
 0x4f8   :  { %v2978_v9 = vmul.f32 %v2956_v47, %v2714_v42  ;;  %v3113_v24 = vmul.f32 %v3042_v22, %v6436_v48  ;;  %v3114_v34 = vmul.f32 %v3042_v22, %v6439_v45  ;;  %v7572_v22 = vld [vmem:[#allocation70_spill] sm:$0xff] }
 0x4f9   :  { %v3007_v44 = vpop.permute.xlu1 %3006 }
 0x4fa   :  { %v3267_v0 = vadd.f32 %v7555_v59, %v3113_v24  ;;  %v3268_v17 = vadd.f32 %v7555_v59, %v3114_v34  ;;  %v3099_v57 = vmul.f32 %v3007_v44, %v6351_v1  ;;  %v3100_v25 = vmul.f32 %v3007_v44, %v6354_v61  ;;  %3086 = vperm.xlu2 %3433, %v2978_v9   ;;  %v7557_v1 = vld [vmem:[#allocation20_spill] sm:$0xff]  ;;  %v7574_v44 = vld [vmem:[#allocation61_spill] sm:$0xff] }
 0x4fb   :  { %v7573_v24 = vld [vmem:[#allocation32_spill] sm:$0xff] }
 0x4fc   :  { %3311 = vst [vmem:[#allocation2 + $0xc0] sm:$0xff] %v3267_v0  ;;  %v3253_v41 = vadd.f32 %v7556_v4, %v3099_v57  ;;  %v3254_v38 = vadd.f32 %v7556_v4, %v3100_v25  ;;  %v7575_v25 = vld [vmem:[#allocation35_spill] sm:$0xff] }
 0x4fd   :  { %3312 = vst.msk [vmem:[#allocation2 + $0xc8] sm:$0xff] %vm2384_vm1, %v3268_v17 }
 0x4fe   :  { %3297 = vst [vmem:[#allocation2 + $0x50] sm:$0xff] %v3253_v41  ;;  %v7576_v41 = vld [vmem:[#allocation74_spill] sm:$0xff] }
 0x4ff   :  { %3298 = vst.msk [vmem:[#allocation2 + $0x58] sm:$0xff] %vm2384_vm1, %v3254_v38  ;;  %v3057_v48 = vpop.permute.xlu2 %3056 }
 0x500   :  { %v3119_v45 = vmul.f32 %v3057_v48, %v6469_v53  ;;  %v3120_v14 = vmul.f32 %v3057_v48, %v6472_v20 }
 0x501   :  { %v3017_v52 = vpop.permute.xlu1 %3016 }
 0x502   :  { %v3273_v18 = vadd.f32 %v7557_v1, %v3119_v45  ;;  %v3274_v61 = vadd.f32 %v7557_v1, %v3120_v14  ;;  %v3103_v10 = vmul.f32 %v3017_v52, %v6381_v26  ;;  %v3104_v16 = vmul.f32 %v3017_v52, %v6384_v58  ;;  %3436 = vset.pattern.permute.xlu2 %v7552_v8  ;;  %v7559_v26 = vld [vmem:[#allocation23_spill] sm:$0xff]  ;;  %v7568_v8 = vld [vmem:[#allocation62_spill] sm:$0xff]  ;;  %v7577_v1 = vld [vmem:[#allocation77_spill] sm:$0xff] }
 0x503   :  { %3230 = vperm.xlu2 %3436, %v6825_v33  }
 0x504   :  { %3317 = vst [vmem:[#allocation2 + $0xf0] sm:$0xff] %v3273_v18  ;;  %v3257_v11 = vadd.f32 %v7558_v40, %v3103_v10  ;;  %v3258_v53 = vadd.f32 %v7558_v40, %v3104_v16  ;;  %v3052_v39 = vpop.permute.xlu0 %3051 }
 0x505   :  { %3318 = vst.msk [vmem:[#allocation2 + $0xf8] sm:$0xff] %vm2384_vm1, %v3274_v61  ;;  %v3117_v20 = vmul.f32 %v3052_v39, %v6458_v35  ;;  %v3118_v51 = vmul.f32 %v3052_v39, %v6461_v13  ;;  %v7578_v61 = vld [vmem:[#allocation76_spill] sm:$0xff] }
 0x506   :  { %3301 = vst [vmem:[#allocation2 + $0x70] sm:$0xff] %v3257_v11 }
 0x507   :  { %3302 = vst.msk [vmem:[#allocation2 + $0x78] sm:$0xff] %vm2384_vm1, %v3258_v53  ;;  %v3271_v58 = vadd.f32 %v7559_v26, %v3117_v20  ;;  %v3272_v46 = vadd.f32 %v7559_v26, %v3118_v51  ;;  %v7579_v53 = vld [vmem:[#allocation5_spill] sm:$0xff]  ;;  %v7580_v20 = vld [vmem:[#allocation78_spill] sm:$0xff] }
 0x509   :  { %3315 = vst [vmem:[#allocation2 + $0xe0] sm:$0xff] %v3271_v58  ;;  %v3032_v33 = vpop.permute.xlu1 %3031 }
 0x50a   :  { %3316 = vst.msk [vmem:[#allocation2 + $0xe8] sm:$0xff] %vm2384_vm1, %v3272_v46  ;;  %v3109_v21 = vmul.f32 %v3032_v33, %v7560_v60  ;;  %v3110_v7 = vmul.f32 %v3032_v33, %v7561_v31 }
 0x50c   :  { %v3263_v55 = vadd.f32 %v7562_v29, %v3109_v21  ;;  %v3264_v35 = vadd.f32 %v7562_v29, %v3110_v7 }
 0x50e   :  { %3307 = vst [vmem:[#allocation2 + $0xa0] sm:$0xff] %v3263_v55 }
 0x50f   :  { %3308 = vst.msk [vmem:[#allocation2 + $0xa8] sm:$0xff] %vm2384_vm1, %v3264_v35 }
 0x511   :  { %v3072_v13 = vpop.permute.xlu2 %3071  ;;  %v3047_v56 = vpop.permute.xlu1 %3046 }
 0x512   :  { %v3125_v27 = vmul.f32 %v3072_v13, %v7563_v2  ;;  %v3126_v6 = vmul.f32 %v3072_v13, %v7564_v23  ;;  %v3115_v37 = vmul.f32 %v3047_v56, %v7565_v3  ;;  %v3116_v62 = vmul.f32 %v3047_v56, %v7566_v28 }
 0x514   :  { %v3279_v54 = vadd.f32 %v7567_v63, %v3125_v27  ;;  %v3280_v30 = vadd.f32 %v7567_v63, %v3126_v6  ;;  %v3269_v19 = vadd.f32 %v7568_v8, %v3115_v37  ;;  %v3270_v36 = vadd.f32 %v7568_v8, %v3116_v62 }
 0x516   :  { %3323 = vst [vmem:[#allocation2 + $0x120] sm:$0xff] %v3279_v54 }
 0x517   :  { %3324 = vst.msk [vmem:[#allocation2 + $0x128] sm:$0xff] %vm2384_vm1, %v3280_v30 }
 0x518   :  { %3313 = vst [vmem:[#allocation2 + $0xd0] sm:$0xff] %v3269_v19 }
 0x519   :  { %3314 = vst.msk [vmem:[#allocation2 + $0xd8] sm:$0xff] %vm2384_vm1, %v3270_v36  ;;  %v3062_v5 = vpop.permute.xlu1 %3061 }
 0x51a   :  { %v3121_v50 = vmul.f32 %v3062_v5, %v7569_v43  ;;  %v3122_v49 = vmul.f32 %v3062_v5, %v7570_v15 }
 0x51c   :  { %v3275_v42 = vadd.f32 %v7571_v32, %v3121_v50  ;;  %v3276_v12 = vadd.f32 %v7571_v32, %v3122_v49 }
 0x51e   :  { %3319 = vst [vmem:[#allocation2 + $0x100] sm:$0xff] %v3275_v42 }
 0x51f   :  { %3320 = vst.msk [vmem:[#allocation2 + $0x108] sm:$0xff] %vm2384_vm1, %v3276_v12 }
 0x521   :  { %v3067_v47 = vpop.permute.xlu0 %3066 }
 0x522   :  { %v3123_v9 = vmul.f32 %v3067_v47, %v7572_v22  ;;  %v3124_v34 = vmul.f32 %v3067_v47, %v7573_v24 }
 0x524   :  { %v3277_v59 = vadd.f32 %v7574_v44, %v3123_v9  ;;  %v3278_v0 = vadd.f32 %v7574_v44, %v3124_v34 }
 0x526   :  { %3321 = vst [vmem:[#allocation2 + $0x110] sm:$0xff] %v3277_v59 }
 0x527   :  { %3322 = vst.msk [vmem:[#allocation2 + $0x118] sm:$0xff] %vm2384_vm1, %v3278_v0 }
 0x554   :  { %v3087_v17 = vpop.permute.xlu2 %3086 }
 0x555   :  { %v3131_v39 = vmul.f32 %v3087_v17, %v7579_v53  ;;  %v3132_v51 = vmul.f32 %v3087_v17, %v7580_v20 }
 0x55a   :  { %v3077_v57 = vpop.permute.xlu1 %3076 }
 0x55b   :  { %v3127_v4 = vmul.f32 %v3077_v57, %v7575_v25  ;;  %v3128_v38 = vmul.f32 %v3077_v57, %v7576_v41 }
 0x55d   :  { %v3231_v48 = vpop.permute.xlu2 %3230 }
 0x55e   :  { %v3281_v45 = vadd.f32 %v3231_v48, %v3127_v4  ;;  %v3282_v14 = vadd.f32 %v3231_v48, %v3128_v38 }
 0x560   :  { %3325 = vst [vmem:[#allocation2 + $0x130] sm:$0xff] %v3281_v45  ;;  %v3082_v52 = vpop.permute.xlu0 %3081 }
 0x561   :  { %3326 = vst.msk [vmem:[#allocation2 + $0x138] sm:$0xff] %vm2384_vm1, %v3282_v14  ;;  %v3129_v18 = vmul.f32 %v3082_v52, %v7577_v1  ;;  %v3130_v10 = vmul.f32 %v3082_v52, %v7578_v61 }
 0x563   :  { %v3236_v16 = vpop.permute.xlu1 %3235 }
 0x564   :  { %v3283_v40 = vadd.f32 %v3236_v16, %v3129_v18  ;;  %v3284_v11 = vadd.f32 %v3236_v16, %v3130_v10 }
 0x566   :  { %3327 = vst [vmem:[#allocation2 + $0x140] sm:$0xff] %v3283_v40 }
 0x567   :  { %3328 = vst.msk [vmem:[#allocation2 + $0x148] sm:$0xff] %vm2384_vm1, %v3284_v11 }
 0x569   :  { %v3241_v26 = vpop.permute.xlu0 %3240 }
 0x56a   :  { %v3285_v58 = vadd.f32 %v3241_v26, %v3131_v39  ;;  %v3286_v46 = vadd.f32 %v3241_v26, %v3132_v51 }
 0x56c   :  { %3329 = vst [vmem:[#allocation2 + $0x150] sm:$0xff] %v3285_v58 }
 0x56d   :  { %3330 = vst.msk [vmem:[#allocation2 + $0x158] sm:$0xff] %vm2384_vm1, %v3286_v46 }
 0x56e   :  { %3343 = dma.vmem_to_hbm [thread:$0]  %s3336_s18, 5632, %s3338_s21, [#allocation3], %s3531_s22, %s3531_s22, %s3532_s0  }
 0x56f   :  { %3526 = dma.done.wait [#allocation3], 5632  }
 0x570   :  { %3527 = vsyncadd [#allocation3], 4294961664 }
 0x571   :  { %3348 = vsyncpa [#allocation3], 1 }

</bundles_post_ra>
